<compile_context>
chip_gen: v7x
topology: tpu7x:2x2x1
jax: 0.10.0
libtpu: 0.0.40
codegen_flags: <defaults>
</compile_context>

<pallas_src>
import functools
import math

import jax
import jax.numpy as jnp
from jax.experimental import pallas as pl
from jax.experimental.pallas import tpu as pltpu

EPS = 1e-5  # nn.LayerNorm default


# ---------------------------------------------------------------------------
# In-kernel building blocks
# ---------------------------------------------------------------------------
def _layernorm(h, w, b):
    # h: [N, D] (f32), w/b: [1, D]
    mu = jnp.mean(h, axis=-1, keepdims=True)
    var = jnp.mean(jnp.square(h - mu), axis=-1, keepdims=True)
    return (h - mu) * jax.lax.rsqrt(var + EPS) * w + b


# ---------------------------------------------------------------------------
# The fused kernel (one batch-block per grid step)
# ---------------------------------------------------------------------------
def fusion_kernel(
    x_ref, cond_ref,
    ln1_w, ln1_b, ln2_w, ln2_b, ln3_w, ln3_b,
    sa_wqkv, sa_bqkv, sa_wo, sa_bo,
    ca_wq, ca_bq, ca_wkv, ca_bkv, ca_wo, ca_bo,
    ff_w1, ff_b1, ff_w2, ff_b2,
    out_ref,
    *, num_heads, head_dim, dot_dtype,
):
    TB, L, D = x_ref.shape
    S = cond_ref.shape[1]

    # Fold the batch block into the matmul row (sublane) dimension.
    x = x_ref[...].reshape(TB * L, D).astype(jnp.float32)
    cond = cond_ref[...].reshape(TB * S, D).astype(jnp.float32)

    def mm(a, b):
        # MXU matmul; operands optionally bf16, accumulation always f32.
        return jnp.dot(a.astype(dot_dtype), b.astype(dot_dtype),
                       preferred_element_type=jnp.float32)

    def attend(q, k, v, skv):
        # q: [TB*L, D] (scale already folded into the Q weights), k/v: [TB*skv, D].
        # Projections are already fused; only the intrinsically tiny per-head
        # score / softmax / AV step remains, batched over the batch dim.
        q3 = q.reshape(TB, L, D)
        k3 = k.reshape(TB, skv, D)
        v3 = v.reshape(TB, skv, D)
        outs = []
        for h in range(num_heads):  # small static unroll over heads
            sl = slice(h * head_dim, (h + 1) * head_dim)
            s = jnp.einsum(
                "bld,bsd->bls",
                q3[:, :, sl].astype(dot_dtype),
                k3[:, :, sl].astype(dot_dtype),
                preferred_element_type=jnp.float32,
            )  # [TB, L, skv]
            s = s - jnp.max(s, axis=-1, keepdims=True)
            e = jnp.exp(s)
            inv = pl.reciprocal(jnp.sum(e, axis=-1, keepdims=True), approx=True)
            p = e * inv
            outs.append(jnp.einsum(
                "bls,bsd->bld",
                p.astype(dot_dtype),
                v3[:, :, sl].astype(dot_dtype),
                preferred_element_type=jnp.float32,
            ))  # [TB, L, hd]
        return jnp.concatenate(outs, axis=-1).reshape(TB * L, D)

    # ---- block 1: pre-LN self attention + residual ----
    h1 = _layernorm(x, ln1_w[...], ln1_b[...])
    qkv = mm(h1, sa_wqkv[...]) + sa_bqkv[...]              # [TB*L, 3D], one fused matmul
    o = attend(qkv[:, :D], qkv[:, D:2 * D], qkv[:, 2 * D:], L)
    x = x + mm(o, sa_wo[...]) + sa_bo[...]

    # ---- block 2: pre-LN cross attention (K/V = Cond_Temp) + residual ----
    h2 = _layernorm(x, ln2_w[...], ln2_b[...])
    q = mm(h2, ca_wq[...]) + ca_bq[...]                    # [TB*L, D]
    kv = mm(cond, ca_wkv[...]) + ca_bkv[...]               # [TB*S, 2D], fused K/V matmul
    o = attend(q, kv[:, :D], kv[:, D:], S)
    x = x + mm(o, ca_wo[...]) + ca_bo[...]

    # ---- block 3: pre-LN feed-forward (Linear -> ReLU -> Linear) + residual ----
    # TODO(synk): dropout layers are inference-mode identities here.
    h3 = _layernorm(x, ln3_w[...], ln3_b[...])
    ff = jnp.maximum(mm(h3, ff_w1[...]) + ff_b1[...], 0.0)
    ff = mm(ff, ff_w2[...]) + ff_b2[...]
    x = x + ff

    out_ref[...] = x.reshape(TB, L, D).astype(out_ref.dtype)


PARAM_NAMES = (
    "ln1_w", "ln1_b", "ln2_w", "ln2_b", "ln3_w", "ln3_b",
    "sa_wqkv", "sa_bqkv", "sa_wo", "sa_bo",
    "ca_wq", "ca_bq", "ca_wkv", "ca_bkv", "ca_wo", "ca_bo",
    "ff_w1", "ff_b1", "ff_w2", "ff_b2",
)


def cross_modal_fusion(x_vis, cond_temp, packed_params, *, num_heads,
                       batch_block=None, dot_dtype=jnp.float32):
    B, L, D = x_vis.shape
    S = cond_temp.shape[1]
    head_dim = D // num_heads
    TB = B if batch_block is None else batch_block
    assert B % TB == 0, "batch_block must divide the batch"
    plist = [packed_params[n] for n in PARAM_NAMES]

    def full_spec(arr):
        nd = arr.ndim
        return pl.BlockSpec(arr.shape, lambda b, nd=nd: (0,) * nd)

    in_specs = [
        pl.BlockSpec((TB, L, D), lambda b: (b, 0, 0)),
        pl.BlockSpec((TB, S, D), lambda b: (b, 0, 0)),
    ] + [full_spec(a) for a in plist]

    return pl.pallas_call(
        functools.partial(fusion_kernel, num_heads=num_heads,
                          head_dim=head_dim, dot_dtype=dot_dtype),
        out_shape=jax.ShapeDtypeStruct((B, L, D), jnp.float32),
        grid=(B // TB,),
        in_specs=in_specs,
        out_specs=pl.BlockSpec((TB, L, D), lambda b: (b, 0, 0)),
        compiler_params=pltpu.CompilerParams(dimension_semantics=("parallel",)),
    )(x_vis, cond_temp, *plist)


# ---------------------------------------------------------------------------
# Host-side weight packing (one-time transform): fuse projections, fold the
# 1/sqrt(head_dim) scale into the Q weights/bias, make everything lane-dense.
# ---------------------------------------------------------------------------
def pack_params(p, num_heads, embed_dim):
    scale = 1.0 / math.sqrt(embed_dim // num_heads)
    r = lambda v: v.reshape(1, -1)
    return {
        "ln1_w": r(p["ln1_w"]), "ln1_b": r(p["ln1_b"]),
        "ln2_w": r(p["ln2_w"]), "ln2_b": r(p["ln2_b"]),
        "ln3_w": r(p["ln3_w"]), "ln3_b": r(p["ln3_b"]),
        "sa_wqkv": jnp.concatenate([p["sa_wq"] * scale, p["sa_wk"], p["sa_wv"]], axis=1),
        "sa_bqkv": r(jnp.concatenate([p["sa_bq"] * scale, p["sa_bk"], p["sa_bv"]])),
        "sa_wo": p["sa_wo"], "sa_bo": r(p["sa_bo"]),
        "ca_wq": p["ca_wq"] * scale, "ca_bq": r(p["ca_bq"] * scale),
        "ca_wkv": jnp.concatenate([p["ca_wk"], p["ca_wv"]], axis=1),
        "ca_bkv": r(jnp.concatenate([p["ca_bk"], p["ca_bv"]])),
        "ca_wo": p["ca_wo"], "ca_bo": r(p["ca_bo"]),
        "ff_w1": p["ff_w1"], "ff_b1": r(p["ff_b1"]),
        "ff_w2": p["ff_w2"], "ff_b2": r(p["ff_b2"]),
    }


# ---------------------------------------------------------------------------
# Pure-JAX reference (mirrors torch.nn.MultiheadAttention eval-mode semantics)
# ---------------------------------------------------------------------------
def _ref_ln(h, w, b):
    mu = jnp.mean(h, axis=-1, keepdims=True)
    var = jnp.mean(jnp.square(h - mu), axis=-1, keepdims=True)
    return (h - mu) / jnp.sqrt(var + EPS) * w + b


def _ref_mha(q_in, kv_in, wq, bq, wk, bk, wv, bv, wo, bo, num_heads):
    B, L, D = q_in.shape
    S = kv_in.shape[1]
    hd = D // num_heads
    q = q_in @ wq + bq
    k = kv_in @ wk + bk
    v = kv_in @ wv + bv
    qh = q.reshape(B, L, num_heads, hd)
    kh = k.reshape(B, S, num_heads, hd)
    vh = v.reshape(B, S, num_heads, hd)
    s = jnp.einsum("blhd,bshd->bhls", qh, kh) / math.sqrt(hd)
    a = jax.nn.softmax(s, axis=-1)
    o = jnp.einsum("bhls,bshd->blhd", a, vh).reshape(B, L, D)
    return o @ wo + bo


def ref_forward(x, cond, p, num_heads):
    h = _ref_ln(x, p["ln1_w"], p["ln1_b"])
    x = x + _ref_mha(h, h, p["sa_wq"], p["sa_bq"], p["sa_wk"], p["sa_bk"],
                     p["sa_wv"], p["sa_bv"], p["sa_wo"], p["sa_bo"], num_heads)
    h = _ref_ln(x, p["ln2_w"], p["ln2_b"])
    x = x + _ref_mha(h, cond, p["ca_wq"], p["ca_bq"], p["ca_wk"], p["ca_bk"],
                     p["ca_wv"], p["ca_bv"], p["ca_wo"], p["ca_bo"], num_heads)
    h = _ref_ln(x, p["ln3_w"], p["ln3_b"])
    ff = jnp.maximum(h @ p["ff_w1"] + p["ff_b1"], 0.0)
    ff = ff @ p["ff_w2"] + p["ff_b2"]
    return x + ff


# ---------------------------------------------------------------------------
def make_params(key, D):
    ks = jax.random.split(key, 40)

    def nrm(k, shape, scale):
        return scale * jax.random.normal(k, shape, jnp.float32)

    i = iter(range(40))
    p = {
        "ln1_w": jnp.ones((D,), jnp.float32) + nrm(ks[next(i)], (D,), 0.02),
        "ln1_b": nrm(ks[next(i)], (D,), 0.02),
        "ln2_w": jnp.ones((D,), jnp.float32) + nrm(ks[next(i)], (D,), 0.02),
        "ln2_b": nrm(ks[next(i)], (D,), 0.02),
        "ln3_w": jnp.ones((D,), jnp.float32) + nrm(ks[next(i)], (D,), 0.02),
        "ln3_b": nrm(ks[next(i)], (D,), 0.02),
        "sa_wq": nrm(ks[next(i)], (D, D), 0.08), "sa_bq": nrm(ks[next(i)], (D,), 0.02),
        "sa_wk": nrm(ks[next(i)], (D, D), 0.08), "sa_bk": nrm(ks[next(i)], (D,), 0.02),
        "sa_wv": nrm(ks[next(i)], (D, D), 0.08), "sa_bv": nrm(ks[next(i)], (D,), 0.02),
        "sa_wo": nrm(ks[next(i)], (D, D), 0.08), "sa_bo": nrm(ks[next(i)], (D,), 0.02),
        "ca_wq": nrm(ks[next(i)], (D, D), 0.08), "ca_bq": nrm(ks[next(i)], (D,), 0.02),
        "ca_wk": nrm(ks[next(i)], (D, D), 0.08), "ca_bk": nrm(ks[next(i)], (D,), 0.02),
        "ca_wv": nrm(ks[next(i)], (D, D), 0.08), "ca_bv": nrm(ks[next(i)], (D,), 0.02),
        "ca_wo": nrm(ks[next(i)], (D, D), 0.08), "ca_bo": nrm(ks[next(i)], (D,), 0.02),
        "ff_w1": nrm(ks[next(i)], (D, 4 * D), 0.05), "ff_b1": nrm(ks[next(i)], (4 * D,), 0.02),
        "ff_w2": nrm(ks[next(i)], (4 * D, D), 0.05), "ff_b2": nrm(ks[next(i)], (D,), 0.02),
    }
    return p


if __name__ == "__main__":
    B, L, S, D, NUM_HEADS = 2, 8, 16, 64, 8

    key = jax.random.PRNGKey(0)
    kx, kc, kp = jax.random.split(key, 3)
    x_vis = jax.random.normal(kx, (B, L, D), jnp.float32)        # query stream
    cond_temp = jax.random.normal(kc, (B, S, D), jnp.float32)    # temporal condition
    # Cond_Text is accepted by the PyTorch forward but never used -> omitted.
    params = make_params(kp, D)
    packed = pack_params(params, NUM_HEADS, D)                   # one-time host transform

    # f32 MXU path (safe on v5e; pass dot_dtype=jnp.bfloat16 on v6e/v7x).
    out = cross_modal_fusion(x_vis, cond_temp, packed, num_heads=NUM_HEADS,
                             dot_dtype=jnp.float32)
    out = jax.block_until_ready(out)

    ref = jax.block_until_ready(ref_forward(x_vis, cond_temp, params, NUM_HEADS))
    if not jnp.allclose(out, ref, rtol=2e-2, atol=2e-2):
        max_err = float(jnp.max(jnp.abs(out - ref)))
        raise AssertionError(f"Pallas output mismatch vs reference, max|err|={max_err}")

    print("KERNEL_OK")
</pallas_src>

<mosaic_0001>
module attributes {stable_mosaic.version = 11 : i64} {
  func.func @fusion_kernel(%arg0: i32, %arg1: memref<2x8x64xf32, #tpu.memory_space<vmem>>, %arg2: memref<2x16x64xf32, #tpu.memory_space<vmem>>, %arg3: memref<1x64xf32, #tpu.memory_space<vmem>>, %arg4: memref<1x64xf32, #tpu.memory_space<vmem>>, %arg5: memref<1x64xf32, #tpu.memory_space<vmem>>, %arg6: memref<1x64xf32, #tpu.memory_space<vmem>>, %arg7: memref<1x64xf32, #tpu.memory_space<vmem>>, %arg8: memref<1x64xf32, #tpu.memory_space<vmem>>, %arg9: memref<64x192xf32, #tpu.memory_space<vmem>>, %arg10: memref<1x192xf32, #tpu.memory_space<vmem>>, %arg11: memref<64x64xf32, #tpu.memory_space<vmem>>, %arg12: memref<1x64xf32, #tpu.memory_space<vmem>>, %arg13: memref<64x64xf32, #tpu.memory_space<vmem>>, %arg14: memref<1x64xf32, #tpu.memory_space<vmem>>, %arg15: memref<64x128xf32, #tpu.memory_space<vmem>>, %arg16: memref<1x128xf32, #tpu.memory_space<vmem>>, %arg17: memref<64x64xf32, #tpu.memory_space<vmem>>, %arg18: memref<1x64xf32, #tpu.memory_space<vmem>>, %arg19: memref<64x256xf32, #tpu.memory_space<vmem>>, %arg20: memref<1x256xf32, #tpu.memory_space<vmem>>, %arg21: memref<256x64xf32, #tpu.memory_space<vmem>>, %arg22: memref<1x64xf32, #tpu.memory_space<vmem>>, %arg23: memref<2x8x64xf32, #tpu.memory_space<vmem>>) attributes {dimension_semantics = [#tpu.dimension_semantics<parallel>], iteration_bounds = array<i64: 1>, scalar_prefetch = 0 : i64, scratch_operands = 0 : i64, tpu.core_type = #tpu.core_type<tc>, window_params = [{transform_indices = @transform_0, window_bounds = array<i64: 2, 8, 64>}, {transform_indices = @transform_1, window_bounds = array<i64: 2, 16, 64>}, {pipeline_mode = #tpu.pipeline_mode<synchronous>, transform_indices = @transform_2, window_bounds = array<i64: 1, 64>}, {pipeline_mode = #tpu.pipeline_mode<synchronous>, transform_indices = @transform_3, window_bounds = array<i64: 1, 64>}, {pipeline_mode = #tpu.pipeline_mode<synchronous>, transform_indices = @transform_4, window_bounds = array<i64: 1, 64>}, {pipeline_mode = #tpu.pipeline_mode<synchronous>, transform_indices = @transform_5, window_bounds = array<i64: 1, 64>}, {pipeline_mode = #tpu.pipeline_mode<synchronous>, transform_indices = @transform_6, window_bounds = array<i64: 1, 64>}, {pipeline_mode = #tpu.pipeline_mode<synchronous>, transform_indices = @transform_7, window_bounds = array<i64: 1, 64>}, {pipeline_mode = #tpu.pipeline_mode<synchronous>, transform_indices = @transform_8, window_bounds = array<i64: 64, 192>}, {pipeline_mode = #tpu.pipeline_mode<synchronous>, transform_indices = @transform_9, window_bounds = array<i64: 1, 192>}, {pipeline_mode = #tpu.pipeline_mode<synchronous>, transform_indices = @transform_10, window_bounds = array<i64: 64, 64>}, {pipeline_mode = #tpu.pipeline_mode<synchronous>, transform_indices = @transform_11, window_bounds = array<i64: 1, 64>}, {pipeline_mode = #tpu.pipeline_mode<synchronous>, transform_indices = @transform_12, window_bounds = array<i64: 64, 64>}, {pipeline_mode = #tpu.pipeline_mode<synchronous>, transform_indices = @transform_13, window_bounds = array<i64: 1, 64>}, {pipeline_mode = #tpu.pipeline_mode<synchronous>, transform_indices = @transform_14, window_bounds = array<i64: 64, 128>}, {pipeline_mode = #tpu.pipeline_mode<synchronous>, transform_indices = @transform_15, window_bounds = array<i64: 1, 128>}, {pipeline_mode = #tpu.pipeline_mode<synchronous>, transform_indices = @transform_16, window_bounds = array<i64: 64, 64>}, {pipeline_mode = #tpu.pipeline_mode<synchronous>, transform_indices = @transform_17, window_bounds = array<i64: 1, 64>}, {pipeline_mode = #tpu.pipeline_mode<synchronous>, transform_indices = @transform_18, window_bounds = array<i64: 64, 256>}, {pipeline_mode = #tpu.pipeline_mode<synchronous>, transform_indices = @transform_19, window_bounds = array<i64: 1, 256>}, {pipeline_mode = #tpu.pipeline_mode<synchronous>, transform_indices = @transform_20, window_bounds = array<i64: 256, 64>}, {pipeline_mode = #tpu.pipeline_mode<synchronous>, transform_indices = @transform_21, window_bounds = array<i64: 1, 64>}, {transform_indices = @transform_22, window_bounds = array<i64: 2, 8, 64>}]} {
    %c0 = arith.constant 0 : index
    %c0_0 = arith.constant 0 : index
    %c0_1 = arith.constant 0 : index
    %0 = vector.load %arg1[%c0, %c0_0, %c0_1] : memref<2x8x64xf32, #tpu.memory_space<vmem>>, vector<2x8x64xf32>
    %1 = vector.shape_cast %0 : vector<2x8x64xf32> to vector<16x64xf32>
    %c0_2 = arith.constant 0 : index
    %c0_3 = arith.constant 0 : index
    %c0_4 = arith.constant 0 : index
    %2 = vector.load %arg2[%c0_2, %c0_3, %c0_4] : memref<2x16x64xf32, #tpu.memory_space<vmem>>, vector<2x16x64xf32>
    %3 = vector.shape_cast %2 : vector<2x16x64xf32> to vector<32x64xf32>
    %c0_5 = arith.constant 0 : index
    %c0_6 = arith.constant 0 : index
    %4 = vector.load %arg3[%c0_5, %c0_6] : memref<1x64xf32, #tpu.memory_space<vmem>>, vector<1x64xf32>
    %c0_7 = arith.constant 0 : index
    %c0_8 = arith.constant 0 : index
    %5 = vector.load %arg4[%c0_7, %c0_8] : memref<1x64xf32, #tpu.memory_space<vmem>>, vector<1x64xf32>
    %cst = arith.constant dense<0.000000e+00> : vector<16xf32>
    %6 = vector.multi_reduction <add>, %1, %cst [1] : vector<16x64xf32> to vector<16xf32>
    %7 = vector.shape_cast %6 : vector<16xf32> to vector<16x1xf32>
    %cst_9 = arith.constant 6.400000e+01 : f32
    %8 = vector.broadcast %cst_9 : f32 to vector<16x1xf32>
    %9 = arith.divf %7, %8 : vector<16x1xf32>
    %10 = vector.broadcast %9 : vector<16x1xf32> to vector<16x64xf32>
    %11 = arith.subf %1, %10 : vector<16x64xf32>
    %12 = arith.mulf %11, %11 : vector<16x64xf32>
    %cst_10 = arith.constant dense<0.000000e+00> : vector<16xf32>
    %13 = vector.multi_reduction <add>, %12, %cst_10 [1] : vector<16x64xf32> to vector<16xf32>
    %14 = vector.shape_cast %13 : vector<16xf32> to vector<16x1xf32>
    %cst_11 = arith.constant 6.400000e+01 : f32
    %15 = vector.broadcast %cst_11 : f32 to vector<16x1xf32>
    %16 = arith.divf %14, %15 : vector<16x1xf32>
    %17 = vector.broadcast %9 : vector<16x1xf32> to vector<16x64xf32>
    %18 = arith.subf %1, %17 : vector<16x64xf32>
    %cst_12 = arith.constant 9.99999974E-6 : f32
    %19 = vector.broadcast %cst_12 : f32 to vector<16x1xf32>
    %20 = arith.addf %16, %19 : vector<16x1xf32>
    %21 = math.rsqrt %20 : vector<16x1xf32>
    %22 = vector.broadcast %21 : vector<16x1xf32> to vector<16x64xf32>
    %23 = arith.mulf %18, %22 : vector<16x64xf32>
    %24 = vector.broadcast %4 : vector<1x64xf32> to vector<16x64xf32>
    %25 = arith.mulf %23, %24 : vector<16x64xf32>
    %26 = vector.broadcast %5 : vector<1x64xf32> to vector<16x64xf32>
    %27 = arith.addf %25, %26 : vector<16x64xf32>
    %c0_13 = arith.constant 0 : index
    %c0_14 = arith.constant 0 : index
    %28 = vector.load %arg9[%c0_13, %c0_14] : memref<64x192xf32, #tpu.memory_space<vmem>>, vector<64x192xf32>
    %cst_15 = arith.constant dense<0.000000e+00> : vector<16x192xf32>
    %29 = tpu.matmul %27, %28, %cst_15 {dimension_numbers = #tpu.dot_dimension_numbers<[1], [0], [0], [1], [0, 0, 1, 1], [], []>} : vector<16x64xf32>, vector<64x192xf32>, vector<16x192xf32> -> vector<16x192xf32>
    %c0_16 = arith.constant 0 : index
    %c0_17 = arith.constant 0 : index
    %30 = vector.load %arg10[%c0_16, %c0_17] : memref<1x192xf32, #tpu.memory_space<vmem>>, vector<1x192xf32>
    %31 = vector.broadcast %30 : vector<1x192xf32> to vector<16x192xf32>
    %32 = arith.addf %29, %31 : vector<16x192xf32>
    %33 = vector.extract_strided_slice %32 {offsets = [0, 0], sizes = [16, 64], strides = [1, 1]} : vector<16x192xf32> to vector<16x64xf32>
    %34 = vector.extract_strided_slice %32 {offsets = [0, 64], sizes = [16, 64], strides = [1, 1]} : vector<16x192xf32> to vector<16x64xf32>
    %35 = vector.extract_strided_slice %32 {offsets = [0, 128], sizes = [16, 64], strides = [1, 1]} : vector<16x192xf32> to vector<16x64xf32>
    %36 = vector.shape_cast %33 : vector<16x64xf32> to vector<2x8x64xf32>
    %37 = vector.shape_cast %34 : vector<16x64xf32> to vector<2x8x64xf32>
    %38 = vector.shape_cast %35 : vector<16x64xf32> to vector<2x8x64xf32>
    %39 = vector.extract_strided_slice %36 {offsets = [0, 0, 0], sizes = [2, 8, 8], strides = [1, 1, 1]} : vector<2x8x64xf32> to vector<2x8x8xf32>
    %40 = vector.extract_strided_slice %37 {offsets = [0, 0, 0], sizes = [2, 8, 8], strides = [1, 1, 1]} : vector<2x8x64xf32> to vector<2x8x8xf32>
    "tpu.trace_start"() <{level = 10 : i32, message = "bld,bsd->bls"}> : () -> ()
    %cst_18 = arith.constant dense<0.000000e+00> : vector<2x8x8xf32>
    %41 = tpu.matmul %39, %40, %cst_18 {dimension_numbers = #tpu.dot_dimension_numbers<[2], [2], [1], [1], [0, 0, 0, 1, 1, 1], [0], [0]>} : vector<2x8x8xf32>, vector<2x8x8xf32>, vector<2x8x8xf32> -> vector<2x8x8xf32>
    "tpu.trace_stop"() : () -> ()
    %cst_19 = arith.constant dense<0xFF800000> : vector<2x8xf32>
    %42 = vector.multi_reduction <maximumf>, %41, %cst_19 [2] : vector<2x8x8xf32> to vector<2x8xf32>
    %43 = vector.shape_cast %42 : vector<2x8xf32> to vector<2x8x1xf32>
    %44 = vector.broadcast %43 : vector<2x8x1xf32> to vector<2x8x8xf32>
    %45 = arith.subf %41, %44 : vector<2x8x8xf32>
    %46 = math.exp %45 : vector<2x8x8xf32>
    %cst_20 = arith.constant dense<0.000000e+00> : vector<2x8xf32>
    %47 = vector.multi_reduction <add>, %46, %cst_20 [2] : vector<2x8x8xf32> to vector<2x8xf32>
    %48 = vector.shape_cast %47 : vector<2x8xf32> to vector<2x8x1xf32>
    %49 = tpu.reciprocal %48 {approx = true} : vector<2x8x1xf32> -> vector<2x8x1xf32>
    %50 = vector.broadcast %49 : vector<2x8x1xf32> to vector<2x8x8xf32>
    %51 = arith.mulf %46, %50 : vector<2x8x8xf32>
    %52 = vector.extract_strided_slice %38 {offsets = [0, 0, 0], sizes = [2, 8, 8], strides = [1, 1, 1]} : vector<2x8x64xf32> to vector<2x8x8xf32>
    "tpu.trace_start"() <{level = 10 : i32, message = "bls,bsd->bld"}> : () -> ()
    %cst_21 = arith.constant dense<0.000000e+00> : vector<2x8x8xf32>
    %53 = tpu.matmul %51, %52, %cst_21 {dimension_numbers = #tpu.dot_dimension_numbers<[2], [1], [1], [2], [0, 0, 0, 1, 1, 2], [0], [0]>} : vector<2x8x8xf32>, vector<2x8x8xf32>, vector<2x8x8xf32> -> vector<2x8x8xf32>
    "tpu.trace_stop"() : () -> ()
    %54 = vector.extract_strided_slice %36 {offsets = [0, 0, 8], sizes = [2, 8, 8], strides = [1, 1, 1]} : vector<2x8x64xf32> to vector<2x8x8xf32>
    %55 = vector.extract_strided_slice %37 {offsets = [0, 0, 8], sizes = [2, 8, 8], strides = [1, 1, 1]} : vector<2x8x64xf32> to vector<2x8x8xf32>
    "tpu.trace_start"() <{level = 10 : i32, message = "bld,bsd->bls"}> : () -> ()
    %cst_22 = arith.constant dense<0.000000e+00> : vector<2x8x8xf32>
    %56 = tpu.matmul %54, %55, %cst_22 {dimension_numbers = #tpu.dot_dimension_numbers<[2], [2], [1], [1], [0, 0, 0, 1, 1, 1], [0], [0]>} : vector<2x8x8xf32>, vector<2x8x8xf32>, vector<2x8x8xf32> -> vector<2x8x8xf32>
    "tpu.trace_stop"() : () -> ()
    %cst_23 = arith.constant dense<0xFF800000> : vector<2x8xf32>
    %57 = vector.multi_reduction <maximumf>, %56, %cst_23 [2] : vector<2x8x8xf32> to vector<2x8xf32>
    %58 = vector.shape_cast %57 : vector<2x8xf32> to vector<2x8x1xf32>
    %59 = vector.broadcast %58 : vector<2x8x1xf32> to vector<2x8x8xf32>
    %60 = arith.subf %56, %59 : vector<2x8x8xf32>
    %61 = math.exp %60 : vector<2x8x8xf32>
    %cst_24 = arith.constant dense<0.000000e+00> : vector<2x8xf32>
    %62 = vector.multi_reduction <add>, %61, %cst_24 [2] : vector<2x8x8xf32> to vector<2x8xf32>
    %63 = vector.shape_cast %62 : vector<2x8xf32> to vector<2x8x1xf32>
    %64 = tpu.reciprocal %63 {approx = true} : vector<2x8x1xf32> -> vector<2x8x1xf32>
    %65 = vector.broadcast %64 : vector<2x8x1xf32> to vector<2x8x8xf32>
    %66 = arith.mulf %61, %65 : vector<2x8x8xf32>
    %67 = vector.extract_strided_slice %38 {offsets = [0, 0, 8], sizes = [2, 8, 8], strides = [1, 1, 1]} : vector<2x8x64xf32> to vector<2x8x8xf32>
    "tpu.trace_start"() <{level = 10 : i32, message = "bls,bsd->bld"}> : () -> ()
    %cst_25 = arith.constant dense<0.000000e+00> : vector<2x8x8xf32>
    %68 = tpu.matmul %66, %67, %cst_25 {dimension_numbers = #tpu.dot_dimension_numbers<[2], [1], [1], [2], [0, 0, 0, 1, 1, 2], [0], [0]>} : vector<2x8x8xf32>, vector<2x8x8xf32>, vector<2x8x8xf32> -> vector<2x8x8xf32>
    "tpu.trace_stop"() : () -> ()
    %69 = vector.extract_strided_slice %36 {offsets = [0, 0, 16], sizes = [2, 8, 8], strides = [1, 1, 1]} : vector<2x8x64xf32> to vector<2x8x8xf32>
    %70 = vector.extract_strided_slice %37 {offsets = [0, 0, 16], sizes = [2, 8, 8], strides = [1, 1, 1]} : vector<2x8x64xf32> to vector<2x8x8xf32>
    "tpu.trace_start"() <{level = 10 : i32, message = "bld,bsd->bls"}> : () -> ()
    %cst_26 = arith.constant dense<0.000000e+00> : vector<2x8x8xf32>
    %71 = tpu.matmul %69, %70, %cst_26 {dimension_numbers = #tpu.dot_dimension_numbers<[2], [2], [1], [1], [0, 0, 0, 1, 1, 1], [0], [0]>} : vector<2x8x8xf32>, vector<2x8x8xf32>, vector<2x8x8xf32> -> vector<2x8x8xf32>
    "tpu.trace_stop"() : () -> ()
    %cst_27 = arith.constant dense<0xFF800000> : vector<2x8xf32>
    %72 = vector.multi_reduction <maximumf>, %71, %cst_27 [2] : vector<2x8x8xf32> to vector<2x8xf32>
    %73 = vector.shape_cast %72 : vector<2x8xf32> to vector<2x8x1xf32>
    %74 = vector.broadcast %73 : vector<2x8x1xf32> to vector<2x8x8xf32>
    %75 = arith.subf %71, %74 : vector<2x8x8xf32>
    %76 = math.exp %75 : vector<2x8x8xf32>
    %cst_28 = arith.constant dense<0.000000e+00> : vector<2x8xf32>
    %77 = vector.multi_reduction <add>, %76, %cst_28 [2] : vector<2x8x8xf32> to vector<2x8xf32>
    %78 = vector.shape_cast %77 : vector<2x8xf32> to vector<2x8x1xf32>
    %79 = tpu.reciprocal %78 {approx = true} : vector<2x8x1xf32> -> vector<2x8x1xf32>
    %80 = vector.broadcast %79 : vector<2x8x1xf32> to vector<2x8x8xf32>
    %81 = arith.mulf %76, %80 : vector<2x8x8xf32>
    %82 = vector.extract_strided_slice %38 {offsets = [0, 0, 16], sizes = [2, 8, 8], strides = [1, 1, 1]} : vector<2x8x64xf32> to vector<2x8x8xf32>
    "tpu.trace_start"() <{level = 10 : i32, message = "bls,bsd->bld"}> : () -> ()
    %cst_29 = arith.constant dense<0.000000e+00> : vector<2x8x8xf32>
    %83 = tpu.matmul %81, %82, %cst_29 {dimension_numbers = #tpu.dot_dimension_numbers<[2], [1], [1], [2], [0, 0, 0, 1, 1, 2], [0], [0]>} : vector<2x8x8xf32>, vector<2x8x8xf32>, vector<2x8x8xf32> -> vector<2x8x8xf32>
    "tpu.trace_stop"() : () -> ()
    %84 = vector.extract_strided_slice %36 {offsets = [0, 0, 24], sizes = [2, 8, 8], strides = [1, 1, 1]} : vector<2x8x64xf32> to vector<2x8x8xf32>
    %85 = vector.extract_strided_slice %37 {offsets = [0, 0, 24], sizes = [2, 8, 8], strides = [1, 1, 1]} : vector<2x8x64xf32> to vector<2x8x8xf32>
    "tpu.trace_start"() <{level = 10 : i32, message = "bld,bsd->bls"}> : () -> ()
    %cst_30 = arith.constant dense<0.000000e+00> : vector<2x8x8xf32>
    %86 = tpu.matmul %84, %85, %cst_30 {dimension_numbers = #tpu.dot_dimension_numbers<[2], [2], [1], [1], [0, 0, 0, 1, 1, 1], [0], [0]>} : vector<2x8x8xf32>, vector<2x8x8xf32>, vector<2x8x8xf32> -> vector<2x8x8xf32>
    "tpu.trace_stop"() : () -> ()
    %cst_31 = arith.constant dense<0xFF800000> : vector<2x8xf32>
    %87 = vector.multi_reduction <maximumf>, %86, %cst_31 [2] : vector<2x8x8xf32> to vector<2x8xf32>
    %88 = vector.shape_cast %87 : vector<2x8xf32> to vector<2x8x1xf32>
    %89 = vector.broadcast %88 : vector<2x8x1xf32> to vector<2x8x8xf32>
    %90 = arith.subf %86, %89 : vector<2x8x8xf32>
    %91 = math.exp %90 : vector<2x8x8xf32>
    %cst_32 = arith.constant dense<0.000000e+00> : vector<2x8xf32>
    %92 = vector.multi_reduction <add>, %91, %cst_32 [2] : vector<2x8x8xf32> to vector<2x8xf32>
    %93 = vector.shape_cast %92 : vector<2x8xf32> to vector<2x8x1xf32>
    %94 = tpu.reciprocal %93 {approx = true} : vector<2x8x1xf32> -> vector<2x8x1xf32>
    %95 = vector.broadcast %94 : vector<2x8x1xf32> to vector<2x8x8xf32>
    %96 = arith.mulf %91, %95 : vector<2x8x8xf32>
    %97 = vector.extract_strided_slice %38 {offsets = [0, 0, 24], sizes = [2, 8, 8], strides = [1, 1, 1]} : vector<2x8x64xf32> to vector<2x8x8xf32>
    "tpu.trace_start"() <{level = 10 : i32, message = "bls,bsd->bld"}> : () -> ()
    %cst_33 = arith.constant dense<0.000000e+00> : vector<2x8x8xf32>
    %98 = tpu.matmul %96, %97, %cst_33 {dimension_numbers = #tpu.dot_dimension_numbers<[2], [1], [1], [2], [0, 0, 0, 1, 1, 2], [0], [0]>} : vector<2x8x8xf32>, vector<2x8x8xf32>, vector<2x8x8xf32> -> vector<2x8x8xf32>
    "tpu.trace_stop"() : () -> ()
    %99 = vector.extract_strided_slice %36 {offsets = [0, 0, 32], sizes = [2, 8, 8], strides = [1, 1, 1]} : vector<2x8x64xf32> to vector<2x8x8xf32>
    %100 = vector.extract_strided_slice %37 {offsets = [0, 0, 32], sizes = [2, 8, 8], strides = [1, 1, 1]} : vector<2x8x64xf32> to vector<2x8x8xf32>
    "tpu.trace_start"() <{level = 10 : i32, message = "bld,bsd->bls"}> : () -> ()
    %cst_34 = arith.constant dense<0.000000e+00> : vector<2x8x8xf32>
    %101 = tpu.matmul %99, %100, %cst_34 {dimension_numbers = #tpu.dot_dimension_numbers<[2], [2], [1], [1], [0, 0, 0, 1, 1, 1], [0], [0]>} : vector<2x8x8xf32>, vector<2x8x8xf32>, vector<2x8x8xf32> -> vector<2x8x8xf32>
    "tpu.trace_stop"() : () -> ()
    %cst_35 = arith.constant dense<0xFF800000> : vector<2x8xf32>
    %102 = vector.multi_reduction <maximumf>, %101, %cst_35 [2] : vector<2x8x8xf32> to vector<2x8xf32>
    %103 = vector.shape_cast %102 : vector<2x8xf32> to vector<2x8x1xf32>
    %104 = vector.broadcast %103 : vector<2x8x1xf32> to vector<2x8x8xf32>
    %105 = arith.subf %101, %104 : vector<2x8x8xf32>
    %106 = math.exp %105 : vector<2x8x8xf32>
    %cst_36 = arith.constant dense<0.000000e+00> : vector<2x8xf32>
    %107 = vector.multi_reduction <add>, %106, %cst_36 [2] : vector<2x8x8xf32> to vector<2x8xf32>
    %108 = vector.shape_cast %107 : vector<2x8xf32> to vector<2x8x1xf32>
    %109 = tpu.reciprocal %108 {approx = true} : vector<2x8x1xf32> -> vector<2x8x1xf32>
    %110 = vector.broadcast %109 : vector<2x8x1xf32> to vector<2x8x8xf32>
    %111 = arith.mulf %106, %110 : vector<2x8x8xf32>
    %112 = vector.extract_strided_slice %38 {offsets = [0, 0, 32], sizes = [2, 8, 8], strides = [1, 1, 1]} : vector<2x8x64xf32> to vector<2x8x8xf32>
    "tpu.trace_start"() <{level = 10 : i32, message = "bls,bsd->bld"}> : () -> ()
    %cst_37 = arith.constant dense<0.000000e+00> : vector<2x8x8xf32>
    %113 = tpu.matmul %111, %112, %cst_37 {dimension_numbers = #tpu.dot_dimension_numbers<[2], [1], [1], [2], [0, 0, 0, 1, 1, 2], [0], [0]>} : vector<2x8x8xf32>, vector<2x8x8xf32>, vector<2x8x8xf32> -> vector<2x8x8xf32>
    "tpu.trace_stop"() : () -> ()
    %114 = vector.extract_strided_slice %36 {offsets = [0, 0, 40], sizes = [2, 8, 8], strides = [1, 1, 1]} : vector<2x8x64xf32> to vector<2x8x8xf32>
    %115 = vector.extract_strided_slice %37 {offsets = [0, 0, 40], sizes = [2, 8, 8], strides = [1, 1, 1]} : vector<2x8x64xf32> to vector<2x8x8xf32>
    "tpu.trace_start"() <{level = 10 : i32, message = "bld,bsd->bls"}> : () -> ()
    %cst_38 = arith.constant dense<0.000000e+00> : vector<2x8x8xf32>
    %116 = tpu.matmul %114, %115, %cst_38 {dimension_numbers = #tpu.dot_dimension_numbers<[2], [2], [1], [1], [0, 0, 0, 1, 1, 1], [0], [0]>} : vector<2x8x8xf32>, vector<2x8x8xf32>, vector<2x8x8xf32> -> vector<2x8x8xf32>
    "tpu.trace_stop"() : () -> ()
    %cst_39 = arith.constant dense<0xFF800000> : vector<2x8xf32>
    %117 = vector.multi_reduction <maximumf>, %116, %cst_39 [2] : vector<2x8x8xf32> to vector<2x8xf32>
    %118 = vector.shape_cast %117 : vector<2x8xf32> to vector<2x8x1xf32>
    %119 = vector.broadcast %118 : vector<2x8x1xf32> to vector<2x8x8xf32>
    %120 = arith.subf %116, %119 : vector<2x8x8xf32>
    %121 = math.exp %120 : vector<2x8x8xf32>
    %cst_40 = arith.constant dense<0.000000e+00> : vector<2x8xf32>
    %122 = vector.multi_reduction <add>, %121, %cst_40 [2] : vector<2x8x8xf32> to vector<2x8xf32>
    %123 = vector.shape_cast %122 : vector<2x8xf32> to vector<2x8x1xf32>
    %124 = tpu.reciprocal %123 {approx = true} : vector<2x8x1xf32> -> vector<2x8x1xf32>
    %125 = vector.broadcast %124 : vector<2x8x1xf32> to vector<2x8x8xf32>
    %126 = arith.mulf %121, %125 : vector<2x8x8xf32>
    %127 = vector.extract_strided_slice %38 {offsets = [0, 0, 40], sizes = [2, 8, 8], strides = [1, 1, 1]} : vector<2x8x64xf32> to vector<2x8x8xf32>
    "tpu.trace_start"() <{level = 10 : i32, message = "bls,bsd->bld"}> : () -> ()
    %cst_41 = arith.constant dense<0.000000e+00> : vector<2x8x8xf32>
    %128 = tpu.matmul %126, %127, %cst_41 {dimension_numbers = #tpu.dot_dimension_numbers<[2], [1], [1], [2], [0, 0, 0, 1, 1, 2], [0], [0]>} : vector<2x8x8xf32>, vector<2x8x8xf32>, vector<2x8x8xf32> -> vector<2x8x8xf32>
    "tpu.trace_stop"() : () -> ()
    %129 = vector.extract_strided_slice %36 {offsets = [0, 0, 48], sizes = [2, 8, 8], strides = [1, 1, 1]} : vector<2x8x64xf32> to vector<2x8x8xf32>
    %130 = vector.extract_strided_slice %37 {offsets = [0, 0, 48], sizes = [2, 8, 8], strides = [1, 1, 1]} : vector<2x8x64xf32> to vector<2x8x8xf32>
    "tpu.trace_start"() <{level = 10 : i32, message = "bld,bsd->bls"}> : () -> ()
    %cst_42 = arith.constant dense<0.000000e+00> : vector<2x8x8xf32>
    %131 = tpu.matmul %129, %130, %cst_42 {dimension_numbers = #tpu.dot_dimension_numbers<[2], [2], [1], [1], [0, 0, 0, 1, 1, 1], [0], [0]>} : vector<2x8x8xf32>, vector<2x8x8xf32>, vector<2x8x8xf32> -> vector<2x8x8xf32>
    "tpu.trace_stop"() : () -> ()
    %cst_43 = arith.constant dense<0xFF800000> : vector<2x8xf32>
    %132 = vector.multi_reduction <maximumf>, %131, %cst_43 [2] : vector<2x8x8xf32> to vector<2x8xf32>
    %133 = vector.shape_cast %132 : vector<2x8xf32> to vector<2x8x1xf32>
    %134 = vector.broadcast %133 : vector<2x8x1xf32> to vector<2x8x8xf32>
    %135 = arith.subf %131, %134 : vector<2x8x8xf32>
    %136 = math.exp %135 : vector<2x8x8xf32>
    %cst_44 = arith.constant dense<0.000000e+00> : vector<2x8xf32>
    %137 = vector.multi_reduction <add>, %136, %cst_44 [2] : vector<2x8x8xf32> to vector<2x8xf32>
    %138 = vector.shape_cast %137 : vector<2x8xf32> to vector<2x8x1xf32>
    %139 = tpu.reciprocal %138 {approx = true} : vector<2x8x1xf32> -> vector<2x8x1xf32>
    %140 = vector.broadcast %139 : vector<2x8x1xf32> to vector<2x8x8xf32>
    %141 = arith.mulf %136, %140 : vector<2x8x8xf32>
    %142 = vector.extract_strided_slice %38 {offsets = [0, 0, 48], sizes = [2, 8, 8], strides = [1, 1, 1]} : vector<2x8x64xf32> to vector<2x8x8xf32>
    "tpu.trace_start"() <{level = 10 : i32, message = "bls,bsd->bld"}> : () -> ()
    %cst_45 = arith.constant dense<0.000000e+00> : vector<2x8x8xf32>
    %143 = tpu.matmul %141, %142, %cst_45 {dimension_numbers = #tpu.dot_dimension_numbers<[2], [1], [1], [2], [0, 0, 0, 1, 1, 2], [0], [0]>} : vector<2x8x8xf32>, vector<2x8x8xf32>, vector<2x8x8xf32> -> vector<2x8x8xf32>
    "tpu.trace_stop"() : () -> ()
    %144 = vector.extract_strided_slice %36 {offsets = [0, 0, 56], sizes = [2, 8, 8], strides = [1, 1, 1]} : vector<2x8x64xf32> to vector<2x8x8xf32>
    %145 = vector.extract_strided_slice %37 {offsets = [0, 0, 56], sizes = [2, 8, 8], strides = [1, 1, 1]} : vector<2x8x64xf32> to vector<2x8x8xf32>
    "tpu.trace_start"() <{level = 10 : i32, message = "bld,bsd->bls"}> : () -> ()
    %cst_46 = arith.constant dense<0.000000e+00> : vector<2x8x8xf32>
    %146 = tpu.matmul %144, %145, %cst_46 {dimension_numbers = #tpu.dot_dimension_numbers<[2], [2], [1], [1], [0, 0, 0, 1, 1, 1], [0], [0]>} : vector<2x8x8xf32>, vector<2x8x8xf32>, vector<2x8x8xf32> -> vector<2x8x8xf32>
    "tpu.trace_stop"() : () -> ()
    %cst_47 = arith.constant dense<0xFF800000> : vector<2x8xf32>
    %147 = vector.multi_reduction <maximumf>, %146, %cst_47 [2] : vector<2x8x8xf32> to vector<2x8xf32>
    %148 = vector.shape_cast %147 : vector<2x8xf32> to vector<2x8x1xf32>
    %149 = vector.broadcast %148 : vector<2x8x1xf32> to vector<2x8x8xf32>
    %150 = arith.subf %146, %149 : vector<2x8x8xf32>
    %151 = math.exp %150 : vector<2x8x8xf32>
    %cst_48 = arith.constant dense<0.000000e+00> : vector<2x8xf32>
    %152 = vector.multi_reduction <add>, %151, %cst_48 [2] : vector<2x8x8xf32> to vector<2x8xf32>
    %153 = vector.shape_cast %152 : vector<2x8xf32> to vector<2x8x1xf32>
    %154 = tpu.reciprocal %153 {approx = true} : vector<2x8x1xf32> -> vector<2x8x1xf32>
    %155 = vector.broadcast %154 : vector<2x8x1xf32> to vector<2x8x8xf32>
    %156 = arith.mulf %151, %155 : vector<2x8x8xf32>
    %157 = vector.extract_strided_slice %38 {offsets = [0, 0, 56], sizes = [2, 8, 8], strides = [1, 1, 1]} : vector<2x8x64xf32> to vector<2x8x8xf32>
    "tpu.trace_start"() <{level = 10 : i32, message = "bls,bsd->bld"}> : () -> ()
    %cst_49 = arith.constant dense<0.000000e+00> : vector<2x8x8xf32>
    %158 = tpu.matmul %156, %157, %cst_49 {dimension_numbers = #tpu.dot_dimension_numbers<[2], [1], [1], [2], [0, 0, 0, 1, 1, 2], [0], [0]>} : vector<2x8x8xf32>, vector<2x8x8xf32>, vector<2x8x8xf32> -> vector<2x8x8xf32>
    "tpu.trace_stop"() : () -> ()
    %159 = tpu.concatenate %53, %68, %83, %98, %113, %128, %143, %158 in 2 : vector<2x8x8xf32>, vector<2x8x8xf32>, vector<2x8x8xf32>, vector<2x8x8xf32>, vector<2x8x8xf32>, vector<2x8x8xf32>, vector<2x8x8xf32>, vector<2x8x8xf32> -> vector<2x8x64xf32>
    %160 = vector.shape_cast %159 : vector<2x8x64xf32> to vector<16x64xf32>
    %c0_50 = arith.constant 0 : index
    %c0_51 = arith.constant 0 : index
    %161 = vector.load %arg11[%c0_50, %c0_51] : memref<64x64xf32, #tpu.memory_space<vmem>>, vector<64x64xf32>
    %cst_52 = arith.constant dense<0.000000e+00> : vector<16x64xf32>
    %162 = tpu.matmul %160, %161, %cst_52 {dimension_numbers = #tpu.dot_dimension_numbers<[1], [0], [0], [1], [0, 0, 1, 1], [], []>} : vector<16x64xf32>, vector<64x64xf32>, vector<16x64xf32> -> vector<16x64xf32>
    %163 = arith.addf %1, %162 : vector<16x64xf32>
    %c0_53 = arith.constant 0 : index
    %c0_54 = arith.constant 0 : index
    %164 = vector.load %arg12[%c0_53, %c0_54] : memref<1x64xf32, #tpu.memory_space<vmem>>, vector<1x64xf32>
    %165 = vector.broadcast %164 : vector<1x64xf32> to vector<16x64xf32>
    %166 = arith.addf %163, %165 : vector<16x64xf32>
    %c0_55 = arith.constant 0 : index
    %c0_56 = arith.constant 0 : index
    %167 = vector.load %arg5[%c0_55, %c0_56] : memref<1x64xf32, #tpu.memory_space<vmem>>, vector<1x64xf32>
    %c0_57 = arith.constant 0 : index
    %c0_58 = arith.constant 0 : index
    %168 = vector.load %arg6[%c0_57, %c0_58] : memref<1x64xf32, #tpu.memory_space<vmem>>, vector<1x64xf32>
    %cst_59 = arith.constant dense<0.000000e+00> : vector<16xf32>
    %169 = vector.multi_reduction <add>, %166, %cst_59 [1] : vector<16x64xf32> to vector<16xf32>
    %170 = vector.shape_cast %169 : vector<16xf32> to vector<16x1xf32>
    %cst_60 = arith.constant 6.400000e+01 : f32
    %171 = vector.broadcast %cst_60 : f32 to vector<16x1xf32>
    %172 = arith.divf %170, %171 : vector<16x1xf32>
    %173 = vector.broadcast %172 : vector<16x1xf32> to vector<16x64xf32>
    %174 = arith.subf %166, %173 : vector<16x64xf32>
    %175 = arith.mulf %174, %174 : vector<16x64xf32>
    %cst_61 = arith.constant dense<0.000000e+00> : vector<16xf32>
    %176 = vector.multi_reduction <add>, %175, %cst_61 [1] : vector<16x64xf32> to vector<16xf32>
    %177 = vector.shape_cast %176 : vector<16xf32> to vector<16x1xf32>
    %cst_62 = arith.constant 6.400000e+01 : f32
    %178 = vector.broadcast %cst_62 : f32 to vector<16x1xf32>
    %179 = arith.divf %177, %178 : vector<16x1xf32>
    %180 = vector.broadcast %172 : vector<16x1xf32> to vector<16x64xf32>
    %181 = arith.subf %166, %180 : vector<16x64xf32>
    %cst_63 = arith.constant 9.99999974E-6 : f32
    %182 = vector.broadcast %cst_63 : f32 to vector<16x1xf32>
    %183 = arith.addf %179, %182 : vector<16x1xf32>
    %184 = math.rsqrt %183 : vector<16x1xf32>
    %185 = vector.broadcast %184 : vector<16x1xf32> to vector<16x64xf32>
    %186 = arith.mulf %181, %185 : vector<16x64xf32>
    %187 = vector.broadcast %167 : vector<1x64xf32> to vector<16x64xf32>
    %188 = arith.mulf %186, %187 : vector<16x64xf32>
    %189 = vector.broadcast %168 : vector<1x64xf32> to vector<16x64xf32>
    %190 = arith.addf %188, %189 : vector<16x64xf32>
    %c0_64 = arith.constant 0 : index
    %c0_65 = arith.constant 0 : index
    %191 = vector.load %arg13[%c0_64, %c0_65] : memref<64x64xf32, #tpu.memory_space<vmem>>, vector<64x64xf32>
    %cst_66 = arith.constant dense<0.000000e+00> : vector<16x64xf32>
    %192 = tpu.matmul %190, %191, %cst_66 {dimension_numbers = #tpu.dot_dimension_numbers<[1], [0], [0], [1], [0, 0, 1, 1], [], []>} : vector<16x64xf32>, vector<64x64xf32>, vector<16x64xf32> -> vector<16x64xf32>
    %c0_67 = arith.constant 0 : index
    %c0_68 = arith.constant 0 : index
    %193 = vector.load %arg14[%c0_67, %c0_68] : memref<1x64xf32, #tpu.memory_space<vmem>>, vector<1x64xf32>
    %194 = vector.broadcast %193 : vector<1x64xf32> to vector<16x64xf32>
    %195 = arith.addf %192, %194 : vector<16x64xf32>
    %c0_69 = arith.constant 0 : index
    %c0_70 = arith.constant 0 : index
    %196 = vector.load %arg15[%c0_69, %c0_70] : memref<64x128xf32, #tpu.memory_space<vmem>>, vector<64x128xf32>
    %cst_71 = arith.constant dense<0.000000e+00> : vector<32x128xf32>
    %197 = tpu.matmul %3, %196, %cst_71 {dimension_numbers = #tpu.dot_dimension_numbers<[1], [0], [0], [1], [0, 0, 1, 1], [], []>} : vector<32x64xf32>, vector<64x128xf32>, vector<32x128xf32> -> vector<32x128xf32>
    %c0_72 = arith.constant 0 : index
    %c0_73 = arith.constant 0 : index
    %198 = vector.load %arg16[%c0_72, %c0_73] : memref<1x128xf32, #tpu.memory_space<vmem>>, vector<1x128xf32>
    %199 = vector.broadcast %198 : vector<1x128xf32> to vector<32x128xf32>
    %200 = arith.addf %197, %199 : vector<32x128xf32>
    %201 = vector.extract_strided_slice %200 {offsets = [0, 0], sizes = [32, 64], strides = [1, 1]} : vector<32x128xf32> to vector<32x64xf32>
    %202 = vector.extract_strided_slice %200 {offsets = [0, 64], sizes = [32, 64], strides = [1, 1]} : vector<32x128xf32> to vector<32x64xf32>
    %203 = vector.shape_cast %195 : vector<16x64xf32> to vector<2x8x64xf32>
    %204 = vector.shape_cast %201 : vector<32x64xf32> to vector<2x16x64xf32>
    %205 = vector.shape_cast %202 : vector<32x64xf32> to vector<2x16x64xf32>
    %206 = vector.extract_strided_slice %203 {offsets = [0, 0, 0], sizes = [2, 8, 8], strides = [1, 1, 1]} : vector<2x8x64xf32> to vector<2x8x8xf32>
    %207 = vector.extract_strided_slice %204 {offsets = [0, 0, 0], sizes = [2, 16, 8], strides = [1, 1, 1]} : vector<2x16x64xf32> to vector<2x16x8xf32>
    "tpu.trace_start"() <{level = 10 : i32, message = "bld,bsd->bls"}> : () -> ()
    %cst_74 = arith.constant dense<0.000000e+00> : vector<2x8x16xf32>
    %208 = tpu.matmul %206, %207, %cst_74 {dimension_numbers = #tpu.dot_dimension_numbers<[2], [2], [1], [1], [0, 0, 0, 1, 1, 1], [0], [0]>} : vector<2x8x8xf32>, vector<2x16x8xf32>, vector<2x8x16xf32> -> vector<2x8x16xf32>
    "tpu.trace_stop"() : () -> ()
    %cst_75 = arith.constant dense<0xFF800000> : vector<2x8xf32>
    %209 = vector.multi_reduction <maximumf>, %208, %cst_75 [2] : vector<2x8x16xf32> to vector<2x8xf32>
    %210 = vector.shape_cast %209 : vector<2x8xf32> to vector<2x8x1xf32>
    %211 = vector.broadcast %210 : vector<2x8x1xf32> to vector<2x8x16xf32>
    %212 = arith.subf %208, %211 : vector<2x8x16xf32>
    %213 = math.exp %212 : vector<2x8x16xf32>
    %cst_76 = arith.constant dense<0.000000e+00> : vector<2x8xf32>
    %214 = vector.multi_reduction <add>, %213, %cst_76 [2] : vector<2x8x16xf32> to vector<2x8xf32>
    %215 = vector.shape_cast %214 : vector<2x8xf32> to vector<2x8x1xf32>
    %216 = tpu.reciprocal %215 {approx = true} : vector<2x8x1xf32> -> vector<2x8x1xf32>
    %217 = vector.broadcast %216 : vector<2x8x1xf32> to vector<2x8x16xf32>
    %218 = arith.mulf %213, %217 : vector<2x8x16xf32>
    %219 = vector.extract_strided_slice %205 {offsets = [0, 0, 0], sizes = [2, 16, 8], strides = [1, 1, 1]} : vector<2x16x64xf32> to vector<2x16x8xf32>
    "tpu.trace_start"() <{level = 10 : i32, message = "bls,bsd->bld"}> : () -> ()
    %cst_77 = arith.constant dense<0.000000e+00> : vector<2x8x8xf32>
    %220 = tpu.matmul %218, %219, %cst_77 {dimension_numbers = #tpu.dot_dimension_numbers<[2], [1], [1], [2], [0, 0, 0, 1, 1, 2], [0], [0]>} : vector<2x8x16xf32>, vector<2x16x8xf32>, vector<2x8x8xf32> -> vector<2x8x8xf32>
    "tpu.trace_stop"() : () -> ()
    %221 = vector.extract_strided_slice %203 {offsets = [0, 0, 8], sizes = [2, 8, 8], strides = [1, 1, 1]} : vector<2x8x64xf32> to vector<2x8x8xf32>
    %222 = vector.extract_strided_slice %204 {offsets = [0, 0, 8], sizes = [2, 16, 8], strides = [1, 1, 1]} : vector<2x16x64xf32> to vector<2x16x8xf32>
    "tpu.trace_start"() <{level = 10 : i32, message = "bld,bsd->bls"}> : () -> ()
    %cst_78 = arith.constant dense<0.000000e+00> : vector<2x8x16xf32>
    %223 = tpu.matmul %221, %222, %cst_78 {dimension_numbers = #tpu.dot_dimension_numbers<[2], [2], [1], [1], [0, 0, 0, 1, 1, 1], [0], [0]>} : vector<2x8x8xf32>, vector<2x16x8xf32>, vector<2x8x16xf32> -> vector<2x8x16xf32>
    "tpu.trace_stop"() : () -> ()
    %cst_79 = arith.constant dense<0xFF800000> : vector<2x8xf32>
    %224 = vector.multi_reduction <maximumf>, %223, %cst_79 [2] : vector<2x8x16xf32> to vector<2x8xf32>
    %225 = vector.shape_cast %224 : vector<2x8xf32> to vector<2x8x1xf32>
    %226 = vector.broadcast %225 : vector<2x8x1xf32> to vector<2x8x16xf32>
    %227 = arith.subf %223, %226 : vector<2x8x16xf32>
    %228 = math.exp %227 : vector<2x8x16xf32>
    %cst_80 = arith.constant dense<0.000000e+00> : vector<2x8xf32>
    %229 = vector.multi_reduction <add>, %228, %cst_80 [2] : vector<2x8x16xf32> to vector<2x8xf32>
    %230 = vector.shape_cast %229 : vector<2x8xf32> to vector<2x8x1xf32>
    %231 = tpu.reciprocal %230 {approx = true} : vector<2x8x1xf32> -> vector<2x8x1xf32>
    %232 = vector.broadcast %231 : vector<2x8x1xf32> to vector<2x8x16xf32>
    %233 = arith.mulf %228, %232 : vector<2x8x16xf32>
    %234 = vector.extract_strided_slice %205 {offsets = [0, 0, 8], sizes = [2, 16, 8], strides = [1, 1, 1]} : vector<2x16x64xf32> to vector<2x16x8xf32>
    "tpu.trace_start"() <{level = 10 : i32, message = "bls,bsd->bld"}> : () -> ()
    %cst_81 = arith.constant dense<0.000000e+00> : vector<2x8x8xf32>
    %235 = tpu.matmul %233, %234, %cst_81 {dimension_numbers = #tpu.dot_dimension_numbers<[2], [1], [1], [2], [0, 0, 0, 1, 1, 2], [0], [0]>} : vector<2x8x16xf32>, vector<2x16x8xf32>, vector<2x8x8xf32> -> vector<2x8x8xf32>
    "tpu.trace_stop"() : () -> ()
    %236 = vector.extract_strided_slice %203 {offsets = [0, 0, 16], sizes = [2, 8, 8], strides = [1, 1, 1]} : vector<2x8x64xf32> to vector<2x8x8xf32>
    %237 = vector.extract_strided_slice %204 {offsets = [0, 0, 16], sizes = [2, 16, 8], strides = [1, 1, 1]} : vector<2x16x64xf32> to vector<2x16x8xf32>
    "tpu.trace_start"() <{level = 10 : i32, message = "bld,bsd->bls"}> : () -> ()
    %cst_82 = arith.constant dense<0.000000e+00> : vector<2x8x16xf32>
    %238 = tpu.matmul %236, %237, %cst_82 {dimension_numbers = #tpu.dot_dimension_numbers<[2], [2], [1], [1], [0, 0, 0, 1, 1, 1], [0], [0]>} : vector<2x8x8xf32>, vector<2x16x8xf32>, vector<2x8x16xf32> -> vector<2x8x16xf32>
    "tpu.trace_stop"() : () -> ()
    %cst_83 = arith.constant dense<0xFF800000> : vector<2x8xf32>
    %239 = vector.multi_reduction <maximumf>, %238, %cst_83 [2] : vector<2x8x16xf32> to vector<2x8xf32>
    %240 = vector.shape_cast %239 : vector<2x8xf32> to vector<2x8x1xf32>
    %241 = vector.broadcast %240 : vector<2x8x1xf32> to vector<2x8x16xf32>
    %242 = arith.subf %238, %241 : vector<2x8x16xf32>
    %243 = math.exp %242 : vector<2x8x16xf32>
    %cst_84 = arith.constant dense<0.000000e+00> : vector<2x8xf32>
    %244 = vector.multi_reduction <add>, %243, %cst_84 [2] : vector<2x8x16xf32> to vector<2x8xf32>
    %245 = vector.shape_cast %244 : vector<2x8xf32> to vector<2x8x1xf32>
    %246 = tpu.reciprocal %245 {approx = true} : vector<2x8x1xf32> -> vector<2x8x1xf32>
    %247 = vector.broadcast %246 : vector<2x8x1xf32> to vector<2x8x16xf32>
    %248 = arith.mulf %243, %247 : vector<2x8x16xf32>
    %249 = vector.extract_strided_slice %205 {offsets = [0, 0, 16], sizes = [2, 16, 8], strides = [1, 1, 1]} : vector<2x16x64xf32> to vector<2x16x8xf32>
    "tpu.trace_start"() <{level = 10 : i32, message = "bls,bsd->bld"}> : () -> ()
    %cst_85 = arith.constant dense<0.000000e+00> : vector<2x8x8xf32>
    %250 = tpu.matmul %248, %249, %cst_85 {dimension_numbers = #tpu.dot_dimension_numbers<[2], [1], [1], [2], [0, 0, 0, 1, 1, 2], [0], [0]>} : vector<2x8x16xf32>, vector<2x16x8xf32>, vector<2x8x8xf32> -> vector<2x8x8xf32>
    "tpu.trace_stop"() : () -> ()
    %251 = vector.extract_strided_slice %203 {offsets = [0, 0, 24], sizes = [2, 8, 8], strides = [1, 1, 1]} : vector<2x8x64xf32> to vector<2x8x8xf32>
    %252 = vector.extract_strided_slice %204 {offsets = [0, 0, 24], sizes = [2, 16, 8], strides = [1, 1, 1]} : vector<2x16x64xf32> to vector<2x16x8xf32>
    "tpu.trace_start"() <{level = 10 : i32, message = "bld,bsd->bls"}> : () -> ()
    %cst_86 = arith.constant dense<0.000000e+00> : vector<2x8x16xf32>
    %253 = tpu.matmul %251, %252, %cst_86 {dimension_numbers = #tpu.dot_dimension_numbers<[2], [2], [1], [1], [0, 0, 0, 1, 1, 1], [0], [0]>} : vector<2x8x8xf32>, vector<2x16x8xf32>, vector<2x8x16xf32> -> vector<2x8x16xf32>
    "tpu.trace_stop"() : () -> ()
    %cst_87 = arith.constant dense<0xFF800000> : vector<2x8xf32>
    %254 = vector.multi_reduction <maximumf>, %253, %cst_87 [2] : vector<2x8x16xf32> to vector<2x8xf32>
    %255 = vector.shape_cast %254 : vector<2x8xf32> to vector<2x8x1xf32>
    %256 = vector.broadcast %255 : vector<2x8x1xf32> to vector<2x8x16xf32>
    %257 = arith.subf %253, %256 : vector<2x8x16xf32>
    %258 = math.exp %257 : vector<2x8x16xf32>
    %cst_88 = arith.constant dense<0.000000e+00> : vector<2x8xf32>
    %259 = vector.multi_reduction <add>, %258, %cst_88 [2] : vector<2x8x16xf32> to vector<2x8xf32>
    %260 = vector.shape_cast %259 : vector<2x8xf32> to vector<2x8x1xf32>
    %261 = tpu.reciprocal %260 {approx = true} : vector<2x8x1xf32> -> vector<2x8x1xf32>
    %262 = vector.broadcast %261 : vector<2x8x1xf32> to vector<2x8x16xf32>
    %263 = arith.mulf %258, %262 : vector<2x8x16xf32>
    %264 = vector.extract_strided_slice %205 {offsets = [0, 0, 24], sizes = [2, 16, 8], strides = [1, 1, 1]} : vector<2x16x64xf32> to vector<2x16x8xf32>
    "tpu.trace_start"() <{level = 10 : i32, message = "bls,bsd->bld"}> : () -> ()
    %cst_89 = arith.constant dense<0.000000e+00> : vector<2x8x8xf32>
    %265 = tpu.matmul %263, %264, %cst_89 {dimension_numbers = #tpu.dot_dimension_numbers<[2], [1], [1], [2], [0, 0, 0, 1, 1, 2], [0], [0]>} : vector<2x8x16xf32>, vector<2x16x8xf32>, vector<2x8x8xf32> -> vector<2x8x8xf32>
    "tpu.trace_stop"() : () -> ()
    %266 = vector.extract_strided_slice %203 {offsets = [0, 0, 32], sizes = [2, 8, 8], strides = [1, 1, 1]} : vector<2x8x64xf32> to vector<2x8x8xf32>
    %267 = vector.extract_strided_slice %204 {offsets = [0, 0, 32], sizes = [2, 16, 8], strides = [1, 1, 1]} : vector<2x16x64xf32> to vector<2x16x8xf32>
    "tpu.trace_start"() <{level = 10 : i32, message = "bld,bsd->bls"}> : () -> ()
    %cst_90 = arith.constant dense<0.000000e+00> : vector<2x8x16xf32>
    %268 = tpu.matmul %266, %267, %cst_90 {dimension_numbers = #tpu.dot_dimension_numbers<[2], [2], [1], [1], [0, 0, 0, 1, 1, 1], [0], [0]>} : vector<2x8x8xf32>, vector<2x16x8xf32>, vector<2x8x16xf32> -> vector<2x8x16xf32>
    "tpu.trace_stop"() : () -> ()
    %cst_91 = arith.constant dense<0xFF800000> : vector<2x8xf32>
    %269 = vector.multi_reduction <maximumf>, %268, %cst_91 [2] : vector<2x8x16xf32> to vector<2x8xf32>
    %270 = vector.shape_cast %269 : vector<2x8xf32> to vector<2x8x1xf32>
    %271 = vector.broadcast %270 : vector<2x8x1xf32> to vector<2x8x16xf32>
    %272 = arith.subf %268, %271 : vector<2x8x16xf32>
    %273 = math.exp %272 : vector<2x8x16xf32>
    %cst_92 = arith.constant dense<0.000000e+00> : vector<2x8xf32>
    %274 = vector.multi_reduction <add>, %273, %cst_92 [2] : vector<2x8x16xf32> to vector<2x8xf32>
    %275 = vector.shape_cast %274 : vector<2x8xf32> to vector<2x8x1xf32>
    %276 = tpu.reciprocal %275 {approx = true} : vector<2x8x1xf32> -> vector<2x8x1xf32>
    %277 = vector.broadcast %276 : vector<2x8x1xf32> to vector<2x8x16xf32>
    %278 = arith.mulf %273, %277 : vector<2x8x16xf32>
    %279 = vector.extract_strided_slice %205 {offsets = [0, 0, 32], sizes = [2, 16, 8], strides = [1, 1, 1]} : vector<2x16x64xf32> to vector<2x16x8xf32>
    "tpu.trace_start"() <{level = 10 : i32, message = "bls,bsd->bld"}> : () -> ()
    %cst_93 = arith.constant dense<0.000000e+00> : vector<2x8x8xf32>
    %280 = tpu.matmul %278, %279, %cst_93 {dimension_numbers = #tpu.dot_dimension_numbers<[2], [1], [1], [2], [0, 0, 0, 1, 1, 2], [0], [0]>} : vector<2x8x16xf32>, vector<2x16x8xf32>, vector<2x8x8xf32> -> vector<2x8x8xf32>
    "tpu.trace_stop"() : () -> ()
    %281 = vector.extract_strided_slice %203 {offsets = [0, 0, 40], sizes = [2, 8, 8], strides = [1, 1, 1]} : vector<2x8x64xf32> to vector<2x8x8xf32>
    %282 = vector.extract_strided_slice %204 {offsets = [0, 0, 40], sizes = [2, 16, 8], strides = [1, 1, 1]} : vector<2x16x64xf32> to vector<2x16x8xf32>
    "tpu.trace_start"() <{level = 10 : i32, message = "bld,bsd->bls"}> : () -> ()
    %cst_94 = arith.constant dense<0.000000e+00> : vector<2x8x16xf32>
    %283 = tpu.matmul %281, %282, %cst_94 {dimension_numbers = #tpu.dot_dimension_numbers<[2], [2], [1], [1], [0, 0, 0, 1, 1, 1], [0], [0]>} : vector<2x8x8xf32>, vector<2x16x8xf32>, vector<2x8x16xf32> -> vector<2x8x16xf32>
    "tpu.trace_stop"() : () -> ()
    %cst_95 = arith.constant dense<0xFF800000> : vector<2x8xf32>
    %284 = vector.multi_reduction <maximumf>, %283, %cst_95 [2] : vector<2x8x16xf32> to vector<2x8xf32>
    %285 = vector.shape_cast %284 : vector<2x8xf32> to vector<2x8x1xf32>
    %286 = vector.broadcast %285 : vector<2x8x1xf32> to vector<2x8x16xf32>
    %287 = arith.subf %283, %286 : vector<2x8x16xf32>
    %288 = math.exp %287 : vector<2x8x16xf32>
    %cst_96 = arith.constant dense<0.000000e+00> : vector<2x8xf32>
    %289 = vector.multi_reduction <add>, %288, %cst_96 [2] : vector<2x8x16xf32> to vector<2x8xf32>
    %290 = vector.shape_cast %289 : vector<2x8xf32> to vector<2x8x1xf32>
    %291 = tpu.reciprocal %290 {approx = true} : vector<2x8x1xf32> -> vector<2x8x1xf32>
    %292 = vector.broadcast %291 : vector<2x8x1xf32> to vector<2x8x16xf32>
    %293 = arith.mulf %288, %292 : vector<2x8x16xf32>
    %294 = vector.extract_strided_slice %205 {offsets = [0, 0, 40], sizes = [2, 16, 8], strides = [1, 1, 1]} : vector<2x16x64xf32> to vector<2x16x8xf32>
    "tpu.trace_start"() <{level = 10 : i32, message = "bls,bsd->bld"}> : () -> ()
    %cst_97 = arith.constant dense<0.000000e+00> : vector<2x8x8xf32>
    %295 = tpu.matmul %293, %294, %cst_97 {dimension_numbers = #tpu.dot_dimension_numbers<[2], [1], [1], [2], [0, 0, 0, 1, 1, 2], [0], [0]>} : vector<2x8x16xf32>, vector<2x16x8xf32>, vector<2x8x8xf32> -> vector<2x8x8xf32>
    "tpu.trace_stop"() : () -> ()
    %296 = vector.extract_strided_slice %203 {offsets = [0, 0, 48], sizes = [2, 8, 8], strides = [1, 1, 1]} : vector<2x8x64xf32> to vector<2x8x8xf32>
    %297 = vector.extract_strided_slice %204 {offsets = [0, 0, 48], sizes = [2, 16, 8], strides = [1, 1, 1]} : vector<2x16x64xf32> to vector<2x16x8xf32>
    "tpu.trace_start"() <{level = 10 : i32, message = "bld,bsd->bls"}> : () -> ()
    %cst_98 = arith.constant dense<0.000000e+00> : vector<2x8x16xf32>
    %298 = tpu.matmul %296, %297, %cst_98 {dimension_numbers = #tpu.dot_dimension_numbers<[2], [2], [1], [1], [0, 0, 0, 1, 1, 1], [0], [0]>} : vector<2x8x8xf32>, vector<2x16x8xf32>, vector<2x8x16xf32> -> vector<2x8x16xf32>
    "tpu.trace_stop"() : () -> ()
    %cst_99 = arith.constant dense<0xFF800000> : vector<2x8xf32>
    %299 = vector.multi_reduction <maximumf>, %298, %cst_99 [2] : vector<2x8x16xf32> to vector<2x8xf32>
    %300 = vector.shape_cast %299 : vector<2x8xf32> to vector<2x8x1xf32>
    %301 = vector.broadcast %300 : vector<2x8x1xf32> to vector<2x8x16xf32>
    %302 = arith.subf %298, %301 : vector<2x8x16xf32>
    %303 = math.exp %302 : vector<2x8x16xf32>
    %cst_100 = arith.constant dense<0.000000e+00> : vector<2x8xf32>
    %304 = vector.multi_reduction <add>, %303, %cst_100 [2] : vector<2x8x16xf32> to vector<2x8xf32>
    %305 = vector.shape_cast %304 : vector<2x8xf32> to vector<2x8x1xf32>
    %306 = tpu.reciprocal %305 {approx = true} : vector<2x8x1xf32> -> vector<2x8x1xf32>
    %307 = vector.broadcast %306 : vector<2x8x1xf32> to vector<2x8x16xf32>
    %308 = arith.mulf %303, %307 : vector<2x8x16xf32>
    %309 = vector.extract_strided_slice %205 {offsets = [0, 0, 48], sizes = [2, 16, 8], strides = [1, 1, 1]} : vector<2x16x64xf32> to vector<2x16x8xf32>
    "tpu.trace_start"() <{level = 10 : i32, message = "bls,bsd->bld"}> : () -> ()
    %cst_101 = arith.constant dense<0.000000e+00> : vector<2x8x8xf32>
    %310 = tpu.matmul %308, %309, %cst_101 {dimension_numbers = #tpu.dot_dimension_numbers<[2], [1], [1], [2], [0, 0, 0, 1, 1, 2], [0], [0]>} : vector<2x8x16xf32>, vector<2x16x8xf32>, vector<2x8x8xf32> -> vector<2x8x8xf32>
    "tpu.trace_stop"() : () -> ()
    %311 = vector.extract_strided_slice %203 {offsets = [0, 0, 56], sizes = [2, 8, 8], strides = [1, 1, 1]} : vector<2x8x64xf32> to vector<2x8x8xf32>
    %312 = vector.extract_strided_slice %204 {offsets = [0, 0, 56], sizes = [2, 16, 8], strides = [1, 1, 1]} : vector<2x16x64xf32> to vector<2x16x8xf32>
    "tpu.trace_start"() <{level = 10 : i32, message = "bld,bsd->bls"}> : () -> ()
    %cst_102 = arith.constant dense<0.000000e+00> : vector<2x8x16xf32>
    %313 = tpu.matmul %311, %312, %cst_102 {dimension_numbers = #tpu.dot_dimension_numbers<[2], [2], [1], [1], [0, 0, 0, 1, 1, 1], [0], [0]>} : vector<2x8x8xf32>, vector<2x16x8xf32>, vector<2x8x16xf32> -> vector<2x8x16xf32>
    "tpu.trace_stop"() : () -> ()
    %cst_103 = arith.constant dense<0xFF800000> : vector<2x8xf32>
    %314 = vector.multi_reduction <maximumf>, %313, %cst_103 [2] : vector<2x8x16xf32> to vector<2x8xf32>
    %315 = vector.shape_cast %314 : vector<2x8xf32> to vector<2x8x1xf32>
    %316 = vector.broadcast %315 : vector<2x8x1xf32> to vector<2x8x16xf32>
    %317 = arith.subf %313, %316 : vector<2x8x16xf32>
    %318 = math.exp %317 : vector<2x8x16xf32>
    %cst_104 = arith.constant dense<0.000000e+00> : vector<2x8xf32>
    %319 = vector.multi_reduction <add>, %318, %cst_104 [2] : vector<2x8x16xf32> to vector<2x8xf32>
    %320 = vector.shape_cast %319 : vector<2x8xf32> to vector<2x8x1xf32>
    %321 = tpu.reciprocal %320 {approx = true} : vector<2x8x1xf32> -> vector<2x8x1xf32>
    %322 = vector.broadcast %321 : vector<2x8x1xf32> to vector<2x8x16xf32>
    %323 = arith.mulf %318, %322 : vector<2x8x16xf32>
    %324 = vector.extract_strided_slice %205 {offsets = [0, 0, 56], sizes = [2, 16, 8], strides = [1, 1, 1]} : vector<2x16x64xf32> to vector<2x16x8xf32>
    "tpu.trace_start"() <{level = 10 : i32, message = "bls,bsd->bld"}> : () -> ()
    %cst_105 = arith.constant dense<0.000000e+00> : vector<2x8x8xf32>
    %325 = tpu.matmul %323, %324, %cst_105 {dimension_numbers = #tpu.dot_dimension_numbers<[2], [1], [1], [2], [0, 0, 0, 1, 1, 2], [0], [0]>} : vector<2x8x16xf32>, vector<2x16x8xf32>, vector<2x8x8xf32> -> vector<2x8x8xf32>
    "tpu.trace_stop"() : () -> ()
    %326 = tpu.concatenate %220, %235, %250, %265, %280, %295, %310, %325 in 2 : vector<2x8x8xf32>, vector<2x8x8xf32>, vector<2x8x8xf32>, vector<2x8x8xf32>, vector<2x8x8xf32>, vector<2x8x8xf32>, vector<2x8x8xf32>, vector<2x8x8xf32> -> vector<2x8x64xf32>
    %327 = vector.shape_cast %326 : vector<2x8x64xf32> to vector<16x64xf32>
    %c0_106 = arith.constant 0 : index
    %c0_107 = arith.constant 0 : index
    %328 = vector.load %arg17[%c0_106, %c0_107] : memref<64x64xf32, #tpu.memory_space<vmem>>, vector<64x64xf32>
    %cst_108 = arith.constant dense<0.000000e+00> : vector<16x64xf32>
    %329 = tpu.matmul %327, %328, %cst_108 {dimension_numbers = #tpu.dot_dimension_numbers<[1], [0], [0], [1], [0, 0, 1, 1], [], []>} : vector<16x64xf32>, vector<64x64xf32>, vector<16x64xf32> -> vector<16x64xf32>
    %330 = arith.addf %166, %329 : vector<16x64xf32>
    %c0_109 = arith.constant 0 : index
    %c0_110 = arith.constant 0 : index
    %331 = vector.load %arg18[%c0_109, %c0_110] : memref<1x64xf32, #tpu.memory_space<vmem>>, vector<1x64xf32>
    %332 = vector.broadcast %331 : vector<1x64xf32> to vector<16x64xf32>
    %333 = arith.addf %330, %332 : vector<16x64xf32>
    %c0_111 = arith.constant 0 : index
    %c0_112 = arith.constant 0 : index
    %334 = vector.load %arg7[%c0_111, %c0_112] : memref<1x64xf32, #tpu.memory_space<vmem>>, vector<1x64xf32>
    %c0_113 = arith.constant 0 : index
    %c0_114 = arith.constant 0 : index
    %335 = vector.load %arg8[%c0_113, %c0_114] : memref<1x64xf32, #tpu.memory_space<vmem>>, vector<1x64xf32>
    %cst_115 = arith.constant dense<0.000000e+00> : vector<16xf32>
    %336 = vector.multi_reduction <add>, %333, %cst_115 [1] : vector<16x64xf32> to vector<16xf32>
    %337 = vector.shape_cast %336 : vector<16xf32> to vector<16x1xf32>
    %cst_116 = arith.constant 6.400000e+01 : f32
    %338 = vector.broadcast %cst_116 : f32 to vector<16x1xf32>
    %339 = arith.divf %337, %338 : vector<16x1xf32>
    %340 = vector.broadcast %339 : vector<16x1xf32> to vector<16x64xf32>
    %341 = arith.subf %333, %340 : vector<16x64xf32>
    %342 = arith.mulf %341, %341 : vector<16x64xf32>
    %cst_117 = arith.constant dense<0.000000e+00> : vector<16xf32>
    %343 = vector.multi_reduction <add>, %342, %cst_117 [1] : vector<16x64xf32> to vector<16xf32>
    %344 = vector.shape_cast %343 : vector<16xf32> to vector<16x1xf32>
    %cst_118 = arith.constant 6.400000e+01 : f32
    %345 = vector.broadcast %cst_118 : f32 to vector<16x1xf32>
    %346 = arith.divf %344, %345 : vector<16x1xf32>
    %347 = vector.broadcast %339 : vector<16x1xf32> to vector<16x64xf32>
    %348 = arith.subf %333, %347 : vector<16x64xf32>
    %cst_119 = arith.constant 9.99999974E-6 : f32
    %349 = vector.broadcast %cst_119 : f32 to vector<16x1xf32>
    %350 = arith.addf %346, %349 : vector<16x1xf32>
    %351 = math.rsqrt %350 : vector<16x1xf32>
    %352 = vector.broadcast %351 : vector<16x1xf32> to vector<16x64xf32>
    %353 = arith.mulf %348, %352 : vector<16x64xf32>
    %354 = vector.broadcast %334 : vector<1x64xf32> to vector<16x64xf32>
    %355 = arith.mulf %353, %354 : vector<16x64xf32>
    %356 = vector.broadcast %335 : vector<1x64xf32> to vector<16x64xf32>
    %357 = arith.addf %355, %356 : vector<16x64xf32>
    %c0_120 = arith.constant 0 : index
    %c0_121 = arith.constant 0 : index
    %358 = vector.load %arg19[%c0_120, %c0_121] : memref<64x256xf32, #tpu.memory_space<vmem>>, vector<64x256xf32>
    %cst_122 = arith.constant dense<0.000000e+00> : vector<16x256xf32>
    %359 = tpu.matmul %357, %358, %cst_122 {dimension_numbers = #tpu.dot_dimension_numbers<[1], [0], [0], [1], [0, 0, 1, 1], [], []>} : vector<16x64xf32>, vector<64x256xf32>, vector<16x256xf32> -> vector<16x256xf32>
    %c0_123 = arith.constant 0 : index
    %c0_124 = arith.constant 0 : index
    %360 = vector.load %arg20[%c0_123, %c0_124] : memref<1x256xf32, #tpu.memory_space<vmem>>, vector<1x256xf32>
    %361 = vector.broadcast %360 : vector<1x256xf32> to vector<16x256xf32>
    %362 = arith.addf %359, %361 : vector<16x256xf32>
    %cst_125 = arith.constant 0.000000e+00 : f32
    %363 = vector.broadcast %cst_125 : f32 to vector<16x256xf32>
    %364 = arith.maximumf %362, %363 : vector<16x256xf32>
    %c0_126 = arith.constant 0 : index
    %c0_127 = arith.constant 0 : index
    %365 = vector.load %arg21[%c0_126, %c0_127] : memref<256x64xf32, #tpu.memory_space<vmem>>, vector<256x64xf32>
    %cst_128 = arith.constant dense<0.000000e+00> : vector<16x64xf32>
    %366 = tpu.matmul %364, %365, %cst_128 {dimension_numbers = #tpu.dot_dimension_numbers<[1], [0], [0], [1], [0, 0, 1, 1], [], []>} : vector<16x256xf32>, vector<256x64xf32>, vector<16x64xf32> -> vector<16x64xf32>
    %c0_129 = arith.constant 0 : index
    %c0_130 = arith.constant 0 : index
    %367 = vector.load %arg22[%c0_129, %c0_130] : memref<1x64xf32, #tpu.memory_space<vmem>>, vector<1x64xf32>
    %368 = vector.broadcast %367 : vector<1x64xf32> to vector<16x64xf32>
    %369 = arith.addf %366, %368 : vector<16x64xf32>
    %370 = arith.addf %333, %369 : vector<16x64xf32>
    %371 = vector.shape_cast %370 : vector<16x64xf32> to vector<2x8x64xf32>
    %c0_131 = arith.constant 0 : index
    %c0_132 = arith.constant 0 : index
    %c0_133 = arith.constant 0 : index
    %372 = vector.load %arg23[%c0_131, %c0_132, %c0_133] : memref<2x8x64xf32, #tpu.memory_space<vmem>>, vector<2x8x64xf32>
    tpu.vector_store %arg23[%c0_131, %c0_132, %c0_133], %371 {strides = array<i32>} : memref<2x8x64xf32, #tpu.memory_space<vmem>>, vector<2x8x64xf32>,
    return
  }
  func.func @transform_0(%arg0: i32) -> (i32, i32, i32) {
    %c0_i32 = arith.constant 0 : i32
    %c0_i32_0 = arith.constant 0 : i32
    %c0_i32_1 = arith.constant 0 : i32
    return %arg0, %c0_i32, %c0_i32_0 : i32, i32, i32
  }
  func.func @transform_1(%arg0: i32) -> (i32, i32, i32) {
    %c0_i32 = arith.constant 0 : i32
    %c0_i32_0 = arith.constant 0 : i32
    %c0_i32_1 = arith.constant 0 : i32
    return %arg0, %c0_i32, %c0_i32_0 : i32, i32, i32
  }
  func.func @transform_2(%arg0: i32) -> (i32, i32) {
    %c0_i32 = arith.constant 0 : i32
    %c0_i32_0 = arith.constant 0 : i32
    %c0_i32_1 = arith.constant 0 : i32
    return %c0_i32, %c0_i32_0 : i32, i32
  }
  func.func @transform_3(%arg0: i32) -> (i32, i32) {
    %c0_i32 = arith.constant 0 : i32
    %c0_i32_0 = arith.constant 0 : i32
    %c0_i32_1 = arith.constant 0 : i32
    return %c0_i32, %c0_i32_0 : i32, i32
  }
  func.func @transform_4(%arg0: i32) -> (i32, i32) {
    %c0_i32 = arith.constant 0 : i32
    %c0_i32_0 = arith.constant 0 : i32
    %c0_i32_1 = arith.constant 0 : i32
    return %c0_i32, %c0_i32_0 : i32, i32
  }
  func.func @transform_5(%arg0: i32) -> (i32, i32) {
    %c0_i32 = arith.constant 0 : i32
    %c0_i32_0 = arith.constant 0 : i32
    %c0_i32_1 = arith.constant 0 : i32
    return %c0_i32, %c0_i32_0 : i32, i32
  }
  func.func @transform_6(%arg0: i32) -> (i32, i32) {
    %c0_i32 = arith.constant 0 : i32
    %c0_i32_0 = arith.constant 0 : i32
    %c0_i32_1 = arith.constant 0 : i32
    return %c0_i32, %c0_i32_0 : i32, i32
  }
  func.func @transform_7(%arg0: i32) -> (i32, i32) {
    %c0_i32 = arith.constant 0 : i32
    %c0_i32_0 = arith.constant 0 : i32
    %c0_i32_1 = arith.constant 0 : i32
    return %c0_i32, %c0_i32_0 : i32, i32
  }
  func.func @transform_8(%arg0: i32) -> (i32, i32) {
    %c0_i32 = arith.constant 0 : i32
    %c0_i32_0 = arith.constant 0 : i32
    %c0_i32_1 = arith.constant 0 : i32
    return %c0_i32, %c0_i32_0 : i32, i32
  }
  func.func @transform_9(%arg0: i32) -> (i32, i32) {
    %c0_i32 = arith.constant 0 : i32
    %c0_i32_0 = arith.constant 0 : i32
    %c0_i32_1 = arith.constant 0 : i32
    return %c0_i32, %c0_i32_0 : i32, i32
  }
  func.func @transform_10(%arg0: i32) -> (i32, i32) {
    %c0_i32 = arith.constant 0 : i32
    %c0_i32_0 = arith.constant 0 : i32
    %c0_i32_1 = arith.constant 0 : i32
    return %c0_i32, %c0_i32_0 : i32, i32
  }
  func.func @transform_11(%arg0: i32) -> (i32, i32) {
    %c0_i32 = arith.constant 0 : i32
    %c0_i32_0 = arith.constant 0 : i32
    %c0_i32_1 = arith.constant 0 : i32
    return %c0_i32, %c0_i32_0 : i32, i32
  }
  func.func @transform_12(%arg0: i32) -> (i32, i32) {
    %c0_i32 = arith.constant 0 : i32
    %c0_i32_0 = arith.constant 0 : i32
    %c0_i32_1 = arith.constant 0 : i32
    return %c0_i32, %c0_i32_0 : i32, i32
  }
  func.func @transform_13(%arg0: i32) -> (i32, i32) {
    %c0_i32 = arith.constant 0 : i32
    %c0_i32_0 = arith.constant 0 : i32
    %c0_i32_1 = arith.constant 0 : i32
    return %c0_i32, %c0_i32_0 : i32, i32
  }
  func.func @transform_14(%arg0: i32) -> (i32, i32) {
    %c0_i32 = arith.constant 0 : i32
    %c0_i32_0 = arith.constant 0 : i32
    %c0_i32_1 = arith.constant 0 : i32
    return %c0_i32, %c0_i32_0 : i32, i32
  }
  func.func @transform_15(%arg0: i32) -> (i32, i32) {
    %c0_i32 = arith.constant 0 : i32
    %c0_i32_0 = arith.constant 0 : i32
    %c0_i32_1 = arith.constant 0 : i32
    return %c0_i32, %c0_i32_0 : i32, i32
  }
  func.func @transform_16(%arg0: i32) -> (i32, i32) {
    %c0_i32 = arith.constant 0 : i32
    %c0_i32_0 = arith.constant 0 : i32
    %c0_i32_1 = arith.constant 0 : i32
    return %c0_i32, %c0_i32_0 : i32, i32
  }
  func.func @transform_17(%arg0: i32) -> (i32, i32) {
    %c0_i32 = arith.constant 0 : i32
    %c0_i32_0 = arith.constant 0 : i32
    %c0_i32_1 = arith.constant 0 : i32
    return %c0_i32, %c0_i32_0 : i32, i32
  }
  func.func @transform_18(%arg0: i32) -> (i32, i32) {
    %c0_i32 = arith.constant 0 : i32
    %c0_i32_0 = arith.constant 0 : i32
    %c0_i32_1 = arith.constant 0 : i32
    return %c0_i32, %c0_i32_0 : i32, i32
  }
  func.func @transform_19(%arg0: i32) -> (i32, i32) {
    %c0_i32 = arith.constant 0 : i32
    %c0_i32_0 = arith.constant 0 : i32
    %c0_i32_1 = arith.constant 0 : i32
    return %c0_i32, %c0_i32_0 : i32, i32
  }
  func.func @transform_20(%arg0: i32) -> (i32, i32) {
    %c0_i32 = arith.constant 0 : i32
    %c0_i32_0 = arith.constant 0 : i32
    %c0_i32_1 = arith.constant 0 : i32
    return %c0_i32, %c0_i32_0 : i32, i32
  }
  func.func @transform_21(%arg0: i32) -> (i32, i32) {
    %c0_i32 = arith.constant 0 : i32
    %c0_i32_0 = arith.constant 0 : i32
    %c0_i32_1 = arith.constant 0 : i32
    return %c0_i32, %c0_i32_0 : i32, i32
  }
  func.func @transform_22(%arg0: i32) -> (i32, i32, i32) {
    %c0_i32 = arith.constant 0 : i32
    %c0_i32_0 = arith.constant 0 : i32
    %c0_i32_1 = arith.constant 0 : i32
    return %arg0, %c0_i32, %c0_i32_0 : i32, i32, i32
  }
}

</mosaic_0001>

<bundles_post_ra>
// kernel: tpu_custom_call.1
= control target key start
LH: loop header
LB: loop body
LE: loop exit
PB: predicated region body
PF: predicated region fallthrough
CT: control target
= control target key end

     0   :  { %s9360_s0 = inlined_call_operand.hbm [shape: f32[2,8,64], index: 0, kind: input, shape index: {}]   ;;  %s9361_s1 = inlined_call_operand.hbm [shape: f32[2,16,64], index: 1, kind: input, shape index: {}]   ;;  %s9362_s2 = inlined_call_operand.vmem [shape: f32[1,64], index: 2, kind: input, shape index: {}]   ;;  %s9363_s3 = inlined_call_operand.vmem [shape: f32[1,64], index: 3, kind: input, shape index: {}]   ;;  %s9364_s4 = inlined_call_operand.vmem [shape: f32[1,64], index: 4, kind: input, shape index: {}]   ;;  %s9365_s5 = inlined_call_operand.vmem [shape: f32[1,64], index: 5, kind: input, shape index: {}]   ;;  %s9366_s6 = inlined_call_operand.vmem [shape: f32[1,64], index: 6, kind: input, shape index: {}]   ;;  %s9367_s7 = inlined_call_operand.vmem [shape: f32[1,64], index: 7, kind: input, shape index: {}]   ;;  %s9368_s8 = inlined_call_operand.vmem [shape: f32[64,192], index: 8, kind: input, shape index: {}]   ;;  %s9369_s9 = inlined_call_operand.vmem [shape: f32[1,192], index: 9, kind: input, shape index: {}]   ;;  %s9370_s10 = inlined_call_operand.vmem [shape: f32[64,64], index: 10, kind: input, shape index: {}]   ;;  %s9371_s11 = inlined_call_operand.vmem [shape: f32[1,64], index: 11, kind: input, shape index: {}]   ;;  %s9372_s12 = inlined_call_operand.vmem [shape: f32[64,64], index: 12, kind: input, shape index: {}]   ;;  %s9373_s13 = inlined_call_operand.vmem [shape: f32[1,64], index: 13, kind: input, shape index: {}]   ;;  %s9374_s14 = inlined_call_operand.hbm [shape: f32[64,128], index: 14, kind: input, shape index: {}]   ;;  %s9375_s15 = inlined_call_operand.vmem [shape: f32[1,128], index: 15, kind: input, shape index: {}]   ;;  %s9376_s16 = inlined_call_operand.hbm [shape: f32[64,64], index: 16, kind: input, shape index: {}]   ;;  %s9377_s17 = inlined_call_operand.vmem [shape: f32[1,64], index: 17, kind: input, shape index: {}]   ;;  %s9378_s18 = inlined_call_operand.vmem [shape: f32[64,256], index: 18, kind: input, shape index: {}]   ;;  %s9379_s19 = inlined_call_operand.vmem [shape: f32[1,256], index: 19, kind: input, shape index: {}]   ;;  %s9380_s20 = inlined_call_operand.vmem [shape: f32[256,64], index: 20, kind: input, shape index: {}]   ;;  %s9381_s21 = inlined_call_operand.vmem [shape: f32[1,64], index: 21, kind: input, shape index: {}]   ;;  %s9382_s22 = inlined_call_operand.hbm [shape: f32[2,8,64], index: 22, kind: output, shape index: {}]  }
   0x1   :  { %9395 = sst [smem:[#allocation15_spill]] %s9360_s0 }
   0x2   :  { %9396 = sst [smem:[#allocation16_spill]] %s9361_s1 }
   0x3   :  { %9397 = sst [smem:[#allocation17_spill]] %s9362_s2 }
   0x4   :  { %9398 = sst [smem:[#allocation18_spill]] %s9363_s3 }
   0x5   :  { %9399 = sst [smem:[#allocation19_spill]] %s9364_s4 }
   0x6   :  { %9400 = sst [smem:[#allocation20_spill]] %s9365_s5 }
   0x7   :  { %9401 = sst [smem:[#allocation21_spill]] %s9366_s6 }
   0x8   :  { %9402 = sst [smem:[#allocation22_spill]] %s9381_s21 }
   0x9   :  { %9403 = sst [smem:[#allocation23_spill]] %s9382_s22 }
   0xa   :  { %27 = vsyncpa [#allocation3], 0 }
   0xb   :  { %28 = vsyncpa [#allocation6], 0 }
   0xc   :  { %29 = vsyncpa [#allocation9], 0 }
   0xd   :  { %30 = vsyncpa [#allocation4], 0  ;;  %s8079_s3 = smov [#allocation5]   ;;  %s8080_s29 = smov [#allocation2]  }
   0xe   :  { %s48_s28 = sshll.u32 %s8079_s3, 4  ;;  %s36_s30 = sshll.u32 %s8080_s29, 4  ;;  %s49_s28 = int_to_ptr.vmem [resolvable:$true] %s48_s28  ;;  %s8218_s30 = int_to_ptr.vmem [resolvable:$true] %s36_s30 }
   0xf   :  { %s9404_s23 = sld [smem:[#allocation16_spill]] }
  0x15   :  { %s7961_s1 = scalar_lea.hbm %s9404_s23, 512 }
  0x16   :  { %p7962_p0 = scmp.ne.s32.totalorder %s9404_s23, %s7961_s1  ;;  %p7965_p1 = scmp.lt.u32.totalorder %s7961_s1, %s9404_s23 }
  0x18   :  { %p7967_p2 = pnand %p7965_p1, %p7962_p0 }
  0x1a   :  { %7970 = shalt.err (!%p7967_p2)
}
  0x1b   :  { %s7971_s26 = scalar_lea.vmem %s49_s28, 512  ;;  %p7976_p4 = scmp.lt.s32.totalorder %s49_s28, %s49_s28 }
  0x1c   :  { %p7972_p3 = scmp.ne.s32.totalorder %s49_s28, %s7971_s26  ;;  %p7977_p5 = scmp.lt.s32.totalorder %s7971_s26, %s7971_s26 }
  0x1e   :  { %p7978_p6 = por %p7977_p5, %p7976_p4 }
  0x20   :  { %p7979_p7 = pnand %p7978_p6, %p7972_p3 }
  0x22   :  { %7982 = shalt.err (!%p7979_p7)
}
  0x23   :  { %s9386_s2 = smov 128   ;;  %s9387_s27 = smov 8  }
  0x24   :  { %54 = dma.hbm_to_vmem [thread:$0]  %s9404_s23, 512, %s49_s28, [#allocation6], %s9386_s2, %s9386_s2, %s9387_s27  }
  0x25   :  { %s9405_s1 = sld [smem:[#allocation15_spill]] }
  0x2b   :  { %s7983_s5 = scalar_lea.hbm %s9405_s1, 256 }
  0x2c   :  { %p7984_p8 = scmp.ne.s32.totalorder %s9405_s1, %s7983_s5  ;;  %p7987_p9 = scmp.lt.u32.totalorder %s7983_s5, %s9405_s1 }
  0x2e   :  { %p7989_p10 = pnand %p7987_p9, %p7984_p8 }
  0x30   :  { %7992 = shalt.err (!%p7989_p10)
}
  0x31   :  { %s7993_s22 = scalar_lea.vmem %s8218_s30, 256  ;;  %p7998_p12 = scmp.lt.s32.totalorder %s8218_s30, %s8218_s30 }
  0x32   :  { %p7994_p11 = scmp.ne.s32.totalorder %s8218_s30, %s7993_s22  ;;  %p7999_p13 = scmp.lt.s32.totalorder %s7993_s22, %s7993_s22 }
  0x34   :  { %p8000_p0 = por %p7999_p13, %p7998_p12 }
  0x36   :  { %p8001_p1 = pnand %p8000_p0, %p7994_p11 }
  0x38   :  { %8004 = shalt.err (!%p8001_p1)
}
  0x39   :  { %42 = dma.hbm_to_vmem [thread:$0]  %s9405_s1, 256, %s8218_s30, [#allocation3], %s9386_s2, %s9386_s2, %s9387_s27  }
  0x3a   :  { %s8083_s3 = smov [#allocation7]   ;;  %s8084_s4 = smov [#allocation8]  }
  0x3b   :  { %s84_s29 = sshll.u32 %s8083_s3, 4  ;;  %s98_s0 = sshll.u32 %s8084_s4, 4  ;;  %s85_s29 = int_to_ptr.vmem [resolvable:$true] %s84_s29  ;;  %s8255_s0 = int_to_ptr.vmem [resolvable:$true] %s98_s0 }
  0x3c   :  { %s8005_s24 = scalar_lea.hbm %s9374_s14, 1024 }
  0x3d   :  { %p8006_p2 = scmp.ne.s32.totalorder %s9374_s14, %s8005_s24  ;;  %p8009_p3 = scmp.lt.u32.totalorder %s8005_s24, %s9374_s14 }
  0x3f   :  { %p8011_p4 = pnand %p8009_p3, %p8006_p2 }
  0x41   :  { %8014 = shalt.err (!%p8011_p4)
}
  0x42   :  { %s8015_s30 = scalar_lea.vmem %s85_s29, 1024  ;;  %p8020_p6 = scmp.lt.s32.totalorder %s85_s29, %s85_s29 }
  0x43   :  { %p8016_p5 = scmp.ne.s32.totalorder %s85_s29, %s8015_s30  ;;  %p8021_p7 = scmp.lt.s32.totalorder %s8015_s30, %s8015_s30 }
  0x45   :  { %p8022_p8 = por %p8021_p7, %p8020_p6 }
  0x47   :  { %p8023_p9 = pnand %p8022_p8, %p8016_p5 }
  0x49   :  { %8026 = shalt.err (!%p8023_p9)
}
  0x4a   :  { %90 = dma.hbm_to_vmem [thread:$0]  %s9374_s14, 1024, %s85_s29, [#allocation6], %s9386_s2, %s9386_s2, %s9387_s27  }
  0x4b   :  { %s8027_s21 = scalar_lea.hbm %s9376_s16, 1024 }
  0x4c   :  { %p8028_p10 = scmp.ne.s32.totalorder %s9376_s16, %s8027_s21  ;;  %p8031_p11 = scmp.lt.u32.totalorder %s8027_s21, %s9376_s16 }
  0x4e   :  { %p8033_p12 = pnand %p8031_p11, %p8028_p10 }
  0x50   :  { %8036 = shalt.err (!%p8033_p12)
}
  0x51   :  { %s8037_s6 = scalar_lea.vmem %s8255_s0, 1024  ;;  %p8042_p0 = scmp.lt.s32.totalorder %s8255_s0, %s8255_s0 }
  0x52   :  { %p8038_p13 = scmp.ne.s32.totalorder %s8255_s0, %s8037_s6  ;;  %p8043_p1 = scmp.lt.s32.totalorder %s8037_s6, %s8037_s6 }
  0x54   :  { %p8044_p2 = por %p8043_p1, %p8042_p0 }
  0x56   :  { %p8045_p3 = pnand %p8044_p2, %p8038_p13 }
  0x58   :  { %8048 = shalt.err (!%p8045_p3)
}
  0x59   :  { %104 = dma.hbm_to_vmem [thread:$0]  %s9376_s16, 1024, %s8255_s0, [#allocation9], %s9386_s2, %s9386_s2, %s9387_s27  }
  0x5a   :  { %8071 = dma.done.wait [#allocation3], 256  }
  0x5b   :  { %8072 = vsyncadd [#allocation3], 4294967040 }
  0x5c   :  { %8073 = dma.done.wait [#allocation6], 1536  }
  0x5d   :  { %8074 = vsyncadd [#allocation6], 4294965760 }
  0x5e   :  { %8075 = dma.done.wait [#allocation9], 1024  }
  0x5f   :  { %8076 = vsyncadd [#allocation9], 4294966272  ;;  %vm135_vm0 = vcmask 523264   ;;  %v127_v0 = vld [vmem:[#allocation2] sm:$0xff]  ;;  %v128_v1 = vld [vmem:[#allocation2 + $0x8] sm:$0xff]  ;;  %v8085_v33 = vmov 0.0   ;;  %v197_v55 = vlaneseq }
  0x60   :  { %v136_v2 = vsel %vm135_vm0, %v127_v0, 0.0  ;;  %v139_v3 = vsel %vm135_vm0, %v128_v1, 0.0  ;;  %v180_v14 = vld [vmem:[%s9368_s8 + $0x8] sm:$0xff]  ;;  %v182_v15 = vld [vmem:[%s9368_s8 + $0x18] sm:$0xff]  ;;  %v179_v17 = vld [vmem:[%s9368_s8] sm:$0xff]  ;;  %277 = vmatprep.mubr.f32.mxu0 %v8085_v33  ;;  %6942 = vmatprep.subr.mxu1 %v8085_v33  ;;  %s9406_s16 = sld [smem:[#allocation17_spill]] }
  0x61   :  { %137 = vadd.xlane.f32.xlu0 %v136_v2  ;;  %v7405_v16 = vpack.c.bf16 %v182_v15, %v180_v14  ;;  %v181_v18 = vld [vmem:[%s9368_s8 + $0x10] sm:$0xff]  ;;  %v184_v20 = vld [vmem:[%s9368_s8 + $0x28] sm:$0xff]  ;;  %v186_v21 = vld [vmem:[%s9368_s8 + $0x38] sm:$0xff]  ;;  %s9407_s25 = sld [smem:[#allocation18_spill]]  ;;  %v8356_v56 = vshrl.u32 %v197_v55, 7  ;;  %vm8086_vm1 = vmmov 0  }
  0x62   :  { %v7407_v19 = vpack.c.bf16 %v181_v18, %v179_v17  ;;  %v7409_v22 = vpack.c.bf16 %v186_v21, %v184_v20  ;;  %v183_v23 = vld [vmem:[%s9368_s8 + $0x20] sm:$0xff]  ;;  %v185_v24 = vld [vmem:[%s9368_s8 + $0x30] sm:$0xff]  ;;  %v188_v26 = vld [vmem:[%s9368_s8 + $0x48] sm:$0xff]  ;;  %6944 = vmatprep.mubr.msk.f32.mxu1 %vm8086_vm1, %v8085_v33  ;;  %s8087_s1 = smov 64   ;;  %vm293_vm2 = vcmask 64512   ;;  %s8089_s28 = smov 120  }
  0x63   :  { %7406 = vmatprep.subr.bf16.mxu0 %v7405_v16  ;;  %v7411_v25 = vpack.c.bf16 %v185_v24, %v183_v23  ;;  %v190_v27 = vld [vmem:[%s9368_s8 + $0x58] sm:$0xff]  ;;  %v187_v28 = vld [vmem:[%s9368_s8 + $0x40] sm:$0xff]  ;;  %v189_v30 = vld [vmem:[%s9368_s8 + $0x50] sm:$0xff]  ;;  %v199_v57 = vsub.s32 0, %v8356_v56  ;;  %v203_v61 = vsub.s32 1, %v8356_v56  ;;  %s8090_s23 = smov 48  }
  0x64   :  { %7408 = vmatpush1.bf16.msra.mxu0 %v7407_v19  ;;  %v7413_v29 = vpack.c.bf16 %v190_v27, %v188_v26  ;;  %v192_v31 = vld [vmem:[%s9368_s8 + $0x68] sm:$0xff]  ;;  %v194_v32 = vld [vmem:[%s9368_s8 + $0x78] sm:$0xff]  ;;  %v7415_v34 = vpack.c.bf16 %v189_v30, %v187_v28  ;;  %v191_v36 = vld [vmem:[%s9368_s8 + $0x60] sm:$0xff]  ;;  %s8091_s3 = smov 112   ;;  %s8092_s21 = smov 40   ;;  %vm2983_vm3 = vcmask 130048  }
  0x65   :  { %140 = vadd.xlane.f32.xlu0 %v139_v3  ;;  %7410 = vmatprep.subr.bf16.mxu0 %v7409_v22  ;;  %v7417_v35 = vpack.c.bf16 %v194_v32, %v192_v31  ;;  %v193_v37 = vld [vmem:[%s9368_s8 + $0x70] sm:$0xff]  ;;  %v195_v58 = vld [vmem:[%s9369_s9] sm:$0x3]  ;;  %s8088_s9 = smov 56   ;;  %s8093_s4 = smov 104   ;;  %vm2986_vm4 = vcmask 195584   ;;  %vm8798_vm9 = vmpackc.low %vm293_vm2, %vm293_vm2 }
  0x66   :  { %v7419_v38 = vpack.c.bf16 %v193_v37, %v191_v36  ;;  %v6565_v46 = vld [vmem:[%s9406_s16] ss:$0 sm:$0xff]  ;;  %v200_v59 = vrot.slane %v195_v58, %v199_v57  ;;  %s8094_s5 = smov 32   ;;  %s8095_s22 = smov 96   ;;  %vm2989_vm5 = vcmask 261120   ;;  %vm2992_vm6 = vcmask 326656  }
  0x67   :  { %v6566_v48 = vld [vmem:[%s9407_s25] ss:$0 sm:$0xff]  ;;  %s8096_s24 = smov 24   ;;  %s8097_s6 = smov 88   ;;  %vm2995_vm7 = vcmask 392192   ;;  %vm2998_vm8 = vcmask 457728  }
  0x68   :  { %7412 = vmatpush1.bf16.msra.mxu0 %v7411_v25  ;;  %s9391_s14 = smov 16   ;;  %s9393_s29 = smov 80  }
  0x69   :  { %7414 = vmatprep.subr.bf16.mxu0 %v7413_v29  ;;  %s9389_s16 = smov 72   ;;  %s9408_s2 = sld [smem:[#allocation19_spill]] }
  0x6a   :  { %s9409_s26 = sld [smem:[#allocation20_spill]] }
  0x6c   :  { %7416 = vmatpush1.bf16.msra.mxu0 %v7415_v34 }
  0x6d   :  { %7418 = vmatprep.subr.bf16.mxu0 %v7417_v35 }
  0x70   :  { %7420 = vmatpush1.bf16.msra.mxu0 %v7419_v38 }
  0x71   :  { %6967 = vmatprep.subr.mxu0 %v8085_v33 }
  0xee   :  { %v138_v4 = vpop.xlane.xlu0 %137 }
  0xef   :  { %v143_v5 = vmul.f32 0.015625, %v138_v4 }
  0xf1   :  { %v145_v6 = vsub.f32 %v127_v0, %v143_v5  ;;  %v204_v0 = vrot.slane %v195_v58, %v203_v61 }
  0xf2   :  { %v141_v7 = vpop.xlane.xlu0 %140 }
  0xf3   :  { %v144_v8 = vmul.f32 0.015625, %v141_v7  ;;  %v147_v9 = vmul.f32 %v145_v6, %v145_v6 }
  0xf5   :  { %v146_v10 = vsub.f32 %v128_v1, %v144_v8  ;;  %v149_v11 = vsel %vm135_vm0, %v147_v9, 0.0 }
  0xf6   :  { %150 = vadd.xlane.f32.xlu1 %v149_v11 }
  0xf7   :  { %v148_v12 = vmul.f32 %v146_v10, %v146_v10 }
  0xf9   :  { %v152_v13 = vsel %vm135_vm0, %v148_v12, 0.0 }
  0xfa   :  { %153 = vadd.xlane.f32.xlu1 %v152_v13 }
 0x183   :  { %v151_v39 = vpop.xlane.xlu1 %150 }
 0x184   :  { %v155_v40 = vmul.f32 0.015625, %v151_v39 }
 0x186   :  { %v157_v41 = vadd.f32 1e-05, %v155_v40 }
 0x187   :  { %v154_v42 = vpop.xlane.xlu1 %153 }
 0x188   :  { %7819 = vrsqrt.f32 %v157_v41  ;;  %v156_v43 = vmul.f32 0.015625, %v154_v42 }
 0x18a   :  { %v158_v44 = vadd.f32 1e-05, %v156_v43 }
 0x18c   :  { %7821 = vrsqrt.f32 %v158_v44 }
 0x192   :  { %v7820_v45 = vpop.eup %7819 }
 0x193   :  { %v161_v47 = vmul.f32 %v7820_v45, %v145_v6 }
 0x195   :  { %v169_v49 = vmul.f32 %v6565_v46, %v161_v47 }
 0x196   :  { %v7822_v50 = vpop.eup %7821 }
 0x197   :  { %v177_v51 = vadd.f32 %v6566_v48, %v169_v49  ;;  %v162_v52 = vmul.f32 %v7822_v50, %v146_v10 }
 0x199   :  { %6567 = vmatmul.mubr.msk.f32.vlgmr.msra.gmra.mrb[0].mxu0 %vm135_vm0, %v177_v51  ;;  %v170_v53 = vmul.f32 %v6565_v46, %v162_v52 }
 0x19a   :  { %283 = vmatprep.mubr.f32.mxu0 %v8085_v33 }
 0x19b   :  { %v178_v54 = vadd.f32 %v6566_v48, %v170_v53 }
 0x19d   :  { %6568 = vmatmul.mubr.msk.f32.gmra.mrb[2].mxu0 %vm135_vm0, %v178_v54 }
 0x19e   :  { %6969 = vmatprep.mubr.msk.f32.mxu0 %vm8086_vm1, %v8085_v33 }
 0x26c   :  { %v279_v60 = vpop.f32.mrb[0].mxu0 }
 0x26d   :  { %v8369_v62 = vadd.f32 %v279_v60, %v200_v59  ;;  %v281_v63 = vpop.f32.mrb[1].mxu0 }
 0x26e   :  { %v8389_v7 = vadd.f32 %v281_v63, %v204_v0 }
 0x26f   :  { %291 = vrot.lane.b32.xlu0 %v8369_v62, %s8087_s1 }
 0x270   :  { %v285_v1 = vpop.f32.mrb[2].mxu0 }
 0x271   :  { %v8375_v2 = vadd.f32 %v285_v1, %v200_v59  ;;  %v287_v3 = vpop.f32.mrb[3].mxu0 }
 0x272   :  { %v8377_v4 = vadd.f32 %v287_v3, %v204_v0 }
 0x273   :  { %369 = vrot.lane.b32.xlu1 %v8375_v2, %s8087_s1 }
 0x2e1   :  { %v292_v5 = vpop.permute.xlu0 %291 }
 0x2e2   :  { %6943 = vmatpush3.xpose.msk.msra.mxu1 %vm293_vm2, %v292_v5 }
 0x2e3   :  { %6947 = vmatprep.subr.mxu1 %v8085_v33 }
 0x2e5   :  { %v370_v6 = vpop.permute.xlu1 %369  ;;  %6945 = vmatmul.mubr.msk.f32.vlgmr.msra.gmra.mrb[0].mxu1 %vm293_vm2, %v8369_v62 }
 0x2e6   :  { %6948 = vmatpush3.xpose.msk.msra.mxu1 %vm293_vm2, %v370_v6  ;;  %6949 = vmatprep.mubr.msk.f32.mxu1 %vm8086_vm1, %v8085_v33 }
 0x2e7   :  { %6952 = vmatprep.subr.mxu1 %v8085_v33 }
 0x2e9   :  { %6950 = vmatmul.mubr.msk.f32.vlgmr.msra.gmra.mrb[2].mxu1 %vm293_vm2, %v8375_v2 }
 0x2ea   :  { %6953 = vmatpush3.msra.mxu1 %v8389_v7  ;;  %6954 = vmatprep.mubr.msk.f32.mxu1 %vm8086_vm1, %v8085_v33 }
 0x2eb   :  { %6957 = vmatprep.subr.mxu1 %v8085_v33 }
 0x3b8   :  { %v364_v8 = vpop.f32.mrb[0].mxu1 }
 0x3b9   :  { %v6946_v9 = vpop.f32.mrb[1].mxu1  ;;  %v445_v10 = vsel %vm293_vm2, %v364_v8, -inf }
 0x3ba   :  { %446 = vmax.xlane.f32.xlu1 %v445_v10 }
 0x3bc   :  { %v441_v11 = vpop.f32.mrb[2].mxu1 }
 0x3bd   :  { %v6951_v12 = vpop.f32.mrb[3].mxu1  ;;  %v448_v13 = vsel %vm293_vm2, %v441_v11, -inf }
 0x3be   :  { %449 = vmax.xlane.f32.xlu0 %v448_v13 }
 0x3cb   :  { %693 = vrot.lane.b32.xlu1 %v8375_v2, %s8088_s9 }
 0x3cf   :  { %613 = vrot.lane.b32.xlu1 %v8369_v62, %s8089_s28 }
 0x447   :  { %v447_v14 = vpop.xlane.xlu1 %446 }
 0x448   :  { %v451_v15 = vsub.f32 %v364_v8, %v447_v14 }
 0x44a   :  { %v453_v16 = vmul.f32 1.442695, %v451_v15 }
 0x44b   :  { %v694_v17 = vpop.permute.xlu1 %693  ;;  %v450_v18 = vpop.xlane.xlu0 %449 }
 0x44c   :  { %7823 = vpow2.f32 %v453_v16  ;;  %v452_v19 = vsub.f32 %v441_v11, %v450_v18  ;;  %6968 = vmatpush3.xpose.msk.msra.mxu0 %vm293_vm2, %v694_v17 }
 0x44d   :  { %6977 = vmatprep.subr.mxu0 %v8085_v33 }
 0x44e   :  { %v455_v20 = vmul.f32 1.442695, %v452_v19 }
 0x44f   :  { %v614_v25 = vpop.permute.xlu1 %613 }
 0x450   :  { %7825 = vpow2.f32 %v455_v20 }
 0x456   :  { %v7824_v21 = vpop.eup %7823 }
 0x457   :  { %v457_v22 = vsel %vm293_vm2, %v7824_v21, 0.0 }
 0x458   :  { %458 = vadd.xlane.f32.xlu0 %v457_v22 }
 0x45a   :  { %v7826_v23 = vpop.eup %7825 }
 0x45b   :  { %v460_v24 = vsel %vm293_vm2, %v7826_v23, 0.0 }
 0x45c   :  { %461 = vadd.xlane.f32.xlu1 %v460_v24 }
 0x46d   :  { %691 = vrot.lane.b32.xlu1 %v8375_v2, %s8089_s28 }
 0x46e   :  { %615 = vrot.lane.b32.xlu0 %v8369_v62, %s8088_s9 }
 0x4e5   :  { %v459_v26 = vpop.xlane.xlu0 %458 }
 0x4e6   :  { %7827 = vrcp.f32 %v459_v26 }
 0x4e9   :  { %v462_v27 = vpop.xlane.xlu1 %461  ;;  %v616_v34 = vpop.permute.xlu0 %615 }
 0x4ea   :  { %7829 = vrcp.f32 %v462_v27 }
 0x4ed   :  { %v692_v28 = vpop.permute.xlu1 %691 }
 0x4ee   :  { %6970 = vmatmul.mubr.msk.f32.vlgmr.msra.gmra.mrb[4].mxu0 %vm293_vm2, %v692_v28 }
 0x4ef   :  { %6979 = vmatprep.mubr.msk.f32.mxu0 %vm8086_vm1, %v8085_v33 }
 0x4f0   :  { %v7828_v29 = vpop.eup %7827 }
 0x4f1   :  { %v465_v30 = vmul.f32 %v7828_v29, %v7824_v21 }
 0x4f3   :  { %6955 = vmatmul.mubr.msk.f32.vlgmr.msra.gmra.mrb[4].mxu1 %vm293_vm2, %v465_v30 }
 0x4f4   :  { %v7830_v31 = vpop.eup %7829  ;;  %6958 = vmatpush3.msra.mxu1 %v8377_v4  ;;  %6959 = vmatprep.mubr.msk.f32.mxu1 %vm8086_vm1, %v8085_v33 }
 0x4f5   :  { %v466_v32 = vmul.f32 %v7830_v31, %v7826_v23  ;;  %6962 = vmatprep.subr.mxu1 %v8085_v33 }
 0x4f7   :  { %6960 = vmatmul.mubr.msk.f32.vlgmr.msra.gmra.mrb[6].mxu1 %vm293_vm2, %v466_v32 }
 0x4f8   :  { %6964 = vmatprep.mubr.msk.f32.mxu1 %vm8086_vm1, %v8085_v33 }
 0x4fb   :  { %6963 = vmatpush3.xpose.msk.msra.mxu1 %vm293_vm2, %v616_v34 }
 0x4fc   :  { %6972 = vmatprep.subr.mxu1 %v8085_v33 }
 0x4fe   :  { %6965 = vmatmul.mubr.msk.f32.vlgmr.msra.gmra.mrb[8].mxu1 %vm293_vm2, %v614_v25 }
 0x4ff   :  { %6974 = vmatprep.mubr.msk.f32.mxu1 %vm8086_vm1, %v8085_v33 }
 0x5c1   :  { %v765_v35 = vpop.f32.mrb[4].mxu0 }
 0x5c2   :  { %v6971_v36 = vpop.f32.mrb[5].mxu0  ;;  %v772_v37 = vsel %vm293_vm2, %v765_v35, -inf }
 0x5c3   :  { %773 = vmax.xlane.f32.xlu1 %v772_v37 }
 0x5c6   :  { %v8428_v38 = vpop.f32.mrb[4].mxu1 }
 0x5c7   :  { %v6956_v39 = vpop.f32.mrb[5].mxu1 }
 0x5ca   :  { %v8430_v40 = vpop.f32.mrb[6].mxu1 }
 0x5cb   :  { %v6961_v41 = vpop.f32.mrb[7].mxu1 }
 0x5d1   :  { %v687_v42 = vpop.f32.mrb[8].mxu1 }
 0x5d2   :  { %v6966_v43 = vpop.f32.mrb[9].mxu1  ;;  %v769_v44 = vsel %vm293_vm2, %v687_v42, -inf }
 0x5d3   :  { %770 = vmax.xlane.f32.xlu0 %v769_v44 }
 0x5d4   :  { %869 = vrot.lane.b32.xlu1 %v8377_v4, %s8089_s28 }
 0x5d8   :  { %947 = vrot.lane.b32.xlu1 %v8369_v62, %s8090_s23 }
 0x5dc   :  { %1025 = vrot.lane.b32.xlu1 %v8375_v2, %s8090_s23 }
 0x5e0   :  { %1023 = vrot.lane.b32.xlu1 %v8375_v2, %s8091_s3 }
 0x650   :  { %v774_v45 = vpop.xlane.xlu1 %773 }
 0x651   :  { %v776_v46 = vsub.f32 %v765_v35, %v774_v45 }
 0x653   :  { %v779_v47 = vmul.f32 1.442695, %v776_v46 }
 0x654   :  { %v870_v48 = vpop.permute.xlu1 %869 }
 0x655   :  { %7831 = vpow2.f32 %v779_v47  ;;  %6978 = vmatpush3.msra.mxu0 %v870_v48 }
 0x656   :  { %6987 = vmatprep.subr.mxu0 %v8085_v33 }
 0x658   :  { %v948_v60 = vpop.permute.xlu1 %947 }
 0x65c   :  { %v1026_v0 = vpop.permute.xlu1 %1025 }
 0x65f   :  { %v7832_v49 = vpop.eup %7831 }
 0x660   :  { %v784_v50 = vsel %vm293_vm2, %v7832_v49, 0.0  ;;  %v771_v51 = vpop.xlane.xlu0 %770  ;;  %v1024_v3 = vpop.permute.xlu1 %1023 }
 0x661   :  { %785 = vadd.xlane.f32.xlu0 %v784_v50  ;;  %v775_v52 = vsub.f32 %v687_v42, %v771_v51 }
 0x663   :  { %v777_v53 = vmul.f32 1.442695, %v775_v52 }
 0x665   :  { %7833 = vpow2.f32 %v777_v53 }
 0x66f   :  { %v7834_v54 = vpop.eup %7833 }
 0x670   :  { %v781_v55 = vsel %vm293_vm2, %v7834_v54, 0.0 }
 0x677   :  { %792 = vrot.lane.b32.xlu0 %v8389_v7, %s8089_s28 }
 0x696   :  { %782 = vadd.xlane.f32.xlu0 %v781_v55 }
 0x6ac   :  { %945 = vrot.lane.b32.xlu0 %v8369_v62, %s8091_s3 }
 0x6ee   :  { %v786_v58 = vpop.xlane.xlu0 %785 }
 0x6ef   :  { %7835 = vrcp.f32 %v786_v58 }
 0x6f2   :  { %v793_v59 = vpop.permute.xlu0 %792 }
 0x6f3   :  { %6973 = vmatpush3.msra.mxu1 %v793_v59 }
 0x6f4   :  { %6982 = vmatprep.subr.mxu1 %v8085_v33 }
 0x6f9   :  { %v7836_v63 = vpop.eup %7835 }
 0x6fa   :  { %v790_v1 = vmul.f32 %v7836_v63, %v7832_v49 }
 0x6fc   :  { %6980 = vmatmul.mubr.msk.f32.vlgmr.msra.gmra.mrb[6].mxu0 %vm293_vm2, %v790_v1 }
 0x6fd   :  { %6988 = vmatpush3.xpose.msk.msra.mxu0 %vm293_vm2, %v1026_v0  ;;  %6989 = vmatprep.mubr.msk.f32.mxu0 %vm8086_vm1, %v8085_v33 }
 0x6fe   :  { %6997 = vmatprep.subr.mxu0 %v8085_v33 }
 0x700   :  { %6990 = vmatmul.mubr.msk.f32.vlgmr.msra.gmra.mrb[8].mxu0 %vm293_vm2, %v1024_v3 }
 0x701   :  { %6999 = vmatprep.mubr.msk.f32.mxu0 %vm8086_vm1, %v8085_v33 }
 0x723   :  { %v783_v5 = vpop.xlane.xlu0 %782 }
 0x724   :  { %7837 = vrcp.f32 %v783_v5 }
 0x727   :  { %v946_v9 = vpop.permute.xlu0 %945 }
 0x72e   :  { %v7838_v6 = vpop.eup %7837 }
 0x72f   :  { %v789_v8 = vmul.f32 %v7838_v6, %v7834_v54 }
 0x731   :  { %6975 = vmatmul.mubr.msk.f32.vlgmr.msra.gmra.mrb[10].mxu1 %vm293_vm2, %v789_v8 }
 0x732   :  { %6983 = vmatpush3.xpose.msk.msra.mxu1 %vm293_vm2, %v948_v60  ;;  %6984 = vmatprep.mubr.msk.f32.mxu1 %vm8086_vm1, %v8085_v33 }
 0x733   :  { %6992 = vmatprep.subr.mxu1 %v8085_v33 }
 0x735   :  { %6985 = vmatmul.mubr.msk.f32.vlgmr.msra.gmra.mrb[12].mxu1 %vm293_vm2, %v946_v9 }
 0x736   :  { %6994 = vmatprep.mubr.msk.f32.mxu1 %vm8086_vm1, %v8085_v33 }
 0x7cf   :  { %v8465_v10 = vpop.f32.mrb[6].mxu0 }
 0x7d0   :  { %v6981_v11 = vpop.f32.mrb[7].mxu0 }
 0x7d3   :  { %v1097_v12 = vpop.f32.mrb[8].mxu0 }
 0x7d4   :  { %v6991_v13 = vpop.f32.mrb[9].mxu0  ;;  %v1104_v14 = vsel %vm293_vm2, %v1097_v12, -inf }
 0x7d5   :  { %1105 = vmax.xlane.f32.xlu1 %v1104_v14 }
 0x7e6   :  { %1199 = vrot.lane.b32.xlu1 %v8377_v4, %s8091_s3 }
 0x7ea   :  { %1277 = vrot.lane.b32.xlu1 %v8369_v62, %s8092_s21 }
 0x7ee   :  { %1355 = vrot.lane.b32.xlu1 %v8375_v2, %s8092_s21 }
 0x7f2   :  { %1353 = vrot.lane.b32.xlu1 %v8375_v2, %s8093_s4 }
 0x804   :  { %v8476_v15 = vpop.f32.mrb[10].mxu1 }
 0x805   :  { %v6976_v16 = vpop.f32.mrb[11].mxu1 }
 0x808   :  { %v1019_v17 = vpop.f32.mrb[12].mxu1 }
 0x809   :  { %v6986_v18 = vpop.f32.mrb[13].mxu1  ;;  %v1101_v19 = vsel %vm293_vm2, %v1019_v17, -inf }
 0x80a   :  { %1102 = vmax.xlane.f32.xlu0 %v1101_v19 }
 0x862   :  { %v1106_v20 = vpop.xlane.xlu1 %1105 }
 0x863   :  { %v1108_v21 = vsub.f32 %v1097_v12, %v1106_v20 }
 0x865   :  { %v1111_v22 = vmul.f32 1.442695, %v1108_v21 }
 0x866   :  { %v1200_v23 = vpop.permute.xlu1 %1199 }
 0x867   :  { %7839 = vpow2.f32 %v1111_v22  ;;  %6998 = vmatpush3.msra.mxu0 %v1200_v23 }
 0x868   :  { %7007 = vmatprep.subr.mxu0 %v8085_v33 }
 0x86a   :  { %v1278_v34 = vpop.permute.xlu1 %1277 }
 0x86e   :  { %v1356_v36 = vpop.permute.xlu1 %1355 }
 0x871   :  { %v7840_v24 = vpop.eup %7839 }
 0x872   :  { %v1116_v25 = vsel %vm293_vm2, %v7840_v24, 0.0  ;;  %v1354_v39 = vpop.permute.xlu1 %1353 }
 0x873   :  { %1117 = vadd.xlane.f32.xlu0 %v1116_v25 }
 0x889   :  { %1123 = vrot.lane.b32.xlu0 %v8389_v7, %s8091_s3 }
 0x897   :  { %v1103_v26 = vpop.xlane.xlu0 %1102 }
 0x898   :  { %v1107_v27 = vsub.f32 %v1019_v17, %v1103_v26 }
 0x89a   :  { %v1109_v28 = vmul.f32 1.442695, %v1107_v27 }
 0x89c   :  { %7841 = vpow2.f32 %v1109_v28 }
 0x8a6   :  { %v7842_v29 = vpop.eup %7841 }
 0x8a7   :  { %v1113_v30 = vsel %vm293_vm2, %v7842_v29, 0.0 }
 0x8a8   :  { %1114 = vadd.xlane.f32.xlu0 %v1113_v30 }
 0x8be   :  { %1275 = vrot.lane.b32.xlu0 %v8369_v62, %s8093_s4 }
 0x900   :  { %v1118_v31 = vpop.xlane.xlu0 %1117 }
 0x901   :  { %7843 = vrcp.f32 %v1118_v31 }
 0x904   :  { %v1124_v32 = vpop.permute.xlu0 %1123 }
 0x905   :  { %6993 = vmatpush3.msra.mxu1 %v1124_v32 }
 0x906   :  { %7002 = vmatprep.subr.mxu1 %v8085_v33 }
 0x90b   :  { %v7844_v35 = vpop.eup %7843 }
 0x90c   :  { %v1122_v37 = vmul.f32 %v7844_v35, %v7840_v24 }
 0x90e   :  { %7000 = vmatmul.mubr.msk.f32.vlgmr.msra.gmra.mrb[10].mxu0 %vm293_vm2, %v1122_v37 }
 0x90f   :  { %7008 = vmatpush3.xpose.msk.msra.mxu0 %vm293_vm2, %v1356_v36  ;;  %7009 = vmatprep.mubr.msk.f32.mxu0 %vm8086_vm1, %v8085_v33 }
 0x910   :  { %7017 = vmatprep.subr.mxu0 %v8085_v33 }
 0x912   :  { %7010 = vmatmul.mubr.msk.f32.vlgmr.msra.gmra.mrb[12].mxu0 %vm293_vm2, %v1354_v39 }
 0x913   :  { %7019 = vmatprep.mubr.msk.f32.mxu0 %vm8086_vm1, %v8085_v33 }
 0x935   :  { %v1115_v41 = vpop.xlane.xlu0 %1114 }
 0x936   :  { %7845 = vrcp.f32 %v1115_v41 }
 0x939   :  { %v1276_v44 = vpop.permute.xlu0 %1275 }
 0x940   :  { %v7846_v42 = vpop.eup %7845 }
 0x941   :  { %v1121_v43 = vmul.f32 %v7846_v42, %v7842_v29 }
 0x943   :  { %6995 = vmatmul.mubr.msk.f32.vlgmr.msra.gmra.mrb[14].mxu1 %vm293_vm2, %v1121_v43 }
 0x944   :  { %7003 = vmatpush3.xpose.msk.msra.mxu1 %vm293_vm2, %v1278_v34  ;;  %7004 = vmatprep.mubr.msk.f32.mxu1 %vm8086_vm1, %v8085_v33 }
 0x945   :  { %7012 = vmatprep.subr.mxu1 %v8085_v33 }
 0x947   :  { %7005 = vmatmul.mubr.msk.f32.vlgmr.msra.gmra.mrb[16].mxu1 %vm293_vm2, %v1276_v44 }
 0x948   :  { %7014 = vmatprep.mubr.msk.f32.mxu1 %vm8086_vm1, %v8085_v33 }
 0x9e1   :  { %v8503_v45 = vpop.f32.mrb[10].mxu0 }
 0x9e2   :  { %v7001_v46 = vpop.f32.mrb[11].mxu0 }
 0x9e5   :  { %v1427_v47 = vpop.f32.mrb[12].mxu0 }
 0x9e6   :  { %v7011_v48 = vpop.f32.mrb[13].mxu0  ;;  %v1434_v49 = vsel %vm293_vm2, %v1427_v47, -inf }
 0x9e7   :  { %1435 = vmax.xlane.f32.xlu1 %v1434_v49 }
 0x9f8   :  { %1529 = vrot.lane.b32.xlu1 %v8377_v4, %s8093_s4 }
 0x9fc   :  { %1607 = vrot.lane.b32.xlu1 %v8369_v62, %s8094_s5 }
 0xa00   :  { %1685 = vrot.lane.b32.xlu1 %v8375_v2, %s8094_s5 }
 0xa04   :  { %1683 = vrot.lane.b32.xlu1 %v8375_v2, %s8095_s22 }
 0xa16   :  { %v8514_v50 = vpop.f32.mrb[14].mxu1 }
 0xa17   :  { %v6996_v51 = vpop.f32.mrb[15].mxu1 }
 0xa1a   :  { %v1349_v52 = vpop.f32.mrb[16].mxu1 }
 0xa1b   :  { %v7006_v53 = vpop.f32.mrb[17].mxu1  ;;  %v1431_v54 = vsel %vm293_vm2, %v1349_v52, -inf }
 0xa1c   :  { %1432 = vmax.xlane.f32.xlu0 %v1431_v54 }
 0xa74   :  { %v1436_v55 = vpop.xlane.xlu1 %1435 }
 0xa75   :  { %v1438_v58 = vsub.f32 %v1427_v47, %v1436_v55 }
 0xa77   :  { %v1441_v59 = vmul.f32 1.442695, %v1438_v58 }
 0xa78   :  { %v1530_v60 = vpop.permute.xlu1 %1529 }
 0xa79   :  { %7847 = vpow2.f32 %v1441_v59  ;;  %7018 = vmatpush3.msra.mxu0 %v1530_v60 }
 0xa7a   :  { %7027 = vmatprep.subr.mxu0 %v8085_v33 }
 0xa7c   :  { %v1608_v12 = vpop.permute.xlu1 %1607 }
 0xa80   :  { %v1686_v14 = vpop.permute.xlu1 %1685 }
 0xa83   :  { %v7848_v63 = vpop.eup %7847 }
 0xa84   :  { %v1446_v0 = vsel %vm293_vm2, %v7848_v63, 0.0  ;;  %v1684_v17 = vpop.permute.xlu1 %1683 }
 0xa85   :  { %1447 = vadd.xlane.f32.xlu0 %v1446_v0 }
 0xa9b   :  { %1453 = vrot.lane.b32.xlu0 %v8389_v7, %s8093_s4 }
 0xaa9   :  { %v1433_v1 = vpop.xlane.xlu0 %1432 }
 0xaaa   :  { %v1437_v3 = vsub.f32 %v1349_v52, %v1433_v1 }
 0xaac   :  { %v1439_v5 = vmul.f32 1.442695, %v1437_v3 }
 0xaae   :  { %7849 = vpow2.f32 %v1439_v5 }
 0xab8   :  { %v7850_v6 = vpop.eup %7849 }
 0xab9   :  { %v1443_v8 = vsel %vm293_vm2, %v7850_v6, 0.0 }
 0xaba   :  { %1444 = vadd.xlane.f32.xlu0 %v1443_v8 }
 0xad0   :  { %1605 = vrot.lane.b32.xlu0 %v8369_v62, %s8095_s22 }
 0xb12   :  { %v1448_v9 = vpop.xlane.xlu0 %1447 }
 0xb13   :  { %7851 = vrcp.f32 %v1448_v9 }
 0xb16   :  { %v1454_v11 = vpop.permute.xlu0 %1453 }
 0xb17   :  { %7013 = vmatpush3.msra.mxu1 %v1454_v11 }
 0xb18   :  { %7022 = vmatprep.subr.mxu1 %v8085_v33 }
 0xb1d   :  { %v7852_v13 = vpop.eup %7851 }
 0xb1e   :  { %v1452_v16 = vmul.f32 %v7852_v13, %v7848_v63 }
 0xb20   :  { %7020 = vmatmul.mubr.msk.f32.vlgmr.msra.gmra.mrb[14].mxu0 %vm293_vm2, %v1452_v16 }
 0xb21   :  { %7028 = vmatpush3.xpose.msk.msra.mxu0 %vm293_vm2, %v1686_v14  ;;  %7029 = vmatprep.mubr.msk.f32.mxu0 %vm8086_vm1, %v8085_v33 }
 0xb22   :  { %7037 = vmatprep.subr.mxu0 %v8085_v33 }
 0xb24   :  { %7030 = vmatmul.mubr.msk.f32.vlgmr.msra.gmra.mrb[16].mxu0 %vm293_vm2, %v1684_v17 }
 0xb25   :  { %7039 = vmatprep.mubr.msk.f32.mxu0 %vm8086_vm1, %v8085_v33 }
 0xb47   :  { %v1445_v18 = vpop.xlane.xlu0 %1444 }
 0xb48   :  { %7853 = vrcp.f32 %v1445_v18 }
 0xb4b   :  { %v1606_v21 = vpop.permute.xlu0 %1605 }
 0xb52   :  { %v7854_v19 = vpop.eup %7853 }
 0xb53   :  { %v1451_v20 = vmul.f32 %v7854_v19, %v7850_v6 }
 0xb55   :  { %7015 = vmatmul.mubr.msk.f32.vlgmr.msra.gmra.mrb[18].mxu1 %vm293_vm2, %v1451_v20 }
 0xb56   :  { %7023 = vmatpush3.xpose.msk.msra.mxu1 %vm293_vm2, %v1608_v12  ;;  %7024 = vmatprep.mubr.msk.f32.mxu1 %vm8086_vm1, %v8085_v33 }
 0xb57   :  { %7032 = vmatprep.subr.mxu1 %v8085_v33 }
 0xb59   :  { %7025 = vmatmul.mubr.msk.f32.vlgmr.msra.gmra.mrb[20].mxu1 %vm293_vm2, %v1606_v21 }
 0xb5a   :  { %7034 = vmatprep.mubr.msk.f32.mxu1 %vm8086_vm1, %v8085_v33 }
 0xbf3   :  { %v8541_v22 = vpop.f32.mrb[14].mxu0 }
 0xbf4   :  { %v7021_v23 = vpop.f32.mrb[15].mxu0 }
 0xbf7   :  { %v1757_v24 = vpop.f32.mrb[16].mxu0 }
 0xbf8   :  { %v7031_v25 = vpop.f32.mrb[17].mxu0  ;;  %v1764_v26 = vsel %vm293_vm2, %v1757_v24, -inf }
 0xbf9   :  { %1765 = vmax.xlane.f32.xlu1 %v1764_v26 }
 0xc0a   :  { %1859 = vrot.lane.b32.xlu1 %v8377_v4, %s8095_s22 }
 0xc0e   :  { %1937 = vrot.lane.b32.xlu1 %v8369_v62, %s8096_s24 }
 0xc12   :  { %2015 = vrot.lane.b32.xlu1 %v8375_v2, %s8096_s24 }
 0xc16   :  { %2013 = vrot.lane.b32.xlu1 %v8375_v2, %s8097_s6 }
 0xc28   :  { %v8552_v27 = vpop.f32.mrb[18].mxu1 }
 0xc29   :  { %v7016_v28 = vpop.f32.mrb[19].mxu1 }
 0xc2c   :  { %v1679_v29 = vpop.f32.mrb[20].mxu1 }
 0xc2d   :  { %v7026_v30 = vpop.f32.mrb[21].mxu1  ;;  %v1761_v31 = vsel %vm293_vm2, %v1679_v29, -inf }
 0xc2e   :  { %1762 = vmax.xlane.f32.xlu0 %v1761_v31 }
 0xc86   :  { %v1766_v32 = vpop.xlane.xlu1 %1765 }
 0xc87   :  { %v1768_v34 = vsub.f32 %v1757_v24, %v1766_v32 }
 0xc89   :  { %v1771_v35 = vmul.f32 1.442695, %v1768_v34 }
 0xc8a   :  { %v1860_v36 = vpop.permute.xlu1 %1859 }
 0xc8b   :  { %7855 = vpow2.f32 %v1771_v35  ;;  %7038 = vmatpush3.msra.mxu0 %v1860_v36 }
 0xc8c   :  { %7047 = vmatprep.subr.mxu0 %v8085_v33 }
 0xc8e   :  { %v1938_v49 = vpop.permute.xlu1 %1937 }
 0xc92   :  { %v2016_v52 = vpop.permute.xlu1 %2015 }
 0xc95   :  { %v7856_v37 = vpop.eup %7855 }
 0xc96   :  { %v1776_v39 = vsel %vm293_vm2, %v7856_v37, 0.0  ;;  %v2014_v54 = vpop.permute.xlu1 %2013 }
 0xc97   :  { %1777 = vadd.xlane.f32.xlu0 %v1776_v39 }
 0xcad   :  { %1783 = vrot.lane.b32.xlu0 %v8389_v7, %s8095_s22 }
 0xcbb   :  { %v1763_v41 = vpop.xlane.xlu0 %1762 }
 0xcbc   :  { %v1767_v42 = vsub.f32 %v1679_v29, %v1763_v41 }
 0xcbe   :  { %v1769_v43 = vmul.f32 1.442695, %v1767_v42 }
 0xcc0   :  { %7857 = vpow2.f32 %v1769_v43 }
 0xcca   :  { %v7858_v44 = vpop.eup %7857 }
 0xccb   :  { %v1773_v46 = vsel %vm293_vm2, %v7858_v44, 0.0 }
 0xccc   :  { %1774 = vadd.xlane.f32.xlu0 %v1773_v46 }
 0xce2   :  { %1935 = vrot.lane.b32.xlu0 %v8369_v62, %s8097_s6 }
 0xd24   :  { %v1778_v47 = vpop.xlane.xlu0 %1777 }
 0xd25   :  { %7859 = vrcp.f32 %v1778_v47 }
 0xd28   :  { %v1784_v48 = vpop.permute.xlu0 %1783 }
 0xd29   :  { %7033 = vmatpush3.msra.mxu1 %v1784_v48 }
 0xd2a   :  { %7042 = vmatprep.subr.mxu1 %v8085_v33 }
 0xd2f   :  { %v7860_v51 = vpop.eup %7859 }
 0xd30   :  { %v1782_v53 = vmul.f32 %v7860_v51, %v7856_v37 }
 0xd32   :  { %7040 = vmatmul.mubr.msk.f32.vlgmr.msra.gmra.mrb[18].mxu0 %vm293_vm2, %v1782_v53 }
 0xd33   :  { %7048 = vmatpush3.xpose.msk.msra.mxu0 %vm293_vm2, %v2016_v52  ;;  %7049 = vmatprep.mubr.msk.f32.mxu0 %vm8086_vm1, %v8085_v33 }
 0xd34   :  { %7057 = vmatprep.subr.mxu0 %v8085_v33 }
 0xd36   :  { %7050 = vmatmul.mubr.msk.f32.vlgmr.msra.gmra.mrb[20].mxu0 %vm293_vm2, %v2014_v54 }
 0xd37   :  { %7059 = vmatprep.mubr.msk.f32.mxu0 %vm8086_vm1, %v8085_v33 }
 0xd59   :  { %v1775_v55 = vpop.xlane.xlu0 %1774 }
 0xd5a   :  { %7861 = vrcp.f32 %v1775_v55 }
 0xd5d   :  { %v1936_v60 = vpop.permute.xlu0 %1935 }
 0xd64   :  { %v7862_v58 = vpop.eup %7861 }
 0xd65   :  { %v1781_v59 = vmul.f32 %v7862_v58, %v7858_v44 }
 0xd67   :  { %7035 = vmatmul.mubr.msk.f32.vlgmr.msra.gmra.mrb[22].mxu1 %vm293_vm2, %v1781_v59 }
 0xd68   :  { %7043 = vmatpush3.xpose.msk.msra.mxu1 %vm293_vm2, %v1938_v49  ;;  %7044 = vmatprep.mubr.msk.f32.mxu1 %vm8086_vm1, %v8085_v33 }
 0xd69   :  { %7052 = vmatprep.subr.mxu1 %v8085_v33 }
 0xd6b   :  { %7045 = vmatmul.mubr.msk.f32.vlgmr.msra.gmra.mrb[24].mxu1 %vm293_vm2, %v1936_v60 }
 0xd6c   :  { %7054 = vmatprep.mubr.msk.f32.mxu1 %vm8086_vm1, %v8085_v33 }
 0xe05   :  { %v8579_v63 = vpop.f32.mrb[18].mxu0 }
 0xe06   :  { %v7041_v0 = vpop.f32.mrb[19].mxu0 }
 0xe09   :  { %v2087_v1 = vpop.f32.mrb[20].mxu0 }
 0xe0a   :  { %v7051_v3 = vpop.f32.mrb[21].mxu0  ;;  %v2094_v5 = vsel %vm293_vm2, %v2087_v1, -inf }
 0xe0b   :  { %2095 = vmax.xlane.f32.xlu1 %v2094_v5 }
 0xe1c   :  { %2189 = vrot.lane.b32.xlu1 %v8377_v4, %s8097_s6 }
 0xe20   :  { %2267 = vrot.lane.b32.xlu1 %v8369_v62, %s9391_s14 }
 0xe24   :  { %2345 = vrot.lane.b32.xlu1 %v8375_v2, %s9391_s14 }
 0xe28   :  { %2343 = vrot.lane.b32.xlu1 %v8375_v2, %s9393_s29 }
 0xe3a   :  { %v8590_v6 = vpop.f32.mrb[22].mxu1 }
 0xe3b   :  { %v7036_v8 = vpop.f32.mrb[23].mxu1 }
 0xe3e   :  { %v2009_v9 = vpop.f32.mrb[24].mxu1 }
 0xe3f   :  { %v7046_v11 = vpop.f32.mrb[25].mxu1  ;;  %v2091_v12 = vsel %vm293_vm2, %v2009_v9, -inf }
 0xe40   :  { %2092 = vmax.xlane.f32.xlu0 %v2091_v12 }
 0xe98   :  { %v2096_v13 = vpop.xlane.xlu1 %2095 }
 0xe99   :  { %v2098_v14 = vsub.f32 %v2087_v1, %v2096_v13 }
 0xe9b   :  { %v2101_v16 = vmul.f32 1.442695, %v2098_v14 }
 0xe9c   :  { %v2190_v17 = vpop.permute.xlu1 %2189 }
 0xe9d   :  { %7863 = vpow2.f32 %v2101_v16  ;;  %7058 = vmatpush3.msra.mxu0 %v2190_v17 }
 0xe9e   :  { %7067 = vmatprep.subr.mxu0 %v8085_v33 }
 0xea0   :  { %v2268_v29 = vpop.permute.xlu1 %2267 }
 0xea4   :  { %v2346_v31 = vpop.permute.xlu1 %2345 }
 0xea7   :  { %v7864_v18 = vpop.eup %7863 }
 0xea8   :  { %v2106_v19 = vsel %vm293_vm2, %v7864_v18, 0.0  ;;  %v2344_v34 = vpop.permute.xlu1 %2343 }
 0xea9   :  { %2107 = vadd.xlane.f32.xlu0 %v2106_v19 }
 0xebf   :  { %2113 = vrot.lane.b32.xlu0 %v8389_v7, %s8097_s6 }
 0xecd   :  { %v2093_v20 = vpop.xlane.xlu0 %2092 }
 0xece   :  { %v2097_v21 = vsub.f32 %v2009_v9, %v2093_v20 }
 0xed0   :  { %v2099_v23 = vmul.f32 1.442695, %v2097_v21 }
 0xed2   :  { %7865 = vpow2.f32 %v2099_v23 }
 0xedc   :  { %v7866_v24 = vpop.eup %7865 }
 0xedd   :  { %v2103_v25 = vsel %vm293_vm2, %v7866_v24, 0.0 }
 0xede   :  { %2104 = vadd.xlane.f32.xlu0 %v2103_v25 }
 0xef4   :  { %2265 = vrot.lane.b32.xlu0 %v8369_v62, %s9393_s29 }
 0xf36   :  { %v2108_v26 = vpop.xlane.xlu0 %2107 }
 0xf37   :  { %7867 = vrcp.f32 %v2108_v26 }
 0xf3a   :  { %v2114_v28 = vpop.permute.xlu0 %2113 }
 0xf3b   :  { %7053 = vmatpush3.msra.mxu1 %v2114_v28 }
 0xf3c   :  { %7062 = vmatprep.subr.mxu1 %v8085_v33 }
 0xf41   :  { %v7868_v30 = vpop.eup %7867 }
 0xf42   :  { %v2112_v32 = vmul.f32 %v7868_v30, %v7864_v18 }
 0xf44   :  { %7060 = vmatmul.mubr.msk.f32.vlgmr.msra.gmra.mrb[22].mxu0 %vm293_vm2, %v2112_v32 }
 0xf45   :  { %7068 = vmatpush3.xpose.msk.msra.mxu0 %vm293_vm2, %v2346_v31  ;;  %7069 = vmatprep.mubr.msk.f32.mxu0 %vm8086_vm1, %v8085_v33 }
 0xf46   :  { %7077 = vmatprep.subr.mxu0 %v8085_v33 }
 0xf48   :  { %7070 = vmatmul.mubr.msk.f32.vlgmr.msra.gmra.mrb[24].mxu0 %vm293_vm2, %v2344_v34 }
 0xf49   :  { %7079 = vmatprep.mubr.msk.f32.mxu0 %vm8086_vm1, %v8085_v33 }
 0xf6b   :  { %v2105_v35 = vpop.xlane.xlu0 %2104 }
 0xf6c   :  { %7869 = vrcp.f32 %v2105_v35 }
 0xf6f   :  { %v2266_v39 = vpop.permute.xlu0 %2265 }
 0xf76   :  { %v7870_v36 = vpop.eup %7869 }
 0xf77   :  { %v2111_v37 = vmul.f32 %v7870_v36, %v7866_v24 }
 0xf79   :  { %7055 = vmatmul.mubr.msk.f32.vlgmr.msra.gmra.mrb[26].mxu1 %vm293_vm2, %v2111_v37 }
 0xf7a   :  { %7063 = vmatpush3.xpose.msk.msra.mxu1 %vm293_vm2, %v2268_v29  ;;  %7064 = vmatprep.mubr.msk.f32.mxu1 %vm8086_vm1, %v8085_v33 }
 0xf7b   :  { %7072 = vmatprep.subr.mxu1 %v8085_v33 }
 0xf7d   :  { %7065 = vmatmul.mubr.msk.f32.vlgmr.msra.gmra.mrb[28].mxu1 %vm293_vm2, %v2266_v39 }
 0xf7e   :  { %7074 = vmatprep.mubr.msk.f32.mxu1 %vm8086_vm1, %v8085_v33 }
0x1017   :  { %v8617_v41 = vpop.f32.mrb[22].mxu0 }
0x1018   :  { %v7061_v42 = vpop.f32.mrb[23].mxu0 }
0x101b   :  { %v2417_v43 = vpop.f32.mrb[24].mxu0 }
0x101c   :  { %v7071_v44 = vpop.f32.mrb[25].mxu0  ;;  %v2424_v46 = vsel %vm293_vm2, %v2417_v43, -inf }
0x101d   :  { %2425 = vmax.xlane.f32.xlu1 %v2424_v46  ;;  %v3002_v44 = vld [vmem:[%s9370_s10 + $0x8] sm:$0xff]  ;;  %v3003_v46 = vld [vmem:[%s9370_s10 + $0x10] sm:$0xff] }
0x102e   :  { %2519 = vrot.lane.b32.xlu1 %v8377_v4, %s9393_s29 }
0x1032   :  { %2597 = vrot.lane.b32.xlu1 %v8369_v62, %s9387_s27 }
0x1036   :  { %2675 = vrot.lane.b32.xlu1 %v8375_v2, %s9387_s27 }
0x103a   :  { %2673 = vrot.lane.b32.xlu1 %v8375_v2, %s9389_s16 }
0x104c   :  { %v8628_v47 = vpop.f32.mrb[26].mxu1 }
0x104d   :  { %v7056_v48 = vpop.f32.mrb[27].mxu1 }
0x104e   :  { %v3004_v48 = vld [vmem:[%s9370_s10 + $0x18] sm:$0xff] }
0x1050   :  { %v2339_v49 = vpop.f32.mrb[28].mxu1 }
0x1051   :  { %v7066_v51 = vpop.f32.mrb[29].mxu1  ;;  %v2421_v52 = vsel %vm293_vm2, %v2339_v49, -inf }
0x1052   :  { %2422 = vmax.xlane.f32.xlu0 %v2421_v52  ;;  %v3005_v51 = vld [vmem:[%s9370_s10 + $0x20] sm:$0xff]  ;;  %v3006_v52 = vld [vmem:[%s9370_s10 + $0x28] sm:$0xff] }
0x10aa   :  { %v2426_v53 = vpop.xlane.xlu1 %2425 }
0x10ab   :  { %v2428_v54 = vsub.f32 %v2417_v43, %v2426_v53  ;;  %v3001_v43 = vld [vmem:[%s9370_s10] sm:$0xff]  ;;  %v7429_v53 = vpack.c.bf16 %v3006_v52, %v3005_v51  ;;  %v3146_v51 = vld [vmem:[%s9372_s12 + $0x8] sm:$0xff] }
0x10ad   :  { %v2431_v55 = vmul.f32 1.442695, %v2428_v54  ;;  %v3007_v54 = vld [vmem:[%s9370_s10 + $0x30] sm:$0xff] }
0x10ae   :  { %v2520_v58 = vpop.permute.xlu1 %2519 }
0x10af   :  { %7871 = vpow2.f32 %v2431_v55  ;;  %7078 = vmatpush3.msra.mxu0 %v2520_v58  ;;  %v3008_v55 = vld [vmem:[%s9370_s10 + $0x38] sm:$0xff] }
0x10b0   :  { %7087 = vmatprep.subr.mxu0 %v8085_v33  ;;  %v7433_v58 = vpack.c.bf16 %v3008_v55, %v3007_v54  ;;  %v3148_v54 = vld [vmem:[%s9372_s12 + $0x18] sm:$0xff] }
0x10b2   :  { %v2598_v11 = vpop.permute.xlu1 %2597 }
0x10b6   :  { %v2676_v13 = vpop.permute.xlu1 %2675 }
0x10b9   :  { %v7872_v59 = vpop.eup %7871 }
0x10ba   :  { %v2436_v60 = vsel %vm293_vm2, %v7872_v59, 0.0 }
0x10bb   :  { %2437 = vadd.xlane.f32.xlu0 %v2436_v60 }
0x10d1   :  { %2443 = vrot.lane.b32.xlu0 %v8389_v7, %s9393_s29 }
0x10df   :  { %v2423_v2 = vpop.xlane.xlu0 %2422 }
0x10e0   :  { %v2427_v0 = vsub.f32 %v2339_v49, %v2423_v2  ;;  %v7425_v49 = vpack.c.bf16 %v3004_v48, %v3003_v46 }
0x10e2   :  { %v2429_v1 = vmul.f32 1.442695, %v2427_v0 }
0x10e4   :  { %7873 = vpow2.f32 %v2429_v1 }
0x10ee   :  { %v7874_v3 = vpop.eup %7873 }
0x10ef   :  { %v2433_v5 = vsel %vm293_vm2, %v7874_v3, 0.0 }
0x10f0   :  { %2434 = vadd.xlane.f32.xlu0 %v2433_v5 }
0x1106   :  { %2595 = vrot.lane.b32.xlu0 %v8369_v62, %s9389_s16  ;;  %v2674_v62 = vpop.permute.xlu1 %2673 }
0x1148   :  { %v2438_v8 = vpop.xlane.xlu0 %2437 }
0x1149   :  { %7875 = vrcp.f32 %v2438_v8 }
0x114c   :  { %v2444_v9 = vpop.permute.xlu0 %2443 }
0x114d   :  { %7073 = vmatpush3.msra.mxu1 %v2444_v9 }
0x114e   :  { %7082 = vmatprep.subr.mxu1 %v8085_v33 }
0x1153   :  { %v7876_v12 = vpop.eup %7875 }
0x1154   :  { %v2442_v14 = vmul.f32 %v7876_v12, %v7872_v59 }
0x1156   :  { %7080 = vmatmul.mubr.msk.f32.vlgmr.msra.gmra.mrb[26].mxu0 %vm293_vm2, %v2442_v14 }
0x1157   :  { %7088 = vmatpush3.xpose.msk.msra.mxu0 %vm293_vm2, %v2676_v13  ;;  %7089 = vmatprep.mubr.msk.f32.mxu0 %vm8086_vm1, %v8085_v33 }
0x1158   :  { %7097 = vmatprep.subr.mxu0 %v8085_v33 }
0x115a   :  { %7090 = vmatmul.mubr.msk.f32.vlgmr.msra.gmra.mrb[28].mxu0 %vm293_vm2, %v2674_v62 }
0x115b   :  { %7099 = vmatprep.mubr.msk.f32.mxu0 %vm8086_vm1, %v8085_v33 }
0x117d   :  { %v2435_v16 = vpop.xlane.xlu0 %2434 }
0x117e   :  { %7877 = vrcp.f32 %v2435_v16 }
0x1181   :  { %v2596_v19 = vpop.permute.xlu0 %2595 }
0x1188   :  { %v7878_v17 = vpop.eup %7877 }
0x1189   :  { %v2441_v18 = vmul.f32 %v7878_v17, %v7874_v3 }
0x118b   :  { %7075 = vmatmul.mubr.msk.f32.vlgmr.msra.gmra.mrb[30].mxu1 %vm293_vm2, %v2441_v18 }
0x118c   :  { %7083 = vmatpush3.xpose.msk.msra.mxu1 %vm293_vm2, %v2598_v11  ;;  %7084 = vmatprep.mubr.msk.f32.mxu1 %vm8086_vm1, %v8085_v33 }
0x118d   :  { %7092 = vmatprep.subr.mxu1 %v8085_v33 }
0x118f   :  { %7085 = vmatmul.mubr.msk.f32.vlgmr.msra.gmra.mrb[32].mxu1 %vm293_vm2, %v2596_v19 }
0x1190   :  { %7094 = vmatprep.mubr.msk.f32.mxu1 %vm8086_vm1, %v8085_v33 }
0x1229   :  { %v2591_v20 = vpop.f32.mrb[26].mxu0 }
0x122a   :  { %v7081_v21 = vpop.f32.mrb[27].mxu0 }
0x122d   :  { %v2747_v23 = vpop.f32.mrb[28].mxu0 }
0x122e   :  { %v7091_v24 = vpop.f32.mrb[29].mxu0  ;;  %v2754_v25 = vsel %vm293_vm2, %v2747_v23, -inf }
0x122f   :  { %2755 = vmax.xlane.f32.xlu1 %v2754_v25 }
0x1240   :  { %2849 = vrot.lane.b32.xlu1 %v8377_v4, %s9389_s16 }
0x1244   :  { %2927 = vrot.lane.b32.xlu1 %v8476_v15, %s9387_s27 }
0x1248   :  { %2929 = vrot.lane.b32.xlu1 %v8465_v10, %s9387_s27 }
0x124c   :  { %2937 = vrot.lane.b32.xlu1 %v8503_v45, %s9391_s14 }
0x1250   :  { %2945 = vrot.lane.b32.xlu1 %v8541_v22, %s8096_s24 }
0x1254   :  { %2953 = vrot.lane.b32.xlu1 %v8579_v63, %s8094_s5 }
0x1258   :  { %2961 = vrot.lane.b32.xlu1 %v8617_v41, %s8092_s21 }
0x125c   :  { %2969 = vrot.lane.b32.xlu1 %v2591_v20, %s8090_s23 }
0x125e   :  { %v2515_v4 = vpop.f32.mrb[30].mxu1 }
0x125f   :  { %v7076_v26 = vpop.f32.mrb[31].mxu1 }
0x1262   :  { %v2669_v15 = vpop.f32.mrb[32].mxu1 }
0x1263   :  { %v7086_v28 = vpop.f32.mrb[33].mxu1  ;;  %v2751_v10 = vsel %vm293_vm2, %v2669_v15, -inf }
0x1264   :  { %2752 = vmax.xlane.f32.xlu0 %v2751_v10 }
0x12bc   :  { %v2756_v29 = vpop.xlane.xlu1 %2755 }
0x12bd   :  { %v2758_v45 = vsub.f32 %v2747_v23, %v2756_v29 }
0x12bf   :  { %v2761_v30 = vmul.f32 1.442695, %v2758_v45 }
0x12c0   :  { %v2850_v31 = vpop.permute.xlu1 %2849 }
0x12c1   :  { %7879 = vpow2.f32 %v2761_v30  ;;  %7098 = vmatpush3.msra.mxu0 %v2850_v31  ;;  %v6619_v31 = vld [vmem:[%s9371_s11] ss:$0 sm:$0xff] }
0x12c4   :  { %v2928_v1 = vpop.permute.xlu1 %2927 }
0x12c5   :  { %v2981_v16 = vsel %vm293_vm2, %v8428_v38, %v2928_v1 }
0x12c8   :  { %v2930_v3 = vpop.permute.xlu1 %2929 }
0x12c9   :  { %v2982_v18 = vsel %vm293_vm2, %v8430_v40, %v2930_v3  ;;  %v3241_v3 = vld [vmem:[#allocation7] sm:$0xff] }
0x12cb   :  { %v7880_v22 = vpop.eup %7879 }
0x12cc   :  { %v2766_v63 = vsel %vm293_vm2, %v7880_v22, 0.0  ;;  %v2938_v5 = vpop.permute.xlu1 %2937 }
0x12cd   :  { %2767 = vadd.xlane.f32.xlu0 %v2766_v63  ;;  %v2985_v21 = vsel %vm2983_vm3, %v2982_v18, %v2938_v5  ;;  %v3242_v5 = vld [vmem:[#allocation7 + $0x8] sm:$0xff] }
0x12d0   :  { %v2946_v9 = vpop.permute.xlu1 %2945 }
0x12d1   :  { %v2988_v24 = vsel %vm2986_vm4, %v2985_v21, %v2946_v9 }
0x12d4   :  { %v2954_v12 = vpop.permute.xlu1 %2953 }
0x12d5   :  { %v2991_v38 = vsel %vm2989_vm5, %v2988_v24, %v2954_v12 }
0x12d8   :  { %v2962_v14 = vpop.permute.xlu1 %2961 }
0x12d9   :  { %v2994_v26 = vsel %vm2992_vm6, %v2991_v38, %v2962_v14  ;;  %v3244_v38 = vld [vmem:[#allocation7 + $0x18] sm:$0xff] }
0x12dc   :  { %v2970_v17 = vpop.permute.xlu1 %2969 }
0x12dd   :  { %v2997_v10 = vsel %vm2995_vm7, %v2994_v26, %v2970_v17  ;;  %v6620_v17 = vld [vmem:[%s9408_s2] ss:$0 sm:$0xff] }
0x12f1   :  { %v2753_v32 = vpop.xlane.xlu0 %2752 }
0x12f2   :  { %v2757_v34 = vsub.f32 %v2669_v15, %v2753_v32 }
0x12f4   :  { %v2759_v35 = vmul.f32 1.442695, %v2757_v34  ;;  %v7960_v34 = vld [vmem:[#allocation2] sm:$0xff] }
0x12f6   :  { %7881 = vpow2.f32 %v2759_v35 }
0x1300   :  { %v7882_v36 = vpop.eup %7881 }
0x1301   :  { %v2763_v37 = vsel %vm293_vm2, %v7882_v36, 0.0 }
0x1302   :  { %2764 = vadd.xlane.f32.xlu0 %v2763_v37 }
0x1318   :  { %2773 = vrot.lane.b32.xlu0 %v8389_v7, %s9389_s16 }
0x131c   :  { %2935 = vrot.lane.b32.xlu0 %v8514_v50, %s9391_s14 }
0x1320   :  { %2943 = vrot.lane.b32.xlu0 %v8552_v27, %s8096_s24 }
0x1324   :  { %2951 = vrot.lane.b32.xlu0 %v8590_v6, %s8094_s5 }
0x1328   :  { %2959 = vrot.lane.b32.xlu0 %v8628_v47, %s8092_s21  ;;  %v7421_v47 = vpack.c.bf16 %v3002_v44, %v3001_v43 }
0x132c   :  { %2967 = vrot.lane.b32.xlu0 %v2515_v4, %s8090_s23 }
0x135a   :  { %v2768_v39 = vpop.xlane.xlu0 %2767 }
0x135b   :  { %7883 = vrcp.f32 %v2768_v39 }
0x1365   :  { %v7884_v41 = vpop.eup %7883 }
0x1366   :  { %v2772_v42 = vmul.f32 %v7884_v41, %v7880_v22  ;;  %v7959_v22 = vld [vmem:[#allocation2 + $0x8] sm:$0xff] }
0x1368   :  { %7100 = vmatmul.mubr.msk.f32.vlgmr.msra.gmra.mrb[30].mxu0 %vm293_vm2, %v2772_v42 }
0x1369   :  { %7166 = vmatprep.mubr.msk.f32.mxu0 %vm8086_vm1, %v8085_v33 }
0x138f   :  { %v2765_v7 = vpop.xlane.xlu0 %2764 }
0x1390   :  { %7885 = vrcp.f32 %v2765_v7 }
0x1393   :  { %v2774_v50 = vpop.permute.xlu0 %2773 }
0x1394   :  { %7093 = vmatpush3.msra.mxu1 %v2774_v50 }
0x1395   :  { %7422 = vmatprep.subr.bf16.mxu1 %v7421_v47 }
0x1397   :  { %v2936_v8 = vpop.permute.xlu0 %2935 }
0x1398   :  { %v2984_v19 = vsel %vm2983_vm3, %v2981_v16, %v2936_v8  ;;  %v7453_v8 = vpack.c.bf16 %v3242_v5, %v3241_v3 }
0x139a   :  { %v7886_v27 = vpop.eup %7885 }
0x139b   :  { %v2771_v6 = vmul.f32 %v7886_v27, %v7882_v36  ;;  %v2944_v11 = vpop.permute.xlu0 %2943 }
0x139c   :  { %v2987_v23 = vsel %vm2986_vm4, %v2984_v19, %v2944_v11  ;;  %v6621_v19 = vld [vmem:[%s9409_s26] ss:$0 sm:$0xff] }
0x139d   :  { %7095 = vmatmul.mubr.msk.f32.vlgmr.msra.gmra.mrb[34].mxu1 %vm293_vm2, %v2771_v6 }
0x139e   :  { %7424 = vmatpush3.bf16.msra.mxu1 %v7421_v47 }
0x139f   :  { %7426 = vmatprep.subr.bf16.mxu1 %v7425_v49  ;;  %v2952_v13 = vpop.permute.xlu0 %2951 }
0x13a0   :  { %v2990_v25 = vsel %vm2989_vm5, %v2987_v23, %v2952_v13 }
0x13a2   :  { %7428 = vmatpush3.bf16.msra.mxu1 %v7425_v49  ;;  %v3145_v49 = vld [vmem:[%s9372_s12] sm:$0xff] }
0x13a3   :  { %7430 = vmatprep.subr.bf16.mxu1 %v7429_v53  ;;  %v2960_v62 = vpop.permute.xlu0 %2959  ;;  %v7437_v52 = vpack.c.bf16 %v3146_v51, %v3145_v49 }
0x13a4   :  { %v2993_v4 = vsel %vm2992_vm6, %v2990_v25, %v2960_v62  ;;  %v3243_v25 = vld [vmem:[#allocation7 + $0x10] sm:$0xff] }
0x13a5   :  { %v7457_v26 = vpack.c.bf16 %v3244_v38, %v3243_v25 }
0x13a6   :  { %7432 = vmatpush3.bf16.msra.mxu1 %v7429_v53  ;;  %v3147_v53 = vld [vmem:[%s9372_s12 + $0x10] sm:$0xff] }
0x13a7   :  { %7434 = vmatprep.subr.bf16.mxu1 %v7433_v58  ;;  %v2968_v20 = vpop.permute.xlu0 %2967  ;;  %v7441_v55 = vpack.c.bf16 %v3148_v54, %v3147_v53 }
0x13a8   :  { %v2996_v15 = vsel %vm2995_vm7, %v2993_v4, %v2968_v20 }
0x13aa   :  { %7436 = vmatpush3.bf16.msra.mxu1 %v7433_v58  ;;  %v3149_v58 = vld [vmem:[%s9372_s12 + $0x20] sm:$0xff] }
0x13ab   :  { %7438 = vmatprep.subr.bf16.mxu1 %v7437_v52 }
0x143b   :  { %v2921_v59 = vpop.f32.mrb[30].mxu0 }
0x143c   :  { %2977 = vrot.lane.b32.xlu1 %v2921_v59, %s8088_s9  ;;  %v7101_v60 = vpop.f32.mrb[31].mxu0  ;;  %v3150_v59 = vld [vmem:[%s9372_s12 + $0x28] sm:$0xff] }
0x143d   :  { %v7445_v60 = vpack.c.bf16 %v3150_v59, %v3149_v58 }
0x1470   :  { %v2845_v2 = vpop.f32.mrb[34].mxu1 }
0x1471   :  { %2975 = vrot.lane.b32.xlu0 %v2845_v2, %s8088_s9  ;;  %v7096_v0 = vpop.f32.mrb[35].mxu1  ;;  %v3151_v2 = vld [vmem:[%s9372_s12 + $0x30] sm:$0xff] }
0x1472   :  { %v3152_v0 = vld [vmem:[%s9372_s12 + $0x38] sm:$0xff] }
0x1473   :  { %v7449_v1 = vpack.c.bf16 %v3152_v0, %v3151_v2 }
0x14ae   :  { %v2978_v40 = vpop.permute.xlu1 %2977 }
0x14af   :  { %v3000_v45 = vsel %vm2998_vm8, %v2997_v10, %v2978_v40  ;;  %v3246_v10 = vld [vmem:[#allocation7 + $0x28] sm:$0xff] }
0x14e3   :  { %v2976_v28 = vpop.permute.xlu0 %2975 }
0x14e4   :  { %v2999_v29 = vsel %vm2998_vm8, %v2996_v15, %v2976_v28  ;;  %v129_v15 = vld [vmem:[#allocation5] sm:$0xff] }
0x14e5   :  { %7118 = vmatprep.mubr.msk.f32.mxu1 %vm135_vm0, %v2999_v29  ;;  %v3245_v28 = vld [vmem:[#allocation7 + $0x20] sm:$0xff] }
0x14e6   :  { %7119 = vmatmul.mubr.msk.f32.vlgmr.msra.gmra.mrb[36].mxu1 %vm135_vm0, %v3000_v45  ;;  %v7461_v29 = vpack.c.bf16 %v3246_v10, %v3245_v28  ;;  %v3247_v45 = vld [vmem:[#allocation7 + $0x30] sm:$0xff] }
0x14e7   :  { %7440 = vmatpush3.bf16.msra.mxu1 %v7437_v52 }
0x14e8   :  { %7442 = vmatprep.subr.bf16.mxu1 %v7441_v55 }
0x14eb   :  { %7444 = vmatpush3.bf16.msra.mxu1 %v7441_v55 }
0x14ec   :  { %7446 = vmatprep.subr.bf16.mxu1 %v7445_v60 }
0x14ef   :  { %7448 = vmatpush3.bf16.msra.mxu1 %v7445_v60 }
0x14f0   :  { %7450 = vmatprep.subr.bf16.mxu1 %v7449_v1 }
0x14f3   :  { %7452 = vmatpush3.bf16.msra.mxu1 %v7449_v1 }
0x14f4   :  { %7454 = vmatprep.subr.bf16.mxu1 %v7453_v8 }
0x15b9   :  { %v7120_v30 = vpop.f32.mrb[36].mxu1 }
0x15ba   :  { %v3091_v63 = vadd.f32 %v7959_v22, %v7120_v30  ;;  %v3081_v32 = vpop.f32.mrb[37].mxu1  ;;  %v3248_v30 = vld [vmem:[#allocation7 + $0x38] sm:$0xff]  ;;  %v130_v22 = vld [vmem:[#allocation5 + $0x8] sm:$0xff] }
0x15bb   :  { %v3090_v35 = vadd.f32 %v7960_v34, %v3081_v32  ;;  %v132_v32 = vld [vmem:[#allocation5 + $0x18] sm:$0xff]  ;;  %v8101_v34 = vmov 0.0|0.0  }
0x15bc   :  { %v8736_v36 = vadd.f32 %v6619_v31, %v3091_v63  ;;  %v131_v63 = vld [vmem:[#allocation5 + $0x10] sm:$0xff]  ;;  %7469 = vmatprep.subr.bf16.mxu0 %v8101_v34 }
0x15bd   :  { %v8738_v37 = vadd.f32 %v6619_v31, %v3090_v35  ;;  %v7465_v31 = vpack.c.bf16 %v3248_v30, %v3247_v45 }
0x15be   :  { %v3106_v39 = vsel %vm135_vm0, %v8736_v36, 0.0 }
0x15bf   :  { %3107 = vadd.xlane.f32.xlu1 %v3106_v39  ;;  %v3103_v41 = vsel %vm135_vm0, %v8738_v37, 0.0 }
0x15c0   :  { %3104 = vadd.xlane.f32.xlu0 %v3103_v41  ;;  %v6625_v41 = vld [vmem:[%s9375_s15] ss:$0 sm:$0xff]  ;;  %s9413_s15 = smov 16  }
0x164c   :  { %v3108_v42 = vpop.xlane.xlu1 %3107 }
0x164d   :  { %v3110_v7 = vmul.f32 0.015625, %v3108_v42  ;;  %v3105_v50 = vpop.xlane.xlu0 %3104  ;;  %v6622_v42 = vld [vmem:[%s9373_s13] ss:$0 sm:$0xff]  ;;  %s9412_s13 = smov 80  }
0x164e   :  { %v3109_v27 = vmul.f32 0.015625, %v3105_v50 }
0x164f   :  { %v3112_v6 = vsub.f32 %v8736_v36, %v3110_v7 }
0x1650   :  { %v3111_v43 = vsub.f32 %v8738_v37, %v3109_v27 }
0x1651   :  { %v3114_v47 = vmul.f32 %v3112_v6, %v3112_v6 }
0x1652   :  { %v3113_v44 = vmul.f32 %v3111_v43, %v3111_v43 }
0x1653   :  { %v3118_v48 = vsel %vm135_vm0, %v3114_v47, 0.0 }
0x1654   :  { %v3115_v46 = vsel %vm135_vm0, %v3113_v44, 0.0 }
0x1655   :  { %3116 = vadd.xlane.f32.xlu0 %v3115_v46 }
0x1659   :  { %3119 = vadd.xlane.f32.xlu0 %v3118_v48 }
0x16e2   :  { %v3117_v9 = vpop.xlane.xlu0 %3116 }
0x16e3   :  { %v3121_v11 = vmul.f32 0.015625, %v3117_v9 }
0x16e5   :  { %v3123_v12 = vadd.f32 1e-05, %v3121_v11 }
0x16e6   :  { %v3120_v13 = vpop.xlane.xlu0 %3119 }
0x16e7   :  { %7887 = vrsqrt.f32 %v3123_v12  ;;  %v3122_v14 = vmul.f32 0.015625, %v3120_v13 }
0x16e9   :  { %v3124_v62 = vadd.f32 1e-05, %v3122_v14 }
0x16eb   :  { %7889 = vrsqrt.f32 %v3124_v62 }
0x16f1   :  { %v7888_v16 = vpop.eup %7887 }
0x16f2   :  { %v3127_v18 = vmul.f32 %v7888_v16, %v3111_v43 }
0x16f4   :  { %v3135_v20 = vmul.f32 %v6620_v17, %v3127_v18 }
0x16f5   :  { %v7890_v21 = vpop.eup %7889 }
0x16f6   :  { %v3128_v23 = vmul.f32 %v7890_v21, %v3112_v6  ;;  %v3143_v24 = vadd.f32 %v6621_v19, %v3135_v20 }
0x16f8   :  { %v3136_v4 = vmul.f32 %v6620_v17, %v3128_v23  ;;  %7137 = vmatprep.mubr.msk.f32.mxu1 %vm135_vm0, %v3143_v24 }
0x16fa   :  { %v3144_v40 = vadd.f32 %v6621_v19, %v3136_v4 }
0x16fc   :  { %7138 = vmatmul.mubr.msk.f32.vlgmr.msra.gmra.mrb[38].mxu1 %vm135_vm0, %v3144_v40 }
0x16fd   :  { %7456 = vmatpush3.bf16.msra.mxu1 %v7453_v8  ;;  %7156 = vmatprep.mubr.msk.f32.mxu1 %vm135_vm0, %v129_v15 }
0x16fe   :  { %7458 = vmatprep.subr.bf16.mxu1 %v7457_v26 }
0x1701   :  { %7460 = vmatpush3.bf16.msra.mxu1 %v7457_v26 }
0x1702   :  { %7462 = vmatprep.subr.bf16.mxu1 %v7461_v29 }
0x1705   :  { %7464 = vmatpush3.bf16.msra.mxu1 %v7461_v29 }
0x1706   :  { %7466 = vmatprep.subr.bf16.mxu1 %v7465_v31 }
0x1709   :  { %7468 = vmatpush3.bf16.msra.mxu1 %v7465_v31 }
0x170a   :  { %7480 = vmatprep.subr.bf16.mxu1 %v8101_v34 }
0x170c   :  { %7157 = vmatmul.mubr.msk.f32.vlgmr.msra.gmra.mrb[40].mxu1 %vm135_vm0, %v130_v22 }
0x170d   :  { %7159 = vmatprep.mubr.msk.f32.mxu1 %vm135_vm0, %v131_v63 }
0x1710   :  { %7160 = vmatmul.mubr.msk.f32.gmra.mrb[42].mxu1 %vm135_vm0, %v132_v32 }
0x1711   :  { %7187 = vmatprep.mubr.msk.f32.mxu1 %vm8086_vm1, %v8085_v33 }
0x17cf   :  { %v7139_v35 = vpop.f32.mrb[38].mxu1 }
0x17d0   :  { %v3232_v39 = vpop.f32.mrb[39].mxu1  ;;  %v8816_v55 = vadd.f32 %v7139_v35, %v6622_v42 }
0x17d1   :  { %v8794_v43 = vadd.f32 %v6622_v42, %v3232_v39 }
0x17df   :  { %v7158_v7 = vpop.f32.mrb[40].mxu1 }
0x17e0   :  { %v3340_v50 = vadd.f32 %v7158_v7, %v6625_v41  ;;  %v3334_v27 = vpop.f32.mrb[41].mxu1 }
0x17e1   :  { %v3335_v6 = vadd.f32 %v6625_v41, %v3334_v27 }
0x17e3   :  { %v7470_v46 = vpack.c.bf16 %v3340_v50, %v3335_v6  ;;  %v7161_v47 = vpop.f32.mrb[42].mxu1  ;;  %v8802_v48 = vpack.i.bf16 %v3340_v50, %v3335_v6 }
0x17e4   :  { %v3350_v49 = vadd.f32 %v7161_v47, %v6625_v41  ;;  %v3344_v51 = vpop.f32.mrb[43].mxu1 }
0x17e5   :  { %7472 = vmatpush3.bf16.xpose.msk.msra.mxu0 %vm8798_vm9, %v7470_v46  ;;  %v3345_v52 = vadd.f32 %v6625_v41, %v3344_v51 }
0x17e6   :  { %7473 = vmatprep.subr.bf16.mxu0 %v8101_v34 }
0x17e7   :  { %v7474_v53 = vpack.c.bf16 %v3350_v49, %v3345_v52  ;;  %v8807_v54 = vpack.i.bf16 %v3350_v49, %v3345_v52 }
0x17ec   :  { %7167 = vmatmul.mubr.msk.f32.vlgmr.msra.gmra.mrb[32].mxu0 %vm293_vm2, %v8794_v43 }
0x17ed   :  { %7476 = vmatpush3.bf16.xpose.msk.msra.mxu0 %vm8798_vm9, %v7474_v53  ;;  %7173 = vmatprep.mubr.msk.f32.mxu0 %vm8086_vm1, %v8085_v33 }
0x17ee   :  { %7477 = vmatprep.subr.bf16.mxu0 %v8101_v34 }
0x17f4   :  { %7174 = vmatmul.mubr.msk.f32.vlgmr.msra.gmra.mrb[34].mxu0 %vm293_vm2, %v8816_v55 }
0x17f5   :  { %7180 = vmatprep.mubr.msk.f32.mxu0 %vm8086_vm1, %v8085_v33 }
0x18bf   :  { %v3428_v58 = vpop.f32.mrb[32].mxu0 }
0x18c0   :  { %v7168_v59 = vpop.f32.mrb[33].mxu0  ;;  %v3511_v60 = vsel %vm2983_vm3, %v3428_v58, -inf }
0x18c1   :  { %3512 = vmax.xlane.f32.xlu0 %v3511_v60 }
0x18c7   :  { %v3507_v2 = vpop.f32.mrb[34].mxu0 }
0x18c8   :  { %v7175_v0 = vpop.f32.mrb[35].mxu0  ;;  %v3514_v1 = vsel %vm2983_vm3, %v3507_v2, -inf }
0x18c9   :  { %3515 = vmax.xlane.f32.xlu1 %v3514_v1 }
0x18da   :  { %7675 = vrot.lane.b32.xlu1 %v8807_v54, %s8087_s1 }
0x18de   :  { %7680 = vrot.lane.b32.xlu1 %v8802_v48, %s8089_s28 }
0x18e2   :  { %7685 = vrot.lane.b32.xlu1 %v8807_v54, %s8089_s28 }
0x194e   :  { %v3513_v3 = vpop.xlane.xlu0 %3512 }
0x194f   :  { %v3517_v5 = vsub.f32 %v3428_v58, %v3513_v3 }
0x1951   :  { %v3519_v8 = vmul.f32 1.442695, %v3517_v5 }
0x1953   :  { %7891 = vpow2.f32 %v3519_v8 }
0x1956   :  { %v3516_v9 = vpop.xlane.xlu1 %3515 }
0x1957   :  { %v3518_v11 = vsub.f32 %v3507_v2, %v3516_v9 }
0x1959   :  { %v3521_v12 = vmul.f32 1.442695, %v3518_v11 }
0x195a   :  { %v7676_v13 = vpop.permute.xlu1 %7675 }
0x195b   :  { %7893 = vpow2.f32 %v3521_v12  ;;  %v7678_v14 = vunpack.i.h.bf16 %v7676_v13  ;;  %v7677_v62 = vunpack.i.l.bf16 %v7676_v13 }
0x195d   :  { %v7892_v16 = vpop.eup %7891  ;;  %v7481_v17 = vpack.c.bf16 %v7678_v14, %v7677_v62 }
0x195e   :  { %v3523_v18 = vsel %vm2983_vm3, %v7892_v16, 0.0  ;;  %v7681_v21 = vpop.permute.xlu1 %7680 }
0x195f   :  { %3524 = vadd.xlane.f32.xlu0 %v3523_v18  ;;  %7482 = vmatpush3.bf16.msra.mxu1 %v7481_v17  ;;  %v7683_v28 = vunpack.i.h.bf16 %v7681_v21  ;;  %v7682_v10 = vunpack.i.l.bf16 %v7681_v21 }
0x1960   :  { %7487 = vmatprep.subr.bf16.mxu1 %v8101_v34 }
0x1961   :  { %v7484_v45 = vpack.c.bf16 %v7683_v28, %v7682_v10 }
0x1962   :  { %v7686_v24 = vpop.permute.xlu1 %7685 }
0x1963   :  { %v7688_v30 = vunpack.i.h.bf16 %v7686_v24  ;;  %v7687_v31 = vunpack.i.l.bf16 %v7686_v24 }
0x1965   :  { %v7894_v19 = vpop.eup %7893  ;;  %v7488_v32 = vpack.c.bf16 %v7688_v30, %v7687_v31 }
0x1966   :  { %v3526_v20 = vsel %vm2983_vm3, %v7894_v19, 0.0 }
0x1967   :  { %3527 = vadd.xlane.f32.xlu1 %v3526_v20 }
0x1975   :  { %7670 = vrot.lane.b32.xlu0 %v8802_v48, %s8087_s1  ;;  %s9414_s1 = smov 72  }
0x1978   :  { %3773 = vrot.lane.b32.xlu1 %v8816_v55, %s8089_s28 }
0x1979   :  { %3691 = vrot.lane.b32.xlu0 %v8794_v43, %s8089_s28  ;;  %s9415_s28 = smov 8  }
0x19ec   :  { %v3525_v23 = vpop.xlane.xlu0 %3524 }
0x19ed   :  { %7895 = vrcp.f32 %v3525_v23 }
0x19f0   :  { %v7671_v25 = vpop.permute.xlu0 %7670 }
0x19f1   :  { %v7673_v38 = vunpack.i.h.bf16 %v7671_v25  ;;  %v7672_v4 = vunpack.i.l.bf16 %v7671_v25 }
0x19f3   :  { %v7478_v40 = vpack.c.bf16 %v7673_v38, %v7672_v4 }
0x19f4   :  { %v3528_v26 = vpop.xlane.xlu1 %3527  ;;  %v3692_v35 = vpop.permute.xlu0 %3691 }
0x19f5   :  { %7897 = vrcp.f32 %v3528_v26  ;;  %7479 = vmatpush3.bf16.msra.mxu0 %v7478_v40 }
0x19f6   :  { %7483 = vmatprep.subr.bf16.mxu0 %v8101_v34 }
0x19f7   :  { %v7896_v15 = vpop.eup %7895 }
0x19f8   :  { %v3531_v29 = vmul.f32 %v7896_v15, %v7892_v16  ;;  %v3774_v39 = vpop.permute.xlu1 %3773 }
0x19fa   :  { %7181 = vmatmul.mubr.msk.f32.vlgmr.msra.gmra.mrb[36].mxu0 %vm2983_vm3, %v3531_v29 }
0x19fb   :  { %7194 = vmatprep.mubr.msk.f32.mxu0 %vm8086_vm1, %v8085_v33 }
0x19fe   :  { %7486 = vmatpush3.bf16.xpose.msk.msra.mxu0 %vm8798_vm9, %v7484_v45 }
0x19ff   :  { %v7898_v22 = vpop.eup %7897  ;;  %7491 = vmatprep.subr.bf16.mxu0 %v8101_v34 }
0x1a00   :  { %v3532_v63 = vmul.f32 %v7898_v22, %v7894_v19 }
0x1a02   :  { %7188 = vmatmul.mubr.msk.f32.vlgmr.msra.gmra.mrb[44].mxu1 %vm2983_vm3, %v3532_v63 }
0x1a03   :  { %7490 = vmatpush3.bf16.xpose.msk.msra.mxu1 %vm8798_vm9, %v7488_v32  ;;  %7201 = vmatprep.mubr.msk.f32.mxu1 %vm8086_vm1, %v8085_v33 }
0x1a04   :  { %7494 = vmatprep.subr.bf16.mxu1 %v8101_v34 }
0x1a05   :  { %7195 = vmatmul.mubr.msk.f32.vlgmr.msra.gmra.mrb[38].mxu0 %vm293_vm2, %v3692_v35 }
0x1a06   :  { %7208 = vmatprep.mubr.msk.f32.mxu0 %vm8086_vm1, %v8085_v33 }
0x1a0a   :  { %7202 = vmatmul.mubr.msk.f32.vlgmr.msra.gmra.mrb[46].mxu1 %vm293_vm2, %v3774_v39 }
0x1a0b   :  { %7215 = vmatprep.mubr.msk.f32.mxu1 %vm8086_vm1, %v8085_v33 }
0x1acd   :  { %v8858_v41 = vpop.f32.mrb[36].mxu0 }
0x1ace   :  { %v7182_v42 = vpop.f32.mrb[37].mxu0 }
0x1ad5   :  { %v8860_v7 = vpop.f32.mrb[44].mxu1 }
0x1ad6   :  { %v7189_v50 = vpop.f32.mrb[45].mxu1 }
0x1ad8   :  { %v3769_v27 = vpop.f32.mrb[38].mxu0 }
0x1ad9   :  { %v7196_v6 = vpop.f32.mrb[39].mxu0  ;;  %v3855_v46 = vsel %vm2983_vm3, %v3769_v27, -inf }
0x1ada   :  { %3856 = vmax.xlane.f32.xlu0 %v3855_v46 }
0x1add   :  { %v3851_v47 = vpop.f32.mrb[46].mxu1 }
0x1ade   :  { %v7203_v49 = vpop.f32.mrb[47].mxu1  ;;  %v3858_v51 = vsel %vm2983_vm3, %v3851_v47, -inf }
0x1adf   :  { %3859 = vmax.xlane.f32.xlu1 %v3858_v51 }
0x1af0   :  { %7695 = vrot.lane.b32.xlu1 %v8807_v54, %s8088_s9 }
0x1af4   :  { %7700 = vrot.lane.b32.xlu1 %v8802_v48, %s8091_s3 }
0x1af8   :  { %7705 = vrot.lane.b32.xlu1 %v8807_v54, %s8091_s3 }
0x1afc   :  { %4117 = vrot.lane.b32.xlu1 %v8816_v55, %s8091_s3 }
0x1b67   :  { %v3857_v52 = vpop.xlane.xlu0 %3856 }
0x1b68   :  { %v3861_v53 = vsub.f32 %v3769_v27, %v3857_v52 }
0x1b6a   :  { %v3863_v58 = vmul.f32 1.442695, %v3861_v53 }
0x1b6c   :  { %7899 = vpow2.f32 %v3863_v58  ;;  %v3860_v59 = vpop.xlane.xlu1 %3859 }
0x1b6d   :  { %v3862_v60 = vsub.f32 %v3851_v47, %v3860_v59 }
0x1b6f   :  { %v3865_v2 = vmul.f32 1.442695, %v3862_v60 }
0x1b70   :  { %v7696_v0 = vpop.permute.xlu1 %7695 }
0x1b71   :  { %7901 = vpow2.f32 %v3865_v2  ;;  %v7698_v1 = vunpack.i.h.bf16 %v7696_v0  ;;  %v7697_v3 = vunpack.i.l.bf16 %v7696_v0 }
0x1b73   :  { %v7495_v5 = vpack.c.bf16 %v7698_v1, %v7697_v3 }
0x1b74   :  { %v7701_v14 = vpop.permute.xlu1 %7700 }
0x1b75   :  { %7496 = vmatpush3.bf16.msra.mxu1 %v7495_v5  ;;  %v7703_v4 = vunpack.i.h.bf16 %v7701_v14  ;;  %v7702_v40 = vunpack.i.l.bf16 %v7701_v14 }
0x1b76   :  { %v7900_v8 = vpop.eup %7899  ;;  %7501 = vmatprep.subr.bf16.mxu1 %v8101_v34 }
0x1b77   :  { %v3867_v9 = vsel %vm2983_vm3, %v7900_v8, 0.0  ;;  %v7498_v28 = vpack.c.bf16 %v7703_v4, %v7702_v40 }
0x1b78   :  { %3868 = vadd.xlane.f32.xlu0 %v3867_v9  ;;  %v7706_v19 = vpop.permute.xlu1 %7705 }
0x1b79   :  { %v7708_v23 = vunpack.i.h.bf16 %v7706_v19  ;;  %v7707_v24 = vunpack.i.l.bf16 %v7706_v19 }
0x1b7b   :  { %v7902_v11 = vpop.eup %7901  ;;  %v7502_v15 = vpack.c.bf16 %v7708_v23, %v7707_v24 }
0x1b7c   :  { %v3870_v12 = vsel %vm2983_vm3, %v7902_v11, 0.0  ;;  %v4118_v10 = vpop.permute.xlu1 %4117 }
0x1b7d   :  { %3871 = vadd.xlane.f32.xlu0 %v3870_v12 }
0x1b93   :  { %7690 = vrot.lane.b32.xlu0 %v8802_v48, %s8088_s9 }
0x1b97   :  { %4035 = vrot.lane.b32.xlu0 %v8794_v43, %s8091_s3 }
0x1c05   :  { %v3869_v13 = vpop.xlane.xlu0 %3868 }
0x1c06   :  { %7903 = vrcp.f32 %v3869_v13 }
0x1c0a   :  { %v3872_v62 = vpop.xlane.xlu0 %3871 }
0x1c0b   :  { %7905 = vrcp.f32 %v3872_v62 }
0x1c0e   :  { %v7691_v16 = vpop.permute.xlu0 %7690 }
0x1c0f   :  { %v7693_v17 = vunpack.i.h.bf16 %v7691_v16  ;;  %v7692_v18 = vunpack.i.l.bf16 %v7691_v16 }
0x1c10   :  { %v7904_v20 = vpop.eup %7903 }
0x1c11   :  { %v7492_v21 = vpack.c.bf16 %v7693_v17, %v7692_v18  ;;  %v3875_v25 = vmul.f32 %v7904_v20, %v7900_v8 }
0x1c12   :  { %v4036_v29 = vpop.permute.xlu0 %4035 }
0x1c13   :  { %7493 = vmatpush3.bf16.msra.mxu0 %v7492_v21 }
0x1c14   :  { %7497 = vmatprep.subr.bf16.mxu0 %v8101_v34 }
0x1c15   :  { %v7906_v38 = vpop.eup %7905 }
0x1c16   :  { %v3876_v26 = vmul.f32 %v7906_v38, %v7902_v11  ;;  %7209 = vmatmul.mubr.msk.f32.vlgmr.msra.gmra.mrb[40].mxu0 %vm2983_vm3, %v3875_v25 }
0x1c17   :  { %7222 = vmatprep.mubr.msk.f32.mxu0 %vm8086_vm1, %v8085_v33 }
0x1c18   :  { %7216 = vmatmul.mubr.msk.f32.vlgmr.msra.gmra.mrb[48].mxu1 %vm2983_vm3, %v3876_v26 }
0x1c19   :  { %7504 = vmatpush3.bf16.xpose.msk.msra.mxu1 %vm8798_vm9, %v7502_v15  ;;  %7229 = vmatprep.mubr.msk.f32.mxu1 %vm8086_vm1, %v8085_v33 }
0x1c1a   :  { %7508 = vmatprep.subr.bf16.mxu1 %v8101_v34 }
0x1c1c   :  { %7500 = vmatpush3.bf16.xpose.msk.msra.mxu0 %vm8798_vm9, %v7498_v28 }
0x1c1d   :  { %7505 = vmatprep.subr.bf16.mxu0 %v8101_v34 }
0x1c20   :  { %7230 = vmatmul.mubr.msk.f32.vlgmr.msra.gmra.mrb[50].mxu1 %vm293_vm2, %v4118_v10 }
0x1c21   :  { %7243 = vmatprep.mubr.msk.f32.mxu1 %vm8086_vm1, %v8085_v33 }
0x1c23   :  { %7223 = vmatmul.mubr.msk.f32.vlgmr.msra.gmra.mrb[42].mxu0 %vm293_vm2, %v4036_v29 }
0x1c24   :  { %7236 = vmatprep.mubr.msk.f32.mxu0 %vm8086_vm1, %v8085_v33 }
0x1ce9   :  { %v8898_v45 = vpop.f32.mrb[40].mxu0 }
0x1cea   :  { %v7210_v30 = vpop.f32.mrb[41].mxu0 }
0x1ceb   :  { %v8900_v31 = vpop.f32.mrb[48].mxu1 }
0x1cec   :  { %v7217_v22 = vpop.f32.mrb[49].mxu1 }
0x1cf3   :  { %v4195_v63 = vpop.f32.mrb[50].mxu1 }
0x1cf4   :  { %v7231_v32 = vpop.f32.mrb[51].mxu1  ;;  %v4202_v35 = vsel %vm2983_vm3, %v4195_v63, -inf }
0x1cf5   :  { %4203 = vmax.xlane.f32.xlu1 %v4202_v35 }
0x1cf6   :  { %v4113_v39 = vpop.f32.mrb[42].mxu0 }
0x1cf7   :  { %v7224_v42 = vpop.f32.mrb[43].mxu0  ;;  %v4199_v50 = vsel %vm2983_vm3, %v4113_v39, -inf }
0x1cf8   :  { %4200 = vmax.xlane.f32.xlu0 %v4199_v50 }
0x1d06   :  { %7715 = vrot.lane.b32.xlu1 %v8807_v54, %s8090_s23 }
0x1d0a   :  { %7720 = vrot.lane.b32.xlu1 %v8802_v48, %s8093_s4 }
0x1d0e   :  { %7725 = vrot.lane.b32.xlu1 %v8807_v54, %s8093_s4 }
0x1d12   :  { %4461 = vrot.lane.b32.xlu1 %v8816_v55, %s8093_s4 }
0x1d82   :  { %v4204_v27 = vpop.xlane.xlu1 %4203 }
0x1d83   :  { %v4206_v6 = vsub.f32 %v4195_v63, %v4204_v27 }
0x1d85   :  { %v4201_v46 = vpop.xlane.xlu0 %4200  ;;  %v4209_v53 = vmul.f32 1.442695, %v4206_v6 }
0x1d86   :  { %v7716_v47 = vpop.permute.xlu1 %7715  ;;  %v4205_v49 = vsub.f32 %v4113_v39, %v4201_v46 }
0x1d87   :  { %v7718_v51 = vunpack.i.h.bf16 %v7716_v47  ;;  %v7717_v52 = vunpack.i.l.bf16 %v7716_v47 }
0x1d88   :  { %v4207_v58 = vmul.f32 1.442695, %v4205_v49 }
0x1d89   :  { %v7509_v59 = vpack.c.bf16 %v7718_v51, %v7717_v52 }
0x1d8a   :  { %7907 = vpow2.f32 %v4207_v58  ;;  %v7721_v5 = vpop.permute.xlu1 %7720 }
0x1d8b   :  { %7510 = vmatpush3.bf16.msra.mxu1 %v7509_v59  ;;  %7909 = vpow2.f32 %v4209_v53  ;;  %v7723_v20 = vunpack.i.h.bf16 %v7721_v5  ;;  %v7722_v21 = vunpack.i.l.bf16 %v7721_v5 }
0x1d8c   :  { %7515 = vmatprep.subr.bf16.mxu1 %v8101_v34 }
0x1d8d   :  { %v7512_v25 = vpack.c.bf16 %v7723_v20, %v7722_v21 }
0x1d8e   :  { %v7726_v13 = vpop.permute.xlu1 %7725 }
0x1d8f   :  { %v7728_v16 = vunpack.i.h.bf16 %v7726_v13  ;;  %v7727_v17 = vunpack.i.l.bf16 %v7726_v13 }
0x1d91   :  { %v7516_v24 = vpack.c.bf16 %v7728_v16, %v7727_v17 }
0x1d92   :  { %v4462_v38 = vpop.permute.xlu1 %4461 }
0x1d94   :  { %v7908_v60 = vpop.eup %7907 }
0x1d95   :  { %v4211_v2 = vsel %vm2983_vm3, %v7908_v60, 0.0  ;;  %v7910_v0 = vpop.eup %7909 }
0x1d96   :  { %4212 = vadd.xlane.f32.xlu0 %v4211_v2  ;;  %v4214_v1 = vsel %vm2983_vm3, %v7910_v0, 0.0 }
0x1d9a   :  { %4215 = vadd.xlane.f32.xlu0 %v4214_v1 }
0x1db0   :  { %7710 = vrot.lane.b32.xlu0 %v8802_v48, %s8090_s23 }
0x1db4   :  { %4379 = vrot.lane.b32.xlu0 %v8794_v43, %s8093_s4 }
0x1e23   :  { %v4213_v3 = vpop.xlane.xlu0 %4212 }
0x1e24   :  { %7911 = vrcp.f32 %v4213_v3 }
0x1e27   :  { %v4216_v8 = vpop.xlane.xlu0 %4215 }
0x1e28   :  { %7913 = vrcp.f32 %v4216_v8 }
0x1e2b   :  { %v7711_v9 = vpop.permute.xlu0 %7710 }
0x1e2c   :  { %v7713_v11 = vunpack.i.h.bf16 %v7711_v9  ;;  %v7712_v12 = vunpack.i.l.bf16 %v7711_v9 }
0x1e2e   :  { %v7912_v14 = vpop.eup %7911  ;;  %v7506_v62 = vpack.c.bf16 %v7713_v11, %v7712_v12 }
0x1e2f   :  { %v4219_v18 = vmul.f32 %v7912_v14, %v7908_v60  ;;  %v4380_v4 = vpop.permute.xlu0 %4379 }
0x1e30   :  { %7507 = vmatpush3.bf16.msra.mxu0 %v7506_v62 }
0x1e31   :  { %7511 = vmatprep.subr.bf16.mxu0 %v8101_v34 }
0x1e32   :  { %v7914_v19 = vpop.eup %7913 }
0x1e33   :  { %v4220_v23 = vmul.f32 %v7914_v19, %v7910_v0  ;;  %7237 = vmatmul.mubr.msk.f32.vlgmr.msra.gmra.mrb[44].mxu0 %vm2983_vm3, %v4219_v18 }
0x1e34   :  { %7250 = vmatprep.mubr.msk.f32.mxu0 %vm8086_vm1, %v8085_v33 }
0x1e35   :  { %7244 = vmatmul.mubr.msk.f32.vlgmr.msra.gmra.mrb[52].mxu1 %vm2983_vm3, %v4220_v23 }
0x1e36   :  { %7518 = vmatpush3.bf16.xpose.msk.msra.mxu1 %vm8798_vm9, %v7516_v24  ;;  %7257 = vmatprep.mubr.msk.f32.mxu1 %vm8086_vm1, %v8085_v33 }
0x1e37   :  { %7522 = vmatprep.subr.bf16.mxu1 %v8101_v34 }
0x1e39   :  { %7514 = vmatpush3.bf16.xpose.msk.msra.mxu0 %vm8798_vm9, %v7512_v25 }
0x1e3a   :  { %7519 = vmatprep.subr.bf16.mxu0 %v8101_v34 }
0x1e3d   :  { %7258 = vmatmul.mubr.msk.f32.vlgmr.msra.gmra.mrb[54].mxu1 %vm293_vm2, %v4462_v38 }
0x1e3e   :  { %7271 = vmatprep.mubr.msk.f32.mxu1 %vm8086_vm1, %v8085_v33 }
0x1e40   :  { %7251 = vmatmul.mubr.msk.f32.vlgmr.msra.gmra.mrb[46].mxu0 %vm293_vm2, %v4380_v4 }
0x1e41   :  { %7264 = vmatprep.mubr.msk.f32.mxu0 %vm8086_vm1, %v8085_v33 }
0x1f06   :  { %v8938_v40 = vpop.f32.mrb[44].mxu0 }
0x1f07   :  { %v7238_v26 = vpop.f32.mrb[45].mxu0 }
0x1f08   :  { %v8940_v15 = vpop.f32.mrb[52].mxu1 }
0x1f09   :  { %v7245_v28 = vpop.f32.mrb[53].mxu1 }
0x1f10   :  { %v4539_v10 = vpop.f32.mrb[54].mxu1 }
0x1f11   :  { %v7259_v29 = vpop.f32.mrb[55].mxu1  ;;  %v4546_v30 = vsel %vm2983_vm3, %v4539_v10, -inf }
0x1f12   :  { %4547 = vmax.xlane.f32.xlu1 %v4546_v30 }
0x1f13   :  { %v4457_v22 = vpop.f32.mrb[46].mxu0 }
0x1f14   :  { %v7252_v63 = vpop.f32.mrb[47].mxu0  ;;  %v4543_v32 = vsel %vm2983_vm3, %v4457_v22, -inf }
0x1f15   :  { %4544 = vmax.xlane.f32.xlu0 %v4543_v32 }
0x1f23   :  { %7735 = vrot.lane.b32.xlu1 %v8807_v54, %s8092_s21 }
0x1f27   :  { %7740 = vrot.lane.b32.xlu1 %v8802_v48, %s8095_s22 }
0x1f2b   :  { %7745 = vrot.lane.b32.xlu1 %v8807_v54, %s8095_s22 }
0x1f2f   :  { %4805 = vrot.lane.b32.xlu1 %v8816_v55, %s8095_s22 }
0x1f9f   :  { %v4548_v35 = vpop.xlane.xlu1 %4547 }
0x1fa0   :  { %v4550_v39 = vsub.f32 %v4539_v10, %v4548_v35 }
0x1fa2   :  { %v4545_v42 = vpop.xlane.xlu0 %4544  ;;  %v4553_v47 = vmul.f32 1.442695, %v4550_v39 }
0x1fa3   :  { %v7736_v50 = vpop.permute.xlu1 %7735  ;;  %v4549_v27 = vsub.f32 %v4457_v22, %v4545_v42 }
0x1fa4   :  { %v7738_v6 = vunpack.i.h.bf16 %v7736_v50  ;;  %v7737_v46 = vunpack.i.l.bf16 %v7736_v50 }
0x1fa5   :  { %v4551_v49 = vmul.f32 1.442695, %v4549_v27 }
0x1fa6   :  { %v7523_v51 = vpack.c.bf16 %v7738_v6, %v7737_v46 }
0x1fa7   :  { %7915 = vpow2.f32 %v4551_v49  ;;  %v7741_v2 = vpop.permute.xlu1 %7740 }
0x1fa8   :  { %7524 = vmatpush3.bf16.msra.mxu1 %v7523_v51  ;;  %7917 = vpow2.f32 %v4553_v47  ;;  %v7743_v16 = vunpack.i.h.bf16 %v7741_v2  ;;  %v7742_v17 = vunpack.i.l.bf16 %v7741_v2 }
0x1fa9   :  { %7529 = vmatprep.subr.bf16.mxu1 %v8101_v34 }
0x1faa   :  { %v7526_v20 = vpack.c.bf16 %v7743_v16, %v7742_v17 }
0x1fab   :  { %v7746_v8 = vpop.permute.xlu1 %7745 }
0x1fac   :  { %v7748_v12 = vunpack.i.h.bf16 %v7746_v8  ;;  %v7747_v13 = vunpack.i.l.bf16 %v7746_v8 }
0x1fae   :  { %v7530_v19 = vpack.c.bf16 %v7748_v12, %v7747_v13 }
0x1faf   :  { %v4806_v21 = vpop.permute.xlu1 %4805 }
0x1fb1   :  { %v7916_v52 = vpop.eup %7915 }
0x1fb2   :  { %v4555_v53 = vsel %vm2983_vm3, %v7916_v52, 0.0  ;;  %v7918_v58 = vpop.eup %7917 }
0x1fb3   :  { %4556 = vadd.xlane.f32.xlu0 %v4555_v53  ;;  %v4558_v59 = vsel %vm2983_vm3, %v7918_v58, 0.0 }
0x1fb7   :  { %4559 = vadd.xlane.f32.xlu0 %v4558_v59 }
0x1fcd   :  { %7730 = vrot.lane.b32.xlu0 %v8802_v48, %s8092_s21 }
0x1fd1   :  { %4723 = vrot.lane.b32.xlu0 %v8794_v43, %s8095_s22 }
0x2040   :  { %v4557_v60 = vpop.xlane.xlu0 %4556 }
0x2041   :  { %7919 = vrcp.f32 %v4557_v60 }
0x2044   :  { %v4560_v0 = vpop.xlane.xlu0 %4559 }
0x2045   :  { %7921 = vrcp.f32 %v4560_v0 }
0x2048   :  { %v7731_v1 = vpop.permute.xlu0 %7730 }
0x2049   :  { %v7733_v3 = vunpack.i.h.bf16 %v7731_v1  ;;  %v7732_v5 = vunpack.i.l.bf16 %v7731_v1 }
0x204b   :  { %v7920_v9 = vpop.eup %7919  ;;  %v7520_v11 = vpack.c.bf16 %v7733_v3, %v7732_v5 }
0x204c   :  { %v4563_v14 = vmul.f32 %v7920_v9, %v7916_v52  ;;  %v4724_v23 = vpop.permute.xlu0 %4723 }
0x204d   :  { %7521 = vmatpush3.bf16.msra.mxu0 %v7520_v11 }
0x204e   :  { %7525 = vmatprep.subr.bf16.mxu0 %v8101_v34 }
0x204f   :  { %v7922_v62 = vpop.eup %7921 }
0x2050   :  { %v4564_v18 = vmul.f32 %v7922_v62, %v7918_v58  ;;  %7265 = vmatmul.mubr.msk.f32.vlgmr.msra.gmra.mrb[48].mxu0 %vm2983_vm3, %v4563_v14 }
0x2051   :  { %7278 = vmatprep.mubr.msk.f32.mxu0 %vm8086_vm1, %v8085_v33 }
0x2052   :  { %7272 = vmatmul.mubr.msk.f32.vlgmr.msra.gmra.mrb[56].mxu1 %vm2983_vm3, %v4564_v18 }
0x2053   :  { %7532 = vmatpush3.bf16.xpose.msk.msra.mxu1 %vm8798_vm9, %v7530_v19  ;;  %7285 = vmatprep.mubr.msk.f32.mxu1 %vm8086_vm1, %v8085_v33 }
0x2054   :  { %7536 = vmatprep.subr.bf16.mxu1 %v8101_v34 }
0x2056   :  { %7528 = vmatpush3.bf16.xpose.msk.msra.mxu0 %vm8798_vm9, %v7526_v20 }
0x2057   :  { %7533 = vmatprep.subr.bf16.mxu0 %v8101_v34 }
0x205a   :  { %7286 = vmatmul.mubr.msk.f32.vlgmr.msra.gmra.mrb[58].mxu1 %vm293_vm2, %v4806_v21 }
0x205b   :  { %7299 = vmatprep.mubr.msk.f32.mxu1 %vm8086_vm1, %v8085_v33 }
0x205d   :  { %7279 = vmatmul.mubr.msk.f32.vlgmr.msra.gmra.mrb[50].mxu0 %vm293_vm2, %v4724_v23 }
0x205e   :  { %7292 = vmatprep.mubr.msk.f32.mxu0 %vm8086_vm1, %v8085_v33 }
0x2123   :  { %v8978_v24 = vpop.f32.mrb[48].mxu0 }
0x2124   :  { %v7266_v25 = vpop.f32.mrb[49].mxu0 }
0x2125   :  { %v8980_v38 = vpop.f32.mrb[56].mxu1 }
0x2126   :  { %v7273_v4 = vpop.f32.mrb[57].mxu1 }
0x212d   :  { %v4883_v26 = vpop.f32.mrb[58].mxu1 }
0x212e   :  { %v7287_v28 = vpop.f32.mrb[59].mxu1  ;;  %v4890_v10 = vsel %vm2983_vm3, %v4883_v26, -inf }
0x212f   :  { %4891 = vmax.xlane.f32.xlu1 %v4890_v10 }
0x2130   :  { %v4801_v29 = vpop.f32.mrb[50].mxu0 }
0x2131   :  { %v7280_v30 = vpop.f32.mrb[51].mxu0  ;;  %v4887_v22 = vsel %vm2983_vm3, %v4801_v29, -inf }
0x2132   :  { %4888 = vmax.xlane.f32.xlu0 %v4887_v22 }
0x2140   :  { %7755 = vrot.lane.b32.xlu1 %v8807_v54, %s8094_s5 }
0x2144   :  { %7760 = vrot.lane.b32.xlu1 %v8802_v48, %s8097_s6 }
0x2148   :  { %7765 = vrot.lane.b32.xlu1 %v8807_v54, %s8097_s6 }
0x214c   :  { %5149 = vrot.lane.b32.xlu1 %v8816_v55, %s8097_s6 }
0x21bc   :  { %v4892_v63 = vpop.xlane.xlu1 %4891 }
0x21bd   :  { %v4894_v32 = vsub.f32 %v4883_v26, %v4892_v63 }
0x21bf   :  { %v4889_v35 = vpop.xlane.xlu0 %4888  ;;  %v4897_v6 = vmul.f32 1.442695, %v4894_v32 }
0x21c0   :  { %v7756_v39 = vpop.permute.xlu1 %7755  ;;  %v4893_v42 = vsub.f32 %v4801_v29, %v4889_v35 }
0x21c1   :  { %v7758_v50 = vunpack.i.h.bf16 %v7756_v39  ;;  %v7757_v27 = vunpack.i.l.bf16 %v7756_v39 }
0x21c2   :  { %v4895_v46 = vmul.f32 1.442695, %v4893_v42 }
0x21c3   :  { %v7537_v47 = vpack.c.bf16 %v7758_v50, %v7757_v27 }
0x21c4   :  { %7923 = vpow2.f32 %v4895_v46  ;;  %v7761_v59 = vpop.permute.xlu1 %7760 }
0x21c5   :  { %7538 = vmatpush3.bf16.msra.mxu1 %v7537_v47  ;;  %7925 = vpow2.f32 %v4897_v6  ;;  %v7763_v14 = vunpack.i.h.bf16 %v7761_v59  ;;  %v7762_v62 = vunpack.i.l.bf16 %v7761_v59 }
0x21c6   :  { %7543 = vmatprep.subr.bf16.mxu1 %v8101_v34 }
0x21c7   :  { %v7540_v18 = vpack.c.bf16 %v7763_v14, %v7762_v62 }
0x21c8   :  { %v7766_v3 = vpop.permute.xlu1 %7765 }
0x21c9   :  { %v7768_v9 = vunpack.i.h.bf16 %v7766_v3  ;;  %v7767_v11 = vunpack.i.l.bf16 %v7766_v3 }
0x21cb   :  { %v7544_v17 = vpack.c.bf16 %v7768_v9, %v7767_v11 }
0x21cc   :  { %v5150_v19 = vpop.permute.xlu1 %5149 }
0x21ce   :  { %v7924_v49 = vpop.eup %7923 }
0x21cf   :  { %v4899_v51 = vsel %vm2983_vm3, %v7924_v49, 0.0  ;;  %v7926_v52 = vpop.eup %7925 }
0x21d0   :  { %4900 = vadd.xlane.f32.xlu0 %v4899_v51  ;;  %v4902_v53 = vsel %vm2983_vm3, %v7926_v52, 0.0 }
0x21d4   :  { %4903 = vadd.xlane.f32.xlu0 %v4902_v53 }
0x21ea   :  { %7750 = vrot.lane.b32.xlu0 %v8802_v48, %s8094_s5 }
0x21ee   :  { %5067 = vrot.lane.b32.xlu0 %v8794_v43, %s8097_s6 }
0x225d   :  { %v4901_v58 = vpop.xlane.xlu0 %4900 }
0x225e   :  { %7927 = vrcp.f32 %v4901_v58 }
0x2261   :  { %v4904_v60 = vpop.xlane.xlu0 %4903 }
0x2262   :  { %7929 = vrcp.f32 %v4904_v60 }
0x2265   :  { %v7751_v2 = vpop.permute.xlu0 %7750 }
0x2266   :  { %v7753_v0 = vunpack.i.h.bf16 %v7751_v2  ;;  %v7752_v1 = vunpack.i.l.bf16 %v7751_v2 }
0x2268   :  { %v7928_v5 = vpop.eup %7927  ;;  %v7534_v8 = vpack.c.bf16 %v7753_v0, %v7752_v1 }
0x2269   :  { %v4907_v12 = vmul.f32 %v7928_v5, %v7924_v49  ;;  %v5068_v20 = vpop.permute.xlu0 %5067 }
0x226a   :  { %7535 = vmatpush3.bf16.msra.mxu0 %v7534_v8 }
0x226b   :  { %7539 = vmatprep.subr.bf16.mxu0 %v8101_v34 }
0x226c   :  { %v7930_v13 = vpop.eup %7929 }
0x226d   :  { %v4908_v16 = vmul.f32 %v7930_v13, %v7926_v52  ;;  %7293 = vmatmul.mubr.msk.f32.vlgmr.msra.gmra.mrb[52].mxu0 %vm2983_vm3, %v4907_v12 }
0x226e   :  { %7306 = vmatprep.mubr.msk.f32.mxu0 %vm8086_vm1, %v8085_v33 }
0x226f   :  { %7300 = vmatmul.mubr.msk.f32.vlgmr.msra.gmra.mrb[60].mxu1 %vm2983_vm3, %v4908_v16 }
0x2270   :  { %7546 = vmatpush3.bf16.xpose.msk.msra.mxu1 %vm8798_vm9, %v7544_v17  ;;  %7313 = vmatprep.mubr.msk.f32.mxu1 %vm8086_vm1, %v8085_v33 }
0x2271   :  { %7550 = vmatprep.subr.bf16.mxu1 %v8101_v34 }
0x2273   :  { %7542 = vmatpush3.bf16.xpose.msk.msra.mxu0 %vm8798_vm9, %v7540_v18 }
0x2274   :  { %7547 = vmatprep.subr.bf16.mxu0 %v8101_v34 }
0x2277   :  { %7314 = vmatmul.mubr.msk.f32.vlgmr.msra.gmra.mrb[62].mxu1 %vm293_vm2, %v5150_v19 }
0x2278   :  { %7327 = vmatprep.mubr.msk.f32.mxu1 %vm8086_vm1, %v8085_v33 }
0x227a   :  { %7307 = vmatmul.mubr.msk.f32.vlgmr.msra.gmra.mrb[54].mxu0 %vm293_vm2, %v5068_v20 }
0x227b   :  { %7320 = vmatprep.mubr.msk.f32.mxu0 %vm8086_vm1, %v8085_v33 }
0x2340   :  { %v9018_v21 = vpop.f32.mrb[52].mxu0 }
0x2341   :  { %v7294_v23 = vpop.f32.mrb[53].mxu0 }
0x2342   :  { %v9020_v25 = vpop.f32.mrb[60].mxu1 }
0x2343   :  { %v7301_v4 = vpop.f32.mrb[61].mxu1 }
0x234a   :  { %v5227_v26 = vpop.f32.mrb[62].mxu1 }
0x234b   :  { %v7315_v28 = vpop.f32.mrb[63].mxu1  ;;  %v5234_v10 = vsel %vm2983_vm3, %v5227_v26, -inf }
0x234c   :  { %5235 = vmax.xlane.f32.xlu1 %v5234_v10 }
0x234d   :  { %v5145_v29 = vpop.f32.mrb[54].mxu0 }
0x234e   :  { %v7308_v30 = vpop.f32.mrb[55].mxu0  ;;  %v5231_v22 = vsel %vm2983_vm3, %v5145_v29, -inf }
0x234f   :  { %5232 = vmax.xlane.f32.xlu0 %v5231_v22 }
0x235d   :  { %7775 = vrot.lane.b32.xlu1 %v8807_v54, %s8096_s24 }
0x2361   :  { %7780 = vrot.lane.b32.xlu1 %v8802_v48, %s9412_s13 }
0x2365   :  { %7785 = vrot.lane.b32.xlu1 %v8807_v54, %s9412_s13 }
0x2369   :  { %5493 = vrot.lane.b32.xlu1 %v8816_v55, %s9412_s13 }
0x23d9   :  { %v5236_v63 = vpop.xlane.xlu1 %5235 }
0x23da   :  { %v5238_v32 = vsub.f32 %v5227_v26, %v5236_v63 }
0x23dc   :  { %v5233_v35 = vpop.xlane.xlu0 %5232  ;;  %v5241_v6 = vmul.f32 1.442695, %v5238_v32 }
0x23dd   :  { %v7776_v39 = vpop.permute.xlu1 %7775  ;;  %v5237_v42 = vsub.f32 %v5145_v29, %v5233_v35 }
0x23de   :  { %v7778_v50 = vunpack.i.h.bf16 %v7776_v39  ;;  %v7777_v27 = vunpack.i.l.bf16 %v7776_v39 }
0x23df   :  { %v5239_v46 = vmul.f32 1.442695, %v5237_v42 }
0x23e0   :  { %v7551_v47 = vpack.c.bf16 %v7778_v50, %v7777_v27 }
0x23e1   :  { %7931 = vpow2.f32 %v5239_v46  ;;  %v7781_v59 = vpop.permute.xlu1 %7780 }
0x23e2   :  { %7552 = vmatpush3.bf16.msra.mxu1 %v7551_v47  ;;  %7933 = vpow2.f32 %v5241_v6  ;;  %v7783_v14 = vunpack.i.h.bf16 %v7781_v59  ;;  %v7782_v62 = vunpack.i.l.bf16 %v7781_v59 }
0x23e3   :  { %7557 = vmatprep.subr.bf16.mxu1 %v8101_v34 }
0x23e4   :  { %v7554_v18 = vpack.c.bf16 %v7783_v14, %v7782_v62 }
0x23e5   :  { %v7786_v3 = vpop.permute.xlu1 %7785 }
0x23e6   :  { %v7788_v9 = vunpack.i.h.bf16 %v7786_v3  ;;  %v7787_v11 = vunpack.i.l.bf16 %v7786_v3 }
0x23e8   :  { %v7558_v17 = vpack.c.bf16 %v7788_v9, %v7787_v11 }
0x23e9   :  { %v5494_v19 = vpop.permute.xlu1 %5493 }
0x23eb   :  { %v7932_v49 = vpop.eup %7931 }
0x23ec   :  { %v5243_v51 = vsel %vm2983_vm3, %v7932_v49, 0.0  ;;  %v7934_v52 = vpop.eup %7933 }
0x23ed   :  { %5244 = vadd.xlane.f32.xlu0 %v5243_v51  ;;  %v5246_v53 = vsel %vm2983_vm3, %v7934_v52, 0.0 }
0x23f1   :  { %5247 = vadd.xlane.f32.xlu0 %v5246_v53 }
0x2407   :  { %7770 = vrot.lane.b32.xlu0 %v8802_v48, %s8096_s24 }
0x240b   :  { %5411 = vrot.lane.b32.xlu0 %v8794_v43, %s9412_s13  ;;  %s9417_s13 = sld [smem:[#allocation22_spill]] }
0x2411   :  { %v6701_v56 = vld [vmem:[%s9417_s13] ss:$0 sm:$0xff] }
0x247a   :  { %v5245_v58 = vpop.xlane.xlu0 %5244 }
0x247b   :  { %7935 = vrcp.f32 %v5245_v58 }
0x247e   :  { %v5248_v60 = vpop.xlane.xlu0 %5247 }
0x247f   :  { %7937 = vrcp.f32 %v5248_v60 }
0x2482   :  { %v7771_v2 = vpop.permute.xlu0 %7770 }
0x2483   :  { %v7773_v0 = vunpack.i.h.bf16 %v7771_v2  ;;  %v7772_v1 = vunpack.i.l.bf16 %v7771_v2 }
0x2485   :  { %v7936_v5 = vpop.eup %7935  ;;  %v7548_v8 = vpack.c.bf16 %v7773_v0, %v7772_v1 }
0x2486   :  { %v5251_v12 = vmul.f32 %v7936_v5, %v7932_v49  ;;  %v5412_v20 = vpop.permute.xlu0 %5411 }
0x2487   :  { %7549 = vmatpush3.bf16.msra.mxu0 %v7548_v8 }
0x2488   :  { %7553 = vmatprep.subr.bf16.mxu0 %v8101_v34 }
0x2489   :  { %v7938_v13 = vpop.eup %7937 }
0x248a   :  { %v5252_v16 = vmul.f32 %v7938_v13, %v7934_v52  ;;  %7321 = vmatmul.mubr.msk.f32.vlgmr.msra.gmra.mrb[56].mxu0 %vm2983_vm3, %v5251_v12 }
0x248b   :  { %7334 = vmatprep.mubr.msk.f32.mxu0 %vm8086_vm1, %v8085_v33 }
0x248c   :  { %7328 = vmatmul.mubr.msk.f32.vlgmr.msra.gmra.mrb[64].mxu1 %vm2983_vm3, %v5252_v16 }
0x248d   :  { %7560 = vmatpush3.bf16.xpose.msk.msra.mxu1 %vm8798_vm9, %v7558_v17  ;;  %7341 = vmatprep.mubr.msk.f32.mxu1 %vm8086_vm1, %v8085_v33 }
0x248e   :  { %7564 = vmatprep.subr.bf16.mxu1 %v8101_v34 }
0x2490   :  { %7556 = vmatpush3.bf16.xpose.msk.msra.mxu0 %vm8798_vm9, %v7554_v18 }
0x2491   :  { %7561 = vmatprep.subr.bf16.mxu0 %v8101_v34 }
0x2494   :  { %7342 = vmatmul.mubr.msk.f32.vlgmr.msra.gmra.mrb[66].mxu1 %vm293_vm2, %v5494_v19 }
0x2495   :  { %7355 = vmatprep.mubr.msk.f32.mxu1 %vm8086_vm1, %v8085_v33 }
0x2497   :  { %7335 = vmatmul.mubr.msk.f32.vlgmr.msra.gmra.mrb[58].mxu0 %vm293_vm2, %v5412_v20 }
0x2498   :  { %7348 = vmatprep.mubr.msk.f32.mxu0 %vm8086_vm1, %v8085_v33 }
0x255d   :  { %v9058_v23 = vpop.f32.mrb[56].mxu0 }
0x255e   :  { %v7322_v4 = vpop.f32.mrb[57].mxu0 }
0x255f   :  { %v9060_v26 = vpop.f32.mrb[64].mxu1 }
0x2560   :  { %v7329_v28 = vpop.f32.mrb[65].mxu1 }
0x2567   :  { %v5571_v10 = vpop.f32.mrb[66].mxu1 }
0x2568   :  { %v7343_v29 = vpop.f32.mrb[67].mxu1  ;;  %v5578_v30 = vsel %vm2983_vm3, %v5571_v10, -inf }
0x2569   :  { %5579 = vmax.xlane.f32.xlu1 %v5578_v30 }
0x256a   :  { %v5489_v22 = vpop.f32.mrb[58].mxu0 }
0x256b   :  { %v7336_v63 = vpop.f32.mrb[59].mxu0  ;;  %v5575_v32 = vsel %vm2983_vm3, %v5489_v22, -inf }
0x256c   :  { %5576 = vmax.xlane.f32.xlu0 %v5575_v32 }
0x257a   :  { %7795 = vrot.lane.b32.xlu1 %v8807_v54, %s9413_s15 }
0x257e   :  { %7800 = vrot.lane.b32.xlu1 %v8802_v48, %s9414_s1 }
0x2582   :  { %7805 = vrot.lane.b32.xlu1 %v8807_v54, %s9414_s1 }
0x2586   :  { %5837 = vrot.lane.b32.xlu1 %v8816_v55, %s9414_s1 }
0x25f6   :  { %v5580_v35 = vpop.xlane.xlu1 %5579 }
0x25f7   :  { %v5582_v39 = vsub.f32 %v5571_v10, %v5580_v35 }
0x25f9   :  { %v5577_v42 = vpop.xlane.xlu0 %5576  ;;  %v5585_v47 = vmul.f32 1.442695, %v5582_v39 }
0x25fa   :  { %v7796_v50 = vpop.permute.xlu1 %7795  ;;  %v5581_v27 = vsub.f32 %v5489_v22, %v5577_v42 }
0x25fb   :  { %v7798_v6 = vunpack.i.h.bf16 %v7796_v50  ;;  %v7797_v46 = vunpack.i.l.bf16 %v7796_v50 }
0x25fc   :  { %v5583_v49 = vmul.f32 1.442695, %v5581_v27 }
0x25fd   :  { %v7565_v51 = vpack.c.bf16 %v7798_v6, %v7797_v46 }
0x25fe   :  { %7939 = vpow2.f32 %v5583_v49  ;;  %v7801_v60 = vpop.permute.xlu1 %7800 }
0x25ff   :  { %7566 = vmatpush3.bf16.msra.mxu1 %v7565_v51  ;;  %7941 = vpow2.f32 %v5585_v47  ;;  %v7803_v62 = vunpack.i.h.bf16 %v7801_v60 }
0x2600   :  { %7571 = vmatprep.subr.bf16.mxu1 %v8101_v34 }
0x2602   :  { %v7806_v5 = vpop.permute.xlu1 %7805 }
0x2603   :  { %v7808_v11 = vunpack.i.h.bf16 %v7806_v5  ;;  %v7807_v12 = vunpack.i.l.bf16 %v7806_v5 }
0x2605   :  { %v7572_v17 = vpack.c.bf16 %v7808_v11, %v7807_v12 }
0x2606   :  { %v5838_v19 = vpop.permute.xlu1 %5837 }
0x2608   :  { %v7940_v52 = vpop.eup %7939 }
0x2609   :  { %v5587_v53 = vsel %vm2983_vm3, %v7940_v52, 0.0  ;;  %v7942_v58 = vpop.eup %7941 }
0x260a   :  { %5588 = vadd.xlane.f32.xlu0 %v5587_v53  ;;  %v5590_v55 = vsel %vm2983_vm3, %v7942_v58, 0.0 }
0x260e   :  { %5591 = vadd.xlane.f32.xlu0 %v5590_v55 }
0x2624   :  { %7790 = vrot.lane.b32.xlu0 %v8802_v48, %s9413_s15 }
0x2628   :  { %5755 = vrot.lane.b32.xlu0 %v8794_v43, %s9414_s1  ;;  %v7802_v43 = vunpack.i.l.bf16 %v7801_v60 }
0x262a   :  { %v7568_v18 = vpack.c.bf16 %v7803_v62, %v7802_v43 }
0x2697   :  { %v5589_v59 = vpop.xlane.xlu0 %5588 }
0x2698   :  { %7943 = vrcp.f32 %v5589_v59  ;;  %v6171_v59 = vld [vmem:[#allocation8 + $0x10] sm:$0xff] }
0x269b   :  { %v5592_v2 = vpop.xlane.xlu0 %5591 }
0x269c   :  { %7945 = vrcp.f32 %v5592_v2  ;;  %v6172_v2 = vld [vmem:[#allocation8 + $0x18] sm:$0xff] }
0x269f   :  { %v7791_v0 = vpop.permute.xlu0 %7790 }
0x26a0   :  { %v7793_v1 = vunpack.i.h.bf16 %v7791_v0  ;;  %v7792_v3 = vunpack.i.l.bf16 %v7791_v0  ;;  %v7585_v0 = vpack.c.bf16 %v6172_v2, %v6171_v59  ;;  %v6316_v2 = vld [vmem:[%s9378_s18 + $0x18] sm:$0xff] }
0x26a2   :  { %v7944_v8 = vpop.eup %7943  ;;  %v7562_v9 = vpack.c.bf16 %v7793_v1, %v7792_v3  ;;  %v6173_v1 = vld [vmem:[#allocation8 + $0x20] sm:$0xff]  ;;  %v6174_v3 = vld [vmem:[#allocation8 + $0x28] sm:$0xff] }
0x26a3   :  { %v5595_v13 = vmul.f32 %v7944_v8, %v7940_v52  ;;  %v5756_v20 = vpop.permute.xlu0 %5755  ;;  %v7589_v5 = vpack.c.bf16 %v6174_v3, %v6173_v1  ;;  %v6175_v8 = vld [vmem:[#allocation8 + $0x30] sm:$0xff]  ;;  %v6315_v3 = vld [vmem:[%s9378_s18 + $0x10] sm:$0xff] }
0x26a4   :  { %7563 = vmatpush3.bf16.msra.mxu0 %v7562_v9  ;;  %v6176_v9 = vld [vmem:[#allocation8 + $0x38] sm:$0xff]  ;;  %v6313_v1 = vld [vmem:[%s9378_s18] sm:$0xff] }
0x26a5   :  { %7567 = vmatprep.subr.bf16.mxu0 %v8101_v34  ;;  %v7593_v11 = vpack.c.bf16 %v6176_v9, %v6175_v8  ;;  %v6318_v8 = vld [vmem:[%s9378_s18 + $0x28] sm:$0xff]  ;;  %v6320_v9 = vld [vmem:[%s9378_s18 + $0x38] sm:$0xff] }
0x26a6   :  { %v7946_v14 = vpop.eup %7945 }
0x26a7   :  { %v5596_v16 = vmul.f32 %v7946_v14, %v7942_v58  ;;  %7349 = vmatmul.mubr.msk.f32.vlgmr.msra.gmra.mrb[60].mxu0 %vm2983_vm3, %v5595_v13 }
0x26a8   :  { %7362 = vmatprep.mubr.msk.f32.mxu0 %vm8086_vm1, %v8085_v33 }
0x26a9   :  { %7356 = vmatmul.mubr.msk.f32.vlgmr.msra.gmra.mrb[68].mxu1 %vm2983_vm3, %v5596_v16 }
0x26aa   :  { %7574 = vmatpush3.bf16.xpose.msk.msra.mxu1 %vm8798_vm9, %v7572_v17  ;;  %7369 = vmatprep.mubr.msk.f32.mxu1 %vm8086_vm1, %v8085_v33 }
0x26ab   :  { %7578 = vmatprep.subr.bf16.mxu1 %v8101_v34 }
0x26ad   :  { %7570 = vmatpush3.bf16.xpose.msk.msra.mxu0 %vm8798_vm9, %v7568_v18 }
0x26ae   :  { %7575 = vmatprep.subr.bf16.mxu0 %v8101_v34 }
0x26b1   :  { %7370 = vmatmul.mubr.msk.f32.vlgmr.msra.gmra.mrb[70].mxu1 %vm293_vm2, %v5838_v19 }
0x26b2   :  { %7383 = vmatprep.mubr.msk.f32.mxu1 %vm8086_vm1, %v8085_v33 }
0x26b4   :  { %7363 = vmatmul.mubr.msk.f32.vlgmr.msra.gmra.mrb[62].mxu0 %vm293_vm2, %v5756_v20 }
0x26b5   :  { %7376 = vmatprep.mubr.msk.f32.mxu0 %vm8086_vm1, %v8085_v33 }
0x277a   :  { %v5672_v4 = vpop.f32.mrb[60].mxu0 }
0x277b   :  { %v7350_v28 = vpop.f32.mrb[61].mxu0 }
0x277c   :  { %v5751_v10 = vpop.f32.mrb[68].mxu1 }
0x277d   :  { %v7357_v29 = vpop.f32.mrb[69].mxu1 }
0x2784   :  { %v5915_v44 = vpop.f32.mrb[70].mxu1 }
0x2785   :  { %v7371_v30 = vpop.f32.mrb[71].mxu1  ;;  %v5922_v34 = vsel %vm2983_vm3, %v5915_v44, -inf }
0x2786   :  { %5923 = vmax.xlane.f32.xlu1 %v5922_v34 }
0x2787   :  { %v5833_v22 = vpop.f32.mrb[62].mxu0 }
0x2788   :  { %v7364_v63 = vpop.f32.mrb[63].mxu0  ;;  %v5919_v32 = vsel %vm2983_vm3, %v5833_v22, -inf }
0x2789   :  { %5920 = vmax.xlane.f32.xlu0 %v5919_v32 }
0x2797   :  { %7815 = vrot.lane.b32.xlu1 %v8807_v54, %s9415_s28 }
0x279b   :  { %6101 = vrot.lane.b32.xlu1 %v8898_v45, %s9415_s28 }
0x279f   :  { %6103 = vrot.lane.b32.xlu1 %v8900_v31, %s9415_s28 }
0x27a3   :  { %6111 = vrot.lane.b32.xlu1 %v8940_v15, %s9413_s15 }
0x27a7   :  { %6119 = vrot.lane.b32.xlu1 %v8980_v38, %s8096_s24 }
0x27ab   :  { %6127 = vrot.lane.b32.xlu1 %v9020_v25, %s8094_s5 }
0x27af   :  { %6135 = vrot.lane.b32.xlu1 %v9060_v26, %s8092_s21 }
0x27b3   :  { %6143 = vrot.lane.b32.xlu1 %v5751_v10, %s8090_s23 }
0x2813   :  { %v5924_v54 = vpop.xlane.xlu1 %5923 }
0x2814   :  { %v5926_v35 = vsub.f32 %v5915_v44, %v5924_v54 }
0x2816   :  { %v5921_v45 = vpop.xlane.xlu0 %5920  ;;  %v5929_v27 = vmul.f32 1.442695, %v5926_v35 }
0x2817   :  { %v7816_v39 = vpop.permute.xlu1 %7815  ;;  %v5925_v42 = vsub.f32 %v5833_v22, %v5921_v45 }
0x2818   :  { %v7818_v31 = vunpack.i.h.bf16 %v7816_v39  ;;  %v7817_v50 = vunpack.i.l.bf16 %v7816_v39 }
0x2819   :  { %v5927_v15 = vmul.f32 1.442695, %v5925_v42 }
0x281a   :  { %v7579_v6 = vpack.c.bf16 %v7818_v31, %v7817_v50 }
0x281b   :  { %7947 = vpow2.f32 %v5927_v15  ;;  %v6102_v43 = vpop.permute.xlu1 %6101 }
0x281c   :  { %7580 = vmatpush3.bf16.msra.mxu1 %v7579_v6  ;;  %7949 = vpow2.f32 %v5929_v27  ;;  %v6155_v44 = vsel %vm293_vm2, %v8858_v41, %v6102_v43  ;;  %v6324_v43 = vld [vmem:[%s9378_s18 + $0x58] sm:$0xff] }
0x281f   :  { %v6104_v16 = vpop.permute.xlu1 %6103 }
0x2820   :  { %v6156_v22 = vsel %vm293_vm2, %v8860_v7, %v6104_v16  ;;  %v6321_v16 = vld [vmem:[%s9378_s18 + $0x40] sm:$0xff] }
0x2823   :  { %v6112_v18 = vpop.permute.xlu1 %6111 }
0x2824   :  { %v6158_v32 = vsel %vm2983_vm3, %v6156_v22, %v6112_v18  ;;  %v6323_v18 = vld [vmem:[%s9378_s18 + $0x50] sm:$0xff]  ;;  %v6428_v22 = vld [vmem:[%s9380_s20] sm:$0xff] }
0x2825   :  { %v7948_v38 = vpop.eup %7947 }
0x2826   :  { %v5931_v25 = vsel %vm2983_vm3, %v7948_v38, 0.0  ;;  %v7950_v46 = vpop.eup %7949 }
0x2827   :  { %5932 = vadd.xlane.f32.xlu0 %v5931_v25  ;;  %v5934_v26 = vsel %vm2983_vm3, %v7950_v46, 0.0  ;;  %v6120_v20 = vpop.permute.xlu1 %6119  ;;  %v6696_v25 = vld [vmem:[%s9377_s17] ss:$0 sm:$0xff] }
0x2828   :  { %v6160_v45 = vsel %vm2986_vm4, %v6158_v32, %v6120_v20  ;;  %v6328_v20 = vld [vmem:[%s9378_s18 + $0x78] sm:$0xff]  ;;  %v6429_v32 = vld [vmem:[%s9380_s20 + $0x8] sm:$0xff] }
0x282b   :  { %5935 = vadd.xlane.f32.xlu0 %v5934_v26  ;;  %v6128_v28 = vpop.permute.xlu1 %6127 }
0x282c   :  { %v6162_v42 = vsel %vm2989_vm5, %v6160_v45, %v6128_v28  ;;  %v7615_v45 = vpack.c.bf16 %v6429_v32, %v6428_v22  ;;  %v6442_v22 = vld [vmem:[%s9380_s20 + $0x70] sm:$0xff] }
0x282f   :  { %v6136_v29 = vpop.permute.xlu1 %6135 }
0x2830   :  { %v6164_v50 = vsel %vm2992_vm6, %v6162_v42, %v6136_v29  ;;  %v6327_v29 = vld [vmem:[%s9378_s18 + $0x70] sm:$0xff] }
0x2831   :  { %v6430_v42 = vld [vmem:[%s9380_s20 + $0x10] sm:$0xff] }
0x2833   :  { %v6144_v54 = vpop.permute.xlu1 %6143 }
0x2834   :  { %v6166_v27 = vsel %vm2995_vm7, %v6164_v50, %v6144_v54  ;;  %v6446_v54 = vld [vmem:[%s9380_s20 + $0x90] sm:$0xff]  ;;  %v6449_v50 = vld [vmem:[%s9380_s20 + $0xa8] sm:$0xff] }
0x2841   :  { %7810 = vrot.lane.b32.xlu0 %v8802_v48, %s9415_s28 }
0x2845   :  { %6109 = vrot.lane.b32.xlu0 %v8938_v40, %s9413_s15  ;;  %s8102_s15 = smov [#allocation10]  }
0x2846   :  { %s6551_s1 = sshll.u32 %s8102_s15, 4  ;;  %s6552_s1 = int_to_ptr.vmem [resolvable:$true] %s6551_s1 }
0x2847   :  { %p8054_p5 = scmp.lt.s32.totalorder %s6552_s1, %s6552_s1 }
0x2849   :  { %6117 = vrot.lane.b32.xlu0 %v8978_v24, %s8096_s24  ;;  %s9416_s24 = sld [smem:[#allocation21_spill]] }
0x284d   :  { %6125 = vrot.lane.b32.xlu0 %v9018_v21, %s8094_s5  ;;  %v6169_v21 = vld [vmem:[#allocation8] sm:$0xff] }
0x2851   :  { %6133 = vrot.lane.b32.xlu0 %v9058_v23, %s8092_s21  ;;  %v6170_v23 = vld [vmem:[#allocation8 + $0x8] sm:$0xff] }
0x2852   :  { %v7581_v60 = vpack.c.bf16 %v6170_v23, %v6169_v21 }
0x2855   :  { %6141 = vrot.lane.b32.xlu0 %v5672_v4, %s8090_s23 }
0x28b4   :  { %v5933_v47 = vpop.xlane.xlu0 %5932 }
0x28b5   :  { %7951 = vrcp.f32 %v5933_v47 }
0x28b8   :  { %v5936_v49 = vpop.xlane.xlu0 %5935 }
0x28b9   :  { %7953 = vrcp.f32 %v5936_v49 }
0x28bc   :  { %v7811_v51 = vpop.permute.xlu0 %7810 }
0x28bd   :  { %v7813_v48 = vunpack.i.h.bf16 %v7811_v51  ;;  %v7812_v52 = vunpack.i.l.bf16 %v7811_v51 }
0x28bf   :  { %v7952_v53 = vpop.eup %7951  ;;  %v7576_v40 = vpack.c.bf16 %v7813_v48, %v7812_v52 }
0x28c0   :  { %v5939_v58 = vmul.f32 %v7952_v53, %v7948_v38  ;;  %v6110_v17 = vpop.permute.xlu0 %6109 }
0x28c1   :  { %7577 = vmatpush3.bf16.msra.mxu0 %v7576_v40  ;;  %v6157_v30 = vsel %vm2983_vm3, %v6155_v44, %v6110_v17 }
0x28c2   :  { %7582 = vmatprep.subr.bf16.mxu0 %v7581_v60 }
0x28c3   :  { %v7954_v24 = vpop.eup %7953 }
0x28c4   :  { %v5940_v55 = vmul.f32 %v7954_v24, %v7950_v46  ;;  %7377 = vmatmul.mubr.msk.f32.vlgmr.msra.gmra.mrb[64].mxu0 %vm2983_vm3, %v5939_v58  ;;  %v6118_v19 = vpop.permute.xlu0 %6117 }
0x28c5   :  { %7584 = vmatpush3.bf16.msra.mxu0 %v7581_v60  ;;  %v6159_v63 = vsel %vm2986_vm4, %v6157_v30, %v6118_v19  ;;  %v6314_v60 = vld [vmem:[%s9378_s18 + $0x8] sm:$0xff]  ;;  %v6444_v30 = vld [vmem:[%s9380_s20 + $0x80] sm:$0xff] }
0x28c6   :  { %7384 = vmatmul.mubr.msk.f32.vlgmr.msra.gmra.mrb[72].mxu1 %vm2983_vm3, %v5940_v55  ;;  %7586 = vmatprep.subr.bf16.mxu0 %v7585_v0  ;;  %v6326_v19 = vld [vmem:[%s9378_s18 + $0x68] sm:$0xff] }
0x28c7   :  { %6411 = vmatprep.mubr.f32.mxu1 %v8085_v33  ;;  %v7609_v28 = vpack.c.bf16 %v6328_v20, %v6326_v19 }
0x28c8   :  { %v6126_v4 = vpop.permute.xlu0 %6125 }
0x28c9   :  { %7588 = vmatpush3.bf16.msra.mxu0 %v7585_v0  ;;  %v6161_v35 = vsel %vm2989_vm5, %v6159_v63, %v6126_v4  ;;  %v7597_v0 = vpack.c.bf16 %v6316_v2, %v6314_v60  ;;  %v7607_v4 = vpack.c.bf16 %v6323_v18, %v6321_v16  ;;  %v6438_v2 = vld [vmem:[%s9380_s20 + $0x50] sm:$0xff]  ;;  %v6697_v16 = vld [vmem:[%s9416_s24] ss:$0 sm:$0xff] }
0x28ca   :  { %7590 = vmatprep.subr.bf16.mxu0 %v7589_v5  ;;  %v6698_v18 = vld [vmem:[%s9367_s7] ss:$0 sm:$0xff] }
0x28cb   :  { %7598 = vmatprep.subr.bf16.mxu1 %v7597_v0  ;;  %v6439_v0 = vld [vmem:[%s9380_s20 + $0x58] sm:$0xff] }
0x28cc   :  { %v6134_v10 = vpop.permute.xlu0 %6133 }
0x28cd   :  { %7592 = vmatpush3.bf16.msra.mxu0 %v7589_v5  ;;  %v6163_v39 = vsel %vm2992_vm6, %v6161_v35, %v6134_v10  ;;  %v7599_v5 = vpack.c.bf16 %v6315_v3, %v6313_v1  ;;  %v6325_v10 = vld [vmem:[%s9378_s18 + $0x60] sm:$0xff]  ;;  %v6447_v35 = vld [vmem:[%s9380_s20 + $0x98] sm:$0xff]  ;;  %v6457_v3 = vld [vmem:[%s9380_s20 + $0xe8] sm:$0xff] }
0x28ce   :  { %7594 = vmatprep.subr.bf16.mxu0 %v7593_v11  ;;  %v7611_v44 = vpack.c.bf16 %v6327_v29, %v6325_v10  ;;  %v6456_v1 = vld [vmem:[%s9380_s20 + $0xe0] sm:$0xff] }
0x28cf   :  { %7600 = vmatpush1.bf16.msra.mxu1 %v7599_v5  ;;  %v7635_v5 = vpack.c.bf16 %v6439_v0, %v6438_v2 }
0x28d0   :  { %v6142_v34 = vpop.permute.xlu0 %6141 }
0x28d1   :  { %7596 = vmatpush3.bf16.msra.mxu0 %v7593_v11  ;;  %v6165_v41 = vsel %vm2995_vm7, %v6163_v39, %v6142_v34  ;;  %v7601_v11 = vpack.c.bf16 %v6320_v9, %v6318_v8  ;;  %v6445_v34 = vld [vmem:[%s9380_s20 + $0x88] sm:$0xff]  ;;  %v7617_v39 = vpack.c.bf16 %v6447_v35, %v6446_v54  ;;  %v7637_v8 = vpack.c.bf16 %v6457_v3, %v6456_v1  ;;  %v6329_v54 = vld [vmem:[%s9379_s19] sm:$0x3] }
0x28d2   :  { %v7613_v63 = vpack.c.bf16 %v6445_v34, %v6444_v30  ;;  %v6334_v35 = vrot.slane %v6329_v54, %v199_v57 }
0x28d3   :  { %7602 = vmatprep.subr.bf16.mxu1 %v7601_v11 }
0x28d4   :  { %7614 = vmatprep.subr.bf16.mxu0 %v7613_v63  ;;  %v6443_v63 = vld [vmem:[%s9380_s20 + $0x78] sm:$0xff] }
0x28d5   :  { %v7643_v32 = vpack.c.bf16 %v6443_v63, %v6442_v22 }
0x2997   :  { %v6016_v12 = vpop.f32.mrb[64].mxu0 }
0x2998   :  { %6149 = vrot.lane.b32.xlu0 %v6016_v12, %s8088_s9  ;;  %v7378_v13 = vpop.f32.mrb[65].mxu0  ;;  %v6317_v12 = vld [vmem:[%s9378_s18 + $0x20] sm:$0xff] }
0x2999   :  { %v6095_v14 = vpop.f32.mrb[72].mxu1  ;;  %v6319_v13 = vld [vmem:[%s9378_s18 + $0x30] sm:$0xff] }
0x299a   :  { %6151 = vrot.lane.b32.xlu1 %v6095_v14, %s8088_s9  ;;  %v7385_v62 = vpop.f32.mrb[73].mxu1  ;;  %v7603_v14 = vpack.c.bf16 %v6319_v13, %v6317_v12  ;;  %s8049_s9 = scalar_lea.vmem %s6552_s1, 256 }
0x299b   :  { %v6322_v62 = vld [vmem:[%s9378_s18 + $0x48] sm:$0xff]  ;;  %p8050_p4 = scmp.ne.s32.totalorder %s6552_s1, %s8049_s9  ;;  %p8055_p6 = scmp.lt.s32.totalorder %s8049_s9, %s8049_s9 }
0x299c   :  { %v7605_v17 = vpack.c.bf16 %v6324_v43, %v6322_v62  ;;  %7604 = vmatpush1.bf16.msra.mxu1 %v7603_v14 }
0x299d   :  { %p8056_p7 = por %p8055_p6, %p8054_p5 }
0x299e   :  { %7606 = vmatprep.subr.bf16.mxu1 %v7605_v17 }
0x299f   :  { %p8057_p8 = pnand %p8056_p7, %p8050_p4 }
0x29a0   :  { %7608 = vmatpush1.bf16.msra.mxu1 %v7607_v4 }
0x29a1   :  { %7610 = vmatprep.subr.bf16.mxu1 %v7609_v28 }
0x29a4   :  { %7612 = vmatpush1.bf16.msra.mxu1 %v7611_v44  ;;  %v6441_v44 = vld [vmem:[%s9380_s20 + $0x68] sm:$0xff] }
0x2a0a   :  { %v6150_v31 = vpop.permute.xlu0 %6149 }
0x2a0b   :  { %v6167_v7 = vsel %vm2998_vm8, %v6165_v41, %v6150_v31  ;;  %v6431_v41 = vld [vmem:[%s9380_s20 + $0x18] sm:$0xff]  ;;  %v6448_v31 = vld [vmem:[%s9380_s20 + $0xa0] sm:$0xff] }
0x2a0c   :  { %v6152_v15 = vpop.permute.xlu1 %6151  ;;  %7402 = vmatprep.mubr.msk.f32.mxu0 %vm135_vm0, %v6167_v7  ;;  %v7619_v7 = vpack.c.bf16 %v6431_v41, %v6430_v42 }
0x2a0d   :  { %v6168_v6 = vsel %vm2998_vm8, %v6166_v27, %v6152_v15  ;;  %v7621_v27 = vpack.c.bf16 %v6449_v50, %v6448_v31  ;;  %v6432_v15 = vld [vmem:[%s9380_s20 + $0x20] sm:$0xff] }
0x2a0e   :  { %7403 = vmatmul.mubr.msk.f32.vlgmr.msra.gmra.mrb[66].mxu0 %vm135_vm0, %v6168_v6  ;;  %v6433_v6 = vld [vmem:[%s9380_s20 + $0x28] sm:$0xff] }
0x2a0f   :  { %7616 = vmatpush3.bf16.msra.mxu0 %v7615_v45  ;;  %v6338_v45 = vrot.slane %v6329_v54, %v203_v61 }
0x2a10   :  { %7618 = vmatprep.subr.bf16.mxu0 %v7617_v39 }
0x2a13   :  { %7620 = vmatpush3.bf16.msra.mxu0 %v7619_v7 }
0x2a14   :  { %7622 = vmatprep.subr.bf16.mxu0 %v7621_v27 }
0x2ae1   :  { %v7404_v38 = vpop.f32.mrb[66].mxu0 }
0x2ae2   :  { %v6259_v46 = vadd.f32 %v7404_v38, %v8736_v36  ;;  %v6249_v26 = vpop.f32.mrb[67].mxu0  ;;  %v6450_v38 = vld [vmem:[%s9380_s20 + $0xb0] sm:$0xff] }
0x2ae3   :  { %v6258_v47 = vadd.f32 %v6249_v26, %v8738_v37 }
0x2ae4   :  { %v9156_v49 = vadd.f32 %v6696_v25, %v6259_v46  ;;  %v7623_v46 = vpack.c.bf16 %v6433_v6, %v6432_v15 }
0x2ae5   :  { %v9158_v51 = vadd.f32 %v6696_v25, %v6258_v47  ;;  %v6451_v25 = vld [vmem:[%s9380_s20 + $0xb8] sm:$0xff]  ;;  %v6434_v47 = vld [vmem:[%s9380_s20 + $0x30] sm:$0xff] }
0x2ae6   :  { %v6274_v48 = vsel %vm135_vm0, %v9156_v49, 0.0  ;;  %v7625_v26 = vpack.c.bf16 %v6451_v25, %v6450_v38  ;;  %7624 = vmatpush3.bf16.msra.mxu0 %v7623_v46 }
0x2ae7   :  { %6275 = vadd.xlane.f32.xlu1 %v6274_v48  ;;  %v6271_v52 = vsel %vm135_vm0, %v9158_v51, 0.0  ;;  %v6435_v48 = vld [vmem:[%s9380_s20 + $0x38] sm:$0xff] }
0x2ae8   :  { %6272 = vadd.xlane.f32.xlu0 %v6271_v52  ;;  %v6452_v52 = vld [vmem:[%s9380_s20 + $0xc0] sm:$0xff]  ;;  %7626 = vmatprep.subr.bf16.mxu0 %v7625_v26 }
0x2b74   :  { %v6276_v53 = vpop.xlane.xlu1 %6275 }
0x2b75   :  { %v6278_v40 = vmul.f32 0.015625, %v6276_v53  ;;  %v6273_v58 = vpop.xlane.xlu0 %6272  ;;  %v6453_v53 = vld [vmem:[%s9380_s20 + $0xc8] sm:$0xff] }
0x2b76   :  { %v6277_v24 = vmul.f32 0.015625, %v6273_v58  ;;  %v7629_v58 = vpack.c.bf16 %v6453_v53, %v6452_v52 }
0x2b77   :  { %v9165_v36 = vsub.f32 %v9156_v49, %v6278_v40  ;;  %v7627_v40 = vpack.c.bf16 %v6435_v48, %v6434_v47 }
0x2b78   :  { %v9168_v37 = vsub.f32 %v9158_v51, %v6277_v24  ;;  %v6436_v24 = vld [vmem:[%s9380_s20 + $0x40] sm:$0xff] }
0x2b79   :  { %v6282_v23 = vmul.f32 %v9165_v36, %v9165_v36  ;;  %7628 = vmatpush3.bf16.msra.mxu0 %v7627_v40 }
0x2b7a   :  { %v6281_v55 = vmul.f32 %v9168_v37, %v9168_v37  ;;  %7630 = vmatprep.subr.bf16.mxu0 %v7629_v58 }
0x2b7b   :  { %v6286_v59 = vsel %vm135_vm0, %v6282_v23, 0.0  ;;  %v6455_v23 = vld [vmem:[%s9380_s20 + $0xd8] sm:$0xff] }
0x2b7c   :  { %v6283_v21 = vsel %vm135_vm0, %v6281_v55, 0.0  ;;  %v6437_v55 = vld [vmem:[%s9380_s20 + $0x48] sm:$0xff] }
0x2b7d   :  { %6284 = vadd.xlane.f32.xlu0 %v6283_v21  ;;  %v6454_v21 = vld [vmem:[%s9380_s20 + $0xd0] sm:$0xff] }
0x2b7e   :  { %v7633_v60 = vpack.c.bf16 %v6455_v23, %v6454_v21 }
0x2b81   :  { %6287 = vadd.xlane.f32.xlu0 %v6286_v59  ;;  %v7631_v59 = vpack.c.bf16 %v6437_v55, %v6436_v24 }
0x2b83   :  { %7632 = vmatpush3.bf16.msra.mxu0 %v7631_v59 }
0x2b84   :  { %7634 = vmatprep.subr.bf16.mxu0 %v7633_v60 }
0x2b87   :  { %7636 = vmatpush3.bf16.msra.mxu0 %v7635_v5 }
0x2b88   :  { %7638 = vmatprep.subr.bf16.mxu0 %v7637_v8 }
0x2c0a   :  { %v6285_v9 = vpop.xlane.xlu0 %6284 }
0x2c0b   :  { %v6289_v11 = vmul.f32 0.015625, %v6285_v9 }
0x2c0d   :  { %v6291_v12 = vadd.f32 1e-05, %v6289_v11 }
0x2c0e   :  { %v6288_v13 = vpop.xlane.xlu0 %6287 }
0x2c0f   :  { %7955 = vrsqrt.f32 %v6291_v12  ;;  %v6290_v14 = vmul.f32 0.015625, %v6288_v13 }
0x2c11   :  { %v6292_v62 = vadd.f32 1e-05, %v6290_v14 }
0x2c13   :  { %7957 = vrsqrt.f32 %v6292_v62 }
0x2c19   :  { %v7956_v43 = vpop.eup %7955 }
0x2c1a   :  { %v6295_v17 = vmul.f32 %v7956_v43, %v9168_v37  ;;  %v6440_v37 = vld [vmem:[%s9380_s20 + $0x60] sm:$0xff] }
0x2c1b   :  { %v7639_v30 = vpack.c.bf16 %v6441_v44, %v6440_v37 }
0x2c1c   :  { %v6303_v19 = vmul.f32 %v6697_v16, %v6295_v17 }
0x2c1d   :  { %v7958_v20 = vpop.eup %7957  ;;  %7640 = vmatpush3.bf16.msra.mxu0 %v7639_v30 }
0x2c1e   :  { %v6311_v4 = vadd.f32 %v6698_v18, %v6303_v19  ;;  %v6296_v28 = vmul.f32 %v7958_v20, %v9165_v36  ;;  %v6458_v36 = vld [vmem:[%s9380_s20 + $0xf0] sm:$0xff] }
0x2c20   :  { %6699 = vmatmul.mubr.msk.f32.vlgmr.msra.gmra.mrb[74].mxu1 %vm135_vm0, %v6311_v4  ;;  %v6304_v10 = vmul.f32 %v6697_v16, %v6296_v28 }
0x2c21   :  { %6417 = vmatprep.mubr.f32.mxu1 %v8085_v33  ;;  %v6459_v33 = vld [vmem:[%s9380_s20 + $0xf8] sm:$0xff] }
0x2c22   :  { %v6312_v29 = vadd.f32 %v6698_v18, %v6304_v10  ;;  %v7641_v34 = vpack.c.bf16 %v6459_v33, %v6458_v36 }
0x2c24   :  { %6700 = vmatmul.mubr.msk.f32.gmra.mrb[76].mxu1 %vm135_vm0, %v6312_v29  ;;  %7642 = vmatprep.subr.bf16.mxu0 %v7641_v34 }
0x2c25   :  { %7644 = vmatpush3.bf16.msra.mxu0 %v7643_v32 }
0x2cf3   :  { %v6413_v39 = vpop.f32.mrb[74].mxu1 }
0x2cf4   :  { %v6414_v42 = vadd.f32 %v6413_v39, %v6334_v35  ;;  %v6415_v41 = vpop.f32.mrb[75].mxu1 }
0x2cf5   :  { %v6416_v31 = vadd.f32 %v6415_v41, %v6338_v45 }
0x2cf6   :  { %v6424_v27 = vmax.f32 %v6414_v42, 0.0 }
0x2cf7   :  { %v6425_v50 = vmax.f32 %v6416_v31, 0.0  ;;  %v6419_v7 = vpop.f32.mrb[76].mxu1 }
0x2cf8   :  { %v6420_v15 = vadd.f32 %v6419_v7, %v6334_v35  ;;  %v6421_v6 = vpop.f32.mrb[77].mxu1 }
0x2cf9   :  { %v6422_v38 = vadd.f32 %v6421_v6, %v6338_v45  ;;  %6531 = vmatprep.mubr.f32.mxu0 %v6425_v50 }
0x2cfa   :  { %6532 = vmatmul.mubr.f32.vlgmr.msra.gmra.mrb[68].mxu0 %v6424_v27  ;;  %v6426_v46 = vmax.f32 %v6420_v15, 0.0 }
0x2cfb   :  { %v6427_v25 = vmax.f32 %v6422_v38, 0.0 }
0x2cfd   :  { %6536 = vmatprep.mubr.f32.mxu0 %v6427_v25 }
0x2cfe   :  { %6537 = vmatmul.mubr.f32.gmra.mrb[70].mxu0 %v6426_v46 }
0x2dcd   :  { %v6936_v57 = vpop.f32.mrb[68].mxu0 }
0x2dce   :  { %v6937_v61 = vpop.f32.mrb[69].mxu0 }
0x2dcf   :  { %v6938_v26 = vadd.f32 %v6937_v61, %v6936_v57 }
0x2dd1   :  { %v6534_v47 = vadd.f32 %v6938_v26, %v6701_v56  ;;  %v6939_v48 = vpop.f32.mrb[70].mxu0 }
0x2dd2   :  { %v6940_v52 = vpop.f32.mrb[71].mxu0 }
0x2dd3   :  { %v6542_v53 = vadd.f32 %v6534_v47, %v9158_v51  ;;  %v6941_v40 = vadd.f32 %v6940_v52, %v6939_v48 }
0x2dd5   :  { %6544 = vst.msk [vmem:[#allocation10] sm:$0xff] %vm135_vm0, %v6542_v53  ;;  %v6539_v58 = vadd.f32 %v6941_v40, %v6701_v56 }
0x2dd7   :  { %v6543_v24 = vadd.f32 %v6539_v58, %v9156_v49 }
0x2dd9   :  { %6545 = vst.msk [vmem:[#allocation10 + $0x8] sm:$0xff] %vm135_vm0, %v6543_v24 }
0x2dda   :  { %8060 = shalt.err (!%p8057_p8)
}
0x2ddb   :  { %s9418_s3 = sld [smem:[#allocation23_spill]] }
0x2de1   :  { %s8061_s21 = scalar_lea.hbm %s9418_s3, 256 }
0x2de2   :  { %p8062_p9 = scmp.ne.s32.totalorder %s9418_s3, %s8061_s21  ;;  %p8065_p10 = scmp.lt.u32.totalorder %s8061_s21, %s9418_s3 }
0x2de4   :  { %p8067_p11 = pnand %p8065_p10, %p8062_p9 }
0x2de6   :  { %8070 = shalt.err (!%p8067_p11)
}
0x2de7   :  { %s9419_s6 = smov 128  }
0x2de8   :  { %6557 = dma.vmem_to_hbm [thread:$0]  %s6552_s1, 256, %s9418_s3, [#allocation4], %s9419_s6, %s9419_s6, %s9415_s28  }
0x2de9   :  { %8077 = dma.done.wait [#allocation4], 256  }
0x2dea   :  { %8078 = vsyncadd [#allocation4], 4294967040 }
0x2deb   :  { %6561 = vsyncpa [#allocation3], 1 }
0x2dec   :  { %6562 = vsyncpa [#allocation6], 1 }
0x2ded   :  { %6563 = vsyncpa [#allocation9], 1 }
0x2dee   :  { %6564 = vsyncpa [#allocation4], 1 }

</bundles_post_ra>
